<compile_context>
chip_gen: v7x
topology: tpu7x:2x2x1
jax: 0.10.0
libtpu: 0.0.40
codegen_flags: <defaults>
</compile_context>

<pallas_src>
import numpy as np
import jax
import jax.numpy as jnp
from jax import lax
from jax.experimental import pallas as pl
from jax.experimental.pallas import tpu as pltpu

EPS = 1e-8


def _round_up(x, m):
    return ((x + m - 1) // m) * m


def _clamp_vmem_limit(estimate_bytes):
    # Floor at 32 MiB (safe on every generation), cap at 48 MiB so v7x
    # (64 MiB / TensorCore) keeps headroom for compiler-internal scratch.
    return int(min(max(estimate_bytes, 32 << 20), 48 << 20))


# ----------------------------- GRU kernel -----------------------------------

def _make_gru_kernel(Tc, Bp, Dp, Hp, nchunks):
    """Fused fwd/bwd GRU recurrence over one time chunk.

    Grid = (num_dirs, nchunks).  d == 0 runs forward in time, d == 1 backward:
    both the chunk order (via the index_map) and the in-chunk step order are
    mirrored.  The hidden state lives in a VMEM scratch and carries across the
    chunk axis (reset at c == 0 for each direction).
    """
    # Partial unroll: enough for the LLO scheduler, without blowing up
    # instruction memory when Tc grows to 64/128.
    unroll = 8 if Tc % 8 == 0 else True

    def kernel(x_ref, len_ref, wih_ref, whh_ref, b_ref, out_ref, h_scr, gx_scr):
        d = pl.program_id(0)            # 0 = forward, 1 = backward
        c = pl.program_id(1)            # chunk counter (mirrored for backward)

        @pl.when(c == 0)
        def _():
            h_scr[...] = jnp.zeros_like(h_scr)

        whh = whh_ref[0]                # (Hp, 3*Hp)  matmul dtype (bf16)
        lens = len_ref[...]             # (Bp, 1) int32  (hoisted out of loop)

        c_act = c + d * (nchunks - 1 - 2 * c)     # actual chunk index
        t_base = c_act * Tc

        # ---- chunk-level input projection (hoisted off the serial path) ----
        # One MXU-filling matmul with M = Tc*Bp instead of Tc matmuls with
        # M = Bp.  Input-side biases (b_r, b_z, b_ni) are folded in here so
        # they disappear from the per-step critical path.
        x_flat = x_ref[...].reshape(Tc * Bp, Dp)
        gx_all = jnp.dot(x_flat, wih_ref[0], preferred_element_type=jnp.float32)
        gx_scr[...] = (gx_all + b_ref[0, 0:1, :]).reshape(Tc, Bp, 3 * Hp)

        # hidden-side candidate-gate bias, broadcast once per chunk (not per
        # step: JAX does not CSE broadcast_in_dim inside the unrolled loop).
        b_nh = jnp.broadcast_to(b_ref[0, 1:2, 2 * Hp:], (Bp, Hp))

        def step(i, h):
            lt = i + d * (Tc - 1 - 2 * i)          # local step (reversed for bwd)
            t = t_base + lt                        # global time index
            gx = gx_scr[lt]                        # (Bp, 3*Hp) f32, pre-biased
            gh = jnp.dot(h.astype(whh.dtype), whh,
                         preferred_element_type=jnp.float32)
            r = jax.nn.sigmoid(gx[:, 0:Hp] + gh[:, 0:Hp])
            z = jax.nn.sigmoid(gx[:, Hp:2 * Hp] + gh[:, Hp:2 * Hp])
            n = jnp.tanh(gx[:, 2 * Hp:] + r * (gh[:, 2 * Hp:] + b_nh))
            h_new = (1.0 - z) * n + z * h
            mask = lens > t                        # packed-sequence semantics
            out_ref[0, lt] = jnp.where(mask, h_new, 0.0).astype(out_ref.dtype)
            return jnp.where(mask, h_new, h)       # freeze past sequence end

        h_scr[...] = lax.fori_loop(0, Tc, step, h_scr[...], unroll=unroll)

    return kernel


def gru_layer(x_tm, lens_p, dir_weights, *, Tc, Hp, out_dtype):
    """One (bi)GRU layer.  x_tm: (Tp, Bp, Dp) time-major, already padded/cast.

    Returns (num_dirs, Tp, Bp, Hp) in out_dtype (index 0 = fwd, 1 = bwd).
    """
    Tp, Bp, Dp = x_tm.shape
    num_dirs = len(dir_weights)
    nchunks = Tp // Tc

    wih = jnp.stack([w for (w, _, _) in dir_weights])    # (nd, Dp, 3Hp) bf16
    whh = jnp.stack([w for (_, w, _) in dir_weights])    # (nd, Hp, 3Hp) bf16
    bias = jnp.stack([b for (_, _, b) in dir_weights])   # (nd, 2, 3Hp)  f32

    def x_map(d, c):
        return (c + d * (nchunks - 1 - 2 * c), 0, 0)

    def out_map(d, c):
        return (d, c + d * (nchunks - 1 - 2 * c), 0, 0)

    x_bytes = Tc * Bp * Dp * x_tm.dtype.itemsize
    out_bytes = Tc * Bp * Hp * jnp.dtype(out_dtype).itemsize
    w_bytes = (Dp + Hp) * 3 * Hp * 2 + 2 * 3 * Hp * 4 + Bp * 4
    scratch_bytes = Bp * Hp * 4 + Tc * Bp * 3 * Hp * 4
    vmem_limit = _clamp_vmem_limit(2 * (x_bytes + out_bytes + w_bytes)
                                   + scratch_bytes + (4 << 20))

    return pl.pallas_call(
        _make_gru_kernel(Tc, Bp, Dp, Hp, nchunks),
        out_shape=jax.ShapeDtypeStruct((num_dirs, Tp, Bp, Hp), out_dtype),
        grid_spec=pltpu.PrefetchScalarGridSpec(
            num_scalar_prefetch=0,
            grid=(num_dirs, nchunks),
            in_specs=[
                pl.BlockSpec((Tc, Bp, Dp), x_map),                    # x chunk
                pl.BlockSpec((Bp, 1), lambda d, c: (0, 0)),           # lengths
                # Weight/bias block index is constant per direction; Pallas
                # skips the re-DMA when the block index does not change.
                pl.BlockSpec((1, Dp, 3 * Hp), lambda d, c: (d, 0, 0)),
                pl.BlockSpec((1, Hp, 3 * Hp), lambda d, c: (d, 0, 0)),
                pl.BlockSpec((1, 2, 3 * Hp), lambda d, c: (d, 0, 0)),
            ],
            out_specs=pl.BlockSpec((1, Tc, Bp, Hp), out_map),
            scratch_shapes=[pltpu.VMEM((Bp, Hp), jnp.float32),        # h state
                            pltpu.VMEM((Tc, Bp, 3 * Hp), jnp.float32)],  # gx
        ),
        compiler_params=pltpu.CompilerParams(
            # direction axis = independent work -> parallel (two recurrences
            # can land on separate TensorCores on multi-core chips); chunk
            # axis carries the hidden state -> arbitrary.
            # TODO(synk): when num_dirs == 1 (or num_layers > 1), add a batch
            # split as an extra parallel axis so v7x's second TC is not idle.
            dimension_semantics=("parallel", "arbitrary"),
            vmem_limit_bytes=vmem_limit),
    )(x_tm, lens_p, wih, whh, bias)


# --------------------------- weight packing ----------------------------------

def _pad_in_cols(w, segments):
    """Zero-pad the input columns of w = (3H, sum(sizes)) segment-wise."""
    cols, off = [], 0
    for size, padded in segments:
        cols.append(jnp.pad(w[:, off:off + size], ((0, 0), (0, padded - size))))
        off += size
    return cols[0] if len(cols) == 1 else jnp.concatenate(cols, axis=1)


def _pack_dir(wih_cp, whh, bih, bhh, H, Hp, w_dtype):
    """Pad each gate block to Hp, transpose for x @ W layout, fold biases.

    wih_cp: (3H, Dp) with input columns already segment-padded.
    Returns (wih_t (Dp, 3Hp), whh_t (Hp, 3Hp), bias (2, 3Hp)):
      bias[0] = [b_ih_r + b_hh_r, b_ih_z + b_hh_z, b_ih_n]  (folded into gx)
      bias[1] = [0, 0, b_hh_n]                              (hidden-side n bias)
    """
    def gate_cols_t(w_cp):
        return [jnp.pad(w_cp[g * H:(g + 1) * H], ((0, Hp - H), (0, 0))).T
                for g in range(3)]

    whh_cp = jnp.pad(whh, ((0, 0), (0, Hp - H)))          # pad hidden-input cols
    wih_t = jnp.concatenate(gate_cols_t(wih_cp), axis=1)
    whh_t = jnp.concatenate(gate_cols_t(whh_cp), axis=1)

    def pad_b(b):
        return jnp.pad(b, (0, Hp - H))

    bx = jnp.concatenate([pad_b(bih[:H] + bhh[:H]),            # r (folded)
                          pad_b(bih[H:2 * H] + bhh[H:2 * H]),  # z (folded)
                          pad_b(bih[2 * H:])])                 # n: input bias
    bh = jnp.concatenate([jnp.zeros(2 * Hp, jnp.float32),
                          pad_b(bhh[2 * H:])])                 # n: hidden bias
    bias = jnp.stack([bx, bh])                                 # (2, 3Hp)
    return (wih_t.astype(w_dtype), whh_t.astype(w_dtype),
            bias.astype(jnp.float32))


# ------------------------ mean + l2norm epilogue -----------------------------

def _make_finalize_kernel(num_dirs, no_txtnorm):

    def kernel(inv_ref, h_ref, cap_ref, mean_ref):
        t = pl.program_id(0)

        @pl.when(t == 0)
        def _():
            mean_ref[...] = jnp.zeros_like(mean_ref)

        cap = h_ref[0].astype(jnp.float32)                 # (Tt, Bp, Hp)
        if num_dirs == 2:
            cap = (cap + h_ref[1].astype(jnp.float32)) * 0.5
        mean_ref[...] += jnp.sum(cap, axis=0)              # sum of this chunk

        if no_txtnorm:
            cap_ref[...] = cap
        else:
            nrm = jnp.sqrt(jnp.sum(cap * cap, axis=-1, keepdims=True) + EPS) + EPS
            cap_ref[...] = cap / nrm

        @pl.when(t == pl.num_programs(0) - 1)
        def _():
            mean = mean_ref[...] * inv_ref[0]              # / max(lengths)
            if no_txtnorm:
                mean_ref[...] = mean
            else:
                mnrm = jnp.sqrt(jnp.sum(mean * mean, axis=-1, keepdims=True)
                                + EPS) + EPS
                mean_ref[...] = mean / mnrm

    return kernel


def finalize(h_stack, inv_len, no_txtnorm, *, Tt):
    """Fused epilogue: (fwd+bwd)/2, mean over time (/ max(lengths)), l2norms.

    h_stack: (num_dirs, Tp, Bp, Hp) time-major GRU output (bf16).
    inv_len: (1,) f32 = 1 / max(lengths), read from SMEM.
    Returns (cap_tm (Tp, Bp, Hp) f32, mean (Bp, Hp) f32).
    """
    num_dirs, Tp, Bp, Hp = h_stack.shape
    nchunks = Tp // Tt
    est = (2 * (num_dirs * Tt * Bp * Hp * h_stack.dtype.itemsize
                + Tt * Bp * Hp * 4)
           + Bp * Hp * 4 + (4 << 20))
    return pl.pallas_call(
        _make_finalize_kernel(num_dirs, no_txtnorm),
        out_shape=(jax.ShapeDtypeStruct((Tp, Bp, Hp), jnp.float32),
                   jax.ShapeDtypeStruct((Bp, Hp), jnp.float32)),
        grid_spec=pltpu.PrefetchScalarGridSpec(
            num_scalar_prefetch=0,
            grid=(nchunks,),
            in_specs=[pl.BlockSpec(memory_space=pltpu.MemorySpace.SMEM),
                      pl.BlockSpec((num_dirs, Tt, Bp, Hp),
                                   lambda t: (0, t, 0, 0))],
            out_specs=[pl.BlockSpec((Tt, Bp, Hp), lambda t: (t, 0, 0)),
                       pl.BlockSpec((Bp, Hp), lambda t: (0, 0))],
        ),
        compiler_params=pltpu.CompilerParams(
            dimension_semantics=("arbitrary",),
            vmem_limit_bytes=_clamp_vmem_limit(est)),
    )(inv_len, h_stack)


# ----------------------------- EncoderText -----------------------------------

def init_params(key, vocab_size, word_dim, embed_size, num_layers, use_bi_gru):
    keys = jax.random.split(key, 2)
    params = {"embed": jax.random.normal(keys[0], (vocab_size, word_dim),
                                         dtype=jnp.float32) * 0.1}
    # TODO(synk): real GloVe vector initialization requires external data.
    k = 1.0 / np.sqrt(embed_size)
    num_dirs = 2 if use_bi_gru else 1
    gkey = keys[1]
    layers = []
    for layer in range(num_layers):
        in_size = word_dim if layer == 0 else embed_size * num_dirs
        dirs = []
        for _ in range(num_dirs):
            gkey, k0, k1, k2, k3 = jax.random.split(gkey, 5)
            wih = jax.random.uniform(k0, (3 * embed_size, in_size), minval=-k, maxval=k)
            whh = jax.random.uniform(k1, (3 * embed_size, embed_size), minval=-k, maxval=k)
            bih = jax.random.uniform(k2, (3 * embed_size,), minval=-k, maxval=k)
            bhh = jax.random.uniform(k3, (3 * embed_size,), minval=-k, maxval=k)
            dirs.append((wih, whh, bih, bhh))
        layers.append(dirs)
    params["gru"] = layers
    return params


def encoder_text_forward(params, x_tokens, lengths, use_bi_gru=True,
                         no_txtnorm=False, time_chunk=64,
                         matmul_dtype=jnp.bfloat16):
    embed = params["embed"]
    B, T = x_tokens.shape
    word_dim = embed.shape[1]
    H = params["gru"][0][0][1].shape[1]            # hidden (embed) size
    num_dirs = 2 if use_bi_gru else 1

    # hardware-friendly padded sizes: bf16 sublane tile (16) for batch, lane
    # (128) for the feature dims so gate slabs / stores are lane-dense and the
    # chunk-level gx matmul has M = Tc*Bp (a multiple of 128).
    Bp = _round_up(B, 16)
    Hp = _round_up(H, 128)
    D0p = _round_up(word_dim, 128)
    Tc = min(time_chunk, T)        # sweep time_chunk (64/128/T) per model size
    Tp = _round_up(T, Tc)

    # embedding gather straight into the time-major layout the kernels want
    x_tm = jnp.take(embed, x_tokens.T, axis=0).astype(matmul_dtype)  # (T, B, D)
    x_pad = jnp.zeros((Tp, Bp, D0p), matmul_dtype).at[:T, :B, :word_dim].set(x_tm)
    lens_i = lengths.astype(jnp.int32)
    lens_p = jnp.zeros((Bp, 1), jnp.int32).at[:B, 0].set(lens_i)

    h_in = x_pad
    col_segments = [(word_dim, D0p)]
    h_stack = None
    for layer_params in params["gru"]:
        dirs = [_pack_dir(_pad_in_cols(wih, col_segments), whh, bih, bhh,
                          H, Hp, matmul_dtype)
                for (wih, whh, bih, bhh) in layer_params]
        h_stack = gru_layer(h_in, lens_p, dirs, Tc=Tc, Hp=Hp,
                            out_dtype=matmul_dtype)
        # TODO(synk): for num_layers > 1, virtualize this concat through two
        # input BlockSpecs (weights pre-split per segment) to save one HBM
        # round trip of the (Tp, Bp, 2*Hp) activation per extra layer.
        h_in = (h_stack[0] if num_dirs == 1
                else jnp.concatenate([h_stack[0], h_stack[1]], axis=-1))
        col_segments = [(H, Hp)] * num_dirs

    # torch.mean over pad_packed_sequence output divides by max(lengths).
    inv_len = (1.0 / jnp.maximum(jnp.max(lens_i), 1).astype(jnp.float32)
               ).reshape((1,))
    cap_tm, mean_p = finalize(h_stack, inv_len, no_txtnorm, Tt=Tc)
    # TODO(synk): folding this (T,B,H)->(B,T,H) transpose into the finalize
    # out_spec needs an in-kernel major-dim relayout (pltpu.einshape); kept in
    # XLA here to stay on the known-supported lowering path.
    cap_emb = jnp.transpose(cap_tm[:T, :B, :H], (1, 0, 2))
    cap_emb_mean = mean_p[:B, :H]
    # NOTE: cap_emb is (B, T, H); PyTorch returns (B, max(lengths), 2H) before
    # the bi-GRU averaging -- padded positions here are zeros, as in PyTorch.
    return cap_emb, lengths, cap_emb_mean


# ------------------------------ reference ------------------------------------
# Pure-JAX reference that mirrors the kernel's numerics (bf16 matmul operands,
# bf16 output storage, f32 gate math) so the comparison can be tight while the
# semantics match the PyTorch EncoderText forward.

def _ref_gru_dir(x_btd, lengths, wih, whh, bih, bhh, *, reverse,
                 matmul_dtype, store_dtype):
    B, T, D = x_btd.shape
    H = whh.shape[1]
    h = jnp.zeros((B, H), jnp.float32)
    outs = [None] * T
    wih_t = wih.T.astype(matmul_dtype)
    whh_t = whh.T.astype(matmul_dtype)
    ts = range(T - 1, -1, -1) if reverse else range(T)
    for t in ts:
        x_t = x_btd[:, t, :].astype(matmul_dtype)
        gx = jnp.dot(x_t, wih_t, preferred_element_type=jnp.float32)
        gh = jnp.dot(h.astype(matmul_dtype), whh_t,
                     preferred_element_type=jnp.float32)
        r = jax.nn.sigmoid(gx[:, :H] + gh[:, :H] + bih[:H] + bhh[:H])
        z = jax.nn.sigmoid(gx[:, H:2 * H] + gh[:, H:2 * H]
                           + bih[H:2 * H] + bhh[H:2 * H])
        n = jnp.tanh(gx[:, 2 * H:] + bih[2 * H:] + r * (gh[:, 2 * H:] + bhh[2 * H:]))
        h_new = (1.0 - z) * n + z * h
        mask = (lengths > t)[:, None]
        h = jnp.where(mask, h_new, h)
        outs[t] = jnp.where(mask, h, 0.0).astype(store_dtype).astype(jnp.float32)
    return jnp.stack(outs, axis=1)


def _ref_forward(params, x_tokens, lengths, use_bi_gru, no_txtnorm,
                 matmul_dtype, store_dtype):
    emb = jnp.take(params["embed"], x_tokens, axis=0)
    num_dirs = 2 if use_bi_gru else 1
    h = emb
    for layer_params in params["gru"]:
        outs = [_ref_gru_dir(h, lengths, wih, whh, bih, bhh, reverse=(d == 1),
                             matmul_dtype=matmul_dtype, store_dtype=store_dtype)
                for d, (wih, whh, bih, bhh) in enumerate(layer_params)]
        h = outs[0] if num_dirs == 1 else jnp.concatenate(outs, axis=-1)
    if use_bi_gru:
        Hh = h.shape[-1] // 2
        cap = (h[:, :, :Hh] + h[:, :, Hh:]) / 2.0
    else:
        cap = h
    denom = jnp.maximum(jnp.max(lengths), 1).astype(jnp.float32)
    mean = jnp.sum(cap, axis=1) / denom
    if not no_txtnorm:
        cap = cap / (jnp.sqrt(jnp.sum(cap ** 2, -1, keepdims=True) + EPS) + EPS)
        mean = mean / (jnp.sqrt(jnp.sum(mean ** 2, -1, keepdims=True) + EPS) + EPS)
    return cap, lengths, mean


# -------------------------------- main ----------------------------------------

if __name__ == "__main__":
    vocab_size = 50
    word_dim = 32
    embed_size = 32
    num_layers = 1
    use_bi_gru = True
    B, T = 2, 8

    key = jax.random.PRNGKey(0)
    kp, kx = jax.random.split(key)
    params = init_params(kp, vocab_size, word_dim, embed_size, num_layers,
                         use_bi_gru)

    x_tokens = jax.random.randint(kx, (B, T), 0, vocab_size, dtype=jnp.int32)
    lengths = jnp.array([T, 5], dtype=jnp.int32)   # sorted descending

    cap_emb, cap_len, cap_emb_mean = encoder_text_forward(
        params, x_tokens, lengths, use_bi_gru=use_bi_gru, no_txtnorm=False)
    jax.block_until_ready((cap_emb, cap_emb_mean))

    ref_emb, _, ref_mean = _ref_forward(
        params, x_tokens, lengths, use_bi_gru=use_bi_gru, no_txtnorm=False,
        matmul_dtype=jnp.bfloat16, store_dtype=jnp.bfloat16)
    np.testing.assert_allclose(np.asarray(cap_emb), np.asarray(ref_emb),
                               rtol=5e-3, atol=5e-3)
    np.testing.assert_allclose(np.asarray(cap_emb_mean), np.asarray(ref_mean),
                               rtol=5e-3, atol=5e-3)

    print("KERNEL_OK")
</pallas_src>

<mosaic_0001>
module attributes {stable_mosaic.version = 11 : i64} {
  func.func @kernel(%arg0: i32, %arg1: i32, %arg2: memref<8x16x128xbf16, #tpu.memory_space<vmem>>, %arg3: memref<16x1xi32, #tpu.memory_space<vmem>>, %arg4: memref<1x128x384xbf16, #tpu.memory_space<vmem>>, %arg5: memref<1x128x384xbf16, #tpu.memory_space<vmem>>, %arg6: memref<1x2x384xf32, #tpu.memory_space<vmem>>, %arg7: memref<1x8x16x128xbf16, #tpu.memory_space<vmem>>, %arg8: memref<16x128xf32, #tpu.memory_space<vmem>>, %arg9: memref<8x16x384xf32, #tpu.memory_space<vmem>>) attributes {dimension_semantics = [#tpu.dimension_semantics<parallel>, #tpu.dimension_semantics<arbitrary>], iteration_bounds = array<i64: 2, 1>, scalar_prefetch = 0 : i64, scratch_operands = 2 : i64, tpu.core_type = #tpu.core_type<tc>, window_params = [{transform_indices = @transform_0, window_bounds = array<i64: 8, 16, 128>}, {pipeline_mode = #tpu.pipeline_mode<synchronous>, transform_indices = @transform_1, window_bounds = array<i64: 16, 1>}, {transform_indices = @transform_2, window_bounds = array<i64: 1, 128, 384>}, {transform_indices = @transform_3, window_bounds = array<i64: 1, 128, 384>}, {transform_indices = @transform_4, window_bounds = array<i64: 1, 2, 384>}, {transform_indices = @transform_5, window_bounds = array<i64: 1, 8, 16, 128>}]} {
    %c0_i32 = arith.constant 0 : i32
    %0 = arith.cmpi eq, %arg1, %c0_i32 : i32
    %1 = arith.extui %0 : i1 to i32
    %c0_i32_0 = arith.constant 0 : i32
    %2 = arith.cmpi ne, %1, %c0_i32_0 : i32
    scf.if %2 {
      %cst_122 = arith.constant 0.000000e+00 : f32
      %436 = vector.broadcast %cst_122 : f32 to vector<16x128xf32>
      %c0_123 = arith.constant 0 : index
      %c0_124 = arith.constant 0 : index
      %437 = vector.load %arg8[%c0_123, %c0_124] : memref<16x128xf32, #tpu.memory_space<vmem>>, vector<16x128xf32>
      tpu.vector_store %arg8[%c0_123, %c0_124], %436 {strides = array<i32>} : memref<16x128xf32, #tpu.memory_space<vmem>>, vector<16x128xf32>,
    } else {
    }
    %c0 = arith.constant 0 : index
    %c0_1 = arith.constant 0 : index
    %c0_2 = arith.constant 0 : index
    %3 = vector.load %arg5[%c0, %c0_1, %c0_2] : memref<1x128x384xbf16, #tpu.memory_space<vmem>>, vector<1x128x384xbf16>
    %4 = vector.shape_cast %3 : vector<1x128x384xbf16> to vector<128x384xbf16>
    %c0_3 = arith.constant 0 : index
    %c0_4 = arith.constant 0 : index
    %5 = vector.load %arg3[%c0_3, %c0_4] : memref<16x1xi32, #tpu.memory_space<vmem>>, vector<16x1xi32>
    %c2_i32 = arith.constant 2 : i32
    %6 = arith.muli %c2_i32, %arg1 : i32
    %c0_i32_5 = arith.constant 0 : i32
    %7 = arith.subi %c0_i32_5, %6 : i32
    %8 = arith.muli %arg0, %7 : i32
    %9 = arith.addi %arg1, %8 : i32
    %c8_i32 = arith.constant 8 : i32
    %10 = arith.muli %9, %c8_i32 : i32
    %c0_6 = arith.constant 0 : index
    %c0_7 = arith.constant 0 : index
    %c0_8 = arith.constant 0 : index
    %11 = vector.load %arg2[%c0_6, %c0_7, %c0_8] : memref<8x16x128xbf16, #tpu.memory_space<vmem>>, vector<8x16x128xbf16>
    %12 = vector.shape_cast %11 : vector<8x16x128xbf16> to vector<128x128xbf16>
    %c0_9 = arith.constant 0 : index
    %c0_10 = arith.constant 0 : index
    %c0_11 = arith.constant 0 : index
    %13 = vector.load %arg4[%c0_9, %c0_10, %c0_11] : memref<1x128x384xbf16, #tpu.memory_space<vmem>>, vector<1x128x384xbf16>
    %14 = vector.shape_cast %13 : vector<1x128x384xbf16> to vector<128x384xbf16>
    %cst = arith.constant dense<0.000000e+00> : vector<128x384xf32>
    %15 = tpu.matmul %12, %14, %cst {dimension_numbers = #tpu.dot_dimension_numbers<[1], [0], [0], [1], [0, 0, 1, 1], [], []>} : vector<128x128xbf16>, vector<128x384xbf16>, vector<128x384xf32> -> vector<128x384xf32>
    %c0_12 = arith.constant 0 : index
    %c0_13 = arith.constant 0 : index
    %c0_14 = arith.constant 0 : index
    %16 = vector.load %arg6[%c0_12, %c0_13, %c0_14] : memref<1x2x384xf32, #tpu.memory_space<vmem>>, vector<1x1x384xf32>
    %17 = vector.shape_cast %16 : vector<1x1x384xf32> to vector<1x384xf32>
    %18 = vector.broadcast %17 : vector<1x384xf32> to vector<128x384xf32>
    %19 = arith.addf %15, %18 : vector<128x384xf32>
    %20 = vector.shape_cast %19 : vector<128x384xf32> to vector<8x16x384xf32>
    %c0_15 = arith.constant 0 : index
    %c0_16 = arith.constant 0 : index
    %c0_17 = arith.constant 0 : index
    %21 = vector.load %arg9[%c0_15, %c0_16, %c0_17] : memref<8x16x384xf32, #tpu.memory_space<vmem>>, vector<8x16x384xf32>
    tpu.vector_store %arg9[%c0_15, %c0_16, %c0_17], %20 {strides = array<i32>} : memref<8x16x384xf32, #tpu.memory_space<vmem>>, vector<8x16x384xf32>,
    %c0_18 = arith.constant 0 : index
    %c1 = arith.constant 1 : index
    %c256 = arith.constant 256 : index
    %22 = vector.load %arg6[%c0_18, %c1, %c256] : memref<1x2x384xf32, #tpu.memory_space<vmem>>, vector<1x1x128xf32>
    %23 = vector.shape_cast %22 : vector<1x1x128xf32> to vector<1x128xf32>
    %24 = vector.shape_cast %23 : vector<1x128xf32> to vector<1x128xf32>
    %25 = vector.broadcast %24 : vector<1x128xf32> to vector<16x128xf32>
    %c0_19 = arith.constant 0 : index
    %c0_20 = arith.constant 0 : index
    %26 = vector.load %arg8[%c0_19, %c0_20] : memref<16x128xf32, #tpu.memory_space<vmem>>, vector<16x128xf32>
    %c0_i32_21 = arith.constant 0 : i32
    %c2_i32_22 = arith.constant 2 : i32
    %27 = arith.muli %c2_i32_22, %c0_i32_21 : i32
    %c7_i32 = arith.constant 7 : i32
    %28 = arith.subi %c7_i32, %27 : i32
    %29 = arith.muli %arg0, %28 : i32
    %30 = arith.addi %c0_i32_21, %29 : i32
    %31 = arith.addi %10, %30 : i32
    %32 = arith.index_cast %30 : i32 to index
    %c0_23 = arith.constant 0 : index
    %c0_24 = arith.constant 0 : index
    %33 = vector.load %arg9[%32, %c0_23, %c0_24] : memref<8x16x384xf32, #tpu.memory_space<vmem>>, vector<1x16x384xf32>
    %34 = vector.shape_cast %33 : vector<1x16x384xf32> to vector<16x384xf32>
    %35 = arith.truncf %26 : vector<16x128xf32> to vector<16x128xbf16>
    %cst_25 = arith.constant dense<0.000000e+00> : vector<16x384xf32>
    %36 = tpu.matmul %35, %4, %cst_25 {dimension_numbers = #tpu.dot_dimension_numbers<[1], [0], [0], [1], [0, 0, 1, 1], [], []>} : vector<16x128xbf16>, vector<128x384xbf16>, vector<16x384xf32> -> vector<16x384xf32>
    %37 = vector.extract_strided_slice %34 {offsets = [0, 0], sizes = [16, 128], strides = [1, 1]} : vector<16x384xf32> to vector<16x128xf32>
    %38 = vector.extract_strided_slice %36 {offsets = [0, 0], sizes = [16, 128], strides = [1, 1]} : vector<16x384xf32> to vector<16x128xf32>
    %39 = arith.addf %37, %38 : vector<16x128xf32>
    %40 = arith.negf %39 : vector<16x128xf32>
    %41 = math.exp %40 : vector<16x128xf32>
    %cst_26 = arith.constant 1.000000e+00 : f32
    %42 = vector.broadcast %cst_26 : f32 to vector<16x128xf32>
    %43 = arith.addf %42, %41 : vector<16x128xf32>
    %44 = arith.divf %42, %43 : vector<16x128xf32>
    %45 = vector.extract_strided_slice %34 {offsets = [0, 128], sizes = [16, 128], strides = [1, 1]} : vector<16x384xf32> to vector<16x128xf32>
    %46 = vector.extract_strided_slice %36 {offsets = [0, 128], sizes = [16, 128], strides = [1, 1]} : vector<16x384xf32> to vector<16x128xf32>
    %47 = arith.addf %45, %46 : vector<16x128xf32>
    %48 = arith.negf %47 : vector<16x128xf32>
    %49 = math.exp %48 : vector<16x128xf32>
    %cst_27 = arith.constant 1.000000e+00 : f32
    %50 = vector.broadcast %cst_27 : f32 to vector<16x128xf32>
    %51 = arith.addf %50, %49 : vector<16x128xf32>
    %52 = arith.divf %50, %51 : vector<16x128xf32>
    %53 = vector.extract_strided_slice %34 {offsets = [0, 256], sizes = [16, 128], strides = [1, 1]} : vector<16x384xf32> to vector<16x128xf32>
    %54 = vector.extract_strided_slice %36 {offsets = [0, 256], sizes = [16, 128], strides = [1, 1]} : vector<16x384xf32> to vector<16x128xf32>
    %55 = arith.addf %54, %25 : vector<16x128xf32>
    %56 = arith.mulf %44, %55 : vector<16x128xf32>
    %57 = arith.addf %53, %56 : vector<16x128xf32>
    %58 = math.tanh %57 : vector<16x128xf32>
    %cst_28 = arith.constant 1.000000e+00 : f32
    %59 = vector.broadcast %cst_28 : f32 to vector<16x128xf32>
    %60 = arith.subf %59, %52 : vector<16x128xf32>
    %61 = arith.mulf %60, %58 : vector<16x128xf32>
    %62 = arith.mulf %52, %26 : vector<16x128xf32>
    %63 = arith.addf %61, %62 : vector<16x128xf32>
    %64 = vector.broadcast %31 : i32 to vector<16x1xi32>
    %65 = arith.cmpi sgt, %5, %64 : vector<16x1xi32>
    %cst_29 = arith.constant 0.000000e+00 : f32
    %66 = vector.shape_cast %65 : vector<16x1xi1> to vector<16x1xi1>
    %67 = vector.broadcast %66 : vector<16x1xi1> to vector<16x128xi1>
    %68 = vector.broadcast %cst_29 : f32 to vector<16x128xf32>
    %69 = arith.select %67, %63, %68 : vector<16x128xi1>, vector<16x128xf32>
    %70 = arith.truncf %69 : vector<16x128xf32> to vector<16x128xbf16>
    %c0_30 = arith.constant 0 : index
    %71 = arith.index_cast %30 : i32 to index
    %c0_31 = arith.constant 0 : index
    %c0_32 = arith.constant 0 : index
    %72 = vector.load %arg7[%c0_30, %71, %c0_31, %c0_32] : memref<1x8x16x128xbf16, #tpu.memory_space<vmem>>, vector<1x1x16x128xbf16>
    %73 = vector.shape_cast %72 : vector<1x1x16x128xbf16> to vector<16x128xbf16>
    %74 = vector.shape_cast %70 : vector<16x128xbf16> to vector<1x1x16x128xbf16>
    tpu.vector_store %arg7[%c0_30, %71, %c0_31, %c0_32], %74 {strides = array<i32>} : memref<1x8x16x128xbf16, #tpu.memory_space<vmem>>, vector<1x1x16x128xbf16>,
    %75 = vector.shape_cast %65 : vector<16x1xi1> to vector<16x1xi1>
    %76 = vector.broadcast %75 : vector<16x1xi1> to vector<16x128xi1>
    %77 = arith.select %76, %63, %26 : vector<16x128xi1>, vector<16x128xf32>
    %c1_i32 = arith.constant 1 : i32
    %c2_i32_33 = arith.constant 2 : i32
    %78 = arith.muli %c2_i32_33, %c1_i32 : i32
    %c7_i32_34 = arith.constant 7 : i32
    %79 = arith.subi %c7_i32_34, %78 : i32
    %80 = arith.muli %arg0, %79 : i32
    %81 = arith.addi %c1_i32, %80 : i32
    %82 = arith.addi %10, %81 : i32
    %83 = arith.index_cast %81 : i32 to index
    %c0_35 = arith.constant 0 : index
    %c0_36 = arith.constant 0 : index
    %84 = vector.load %arg9[%83, %c0_35, %c0_36] : memref<8x16x384xf32, #tpu.memory_space<vmem>>, vector<1x16x384xf32>
    %85 = vector.shape_cast %84 : vector<1x16x384xf32> to vector<16x384xf32>
    %86 = arith.truncf %77 : vector<16x128xf32> to vector<16x128xbf16>
    %cst_37 = arith.constant dense<0.000000e+00> : vector<16x384xf32>
    %87 = tpu.matmul %86, %4, %cst_37 {dimension_numbers = #tpu.dot_dimension_numbers<[1], [0], [0], [1], [0, 0, 1, 1], [], []>} : vector<16x128xbf16>, vector<128x384xbf16>, vector<16x384xf32> -> vector<16x384xf32>
    %88 = vector.extract_strided_slice %85 {offsets = [0, 0], sizes = [16, 128], strides = [1, 1]} : vector<16x384xf32> to vector<16x128xf32>
    %89 = vector.extract_strided_slice %87 {offsets = [0, 0], sizes = [16, 128], strides = [1, 1]} : vector<16x384xf32> to vector<16x128xf32>
    %90 = arith.addf %88, %89 : vector<16x128xf32>
    %91 = arith.negf %90 : vector<16x128xf32>
    %92 = math.exp %91 : vector<16x128xf32>
    %cst_38 = arith.constant 1.000000e+00 : f32
    %93 = vector.broadcast %cst_38 : f32 to vector<16x128xf32>
    %94 = arith.addf %93, %92 : vector<16x128xf32>
    %95 = arith.divf %93, %94 : vector<16x128xf32>
    %96 = vector.extract_strided_slice %85 {offsets = [0, 128], sizes = [16, 128], strides = [1, 1]} : vector<16x384xf32> to vector<16x128xf32>
    %97 = vector.extract_strided_slice %87 {offsets = [0, 128], sizes = [16, 128], strides = [1, 1]} : vector<16x384xf32> to vector<16x128xf32>
    %98 = arith.addf %96, %97 : vector<16x128xf32>
    %99 = arith.negf %98 : vector<16x128xf32>
    %100 = math.exp %99 : vector<16x128xf32>
    %cst_39 = arith.constant 1.000000e+00 : f32
    %101 = vector.broadcast %cst_39 : f32 to vector<16x128xf32>
    %102 = arith.addf %101, %100 : vector<16x128xf32>
    %103 = arith.divf %101, %102 : vector<16x128xf32>
    %104 = vector.extract_strided_slice %85 {offsets = [0, 256], sizes = [16, 128], strides = [1, 1]} : vector<16x384xf32> to vector<16x128xf32>
    %105 = vector.extract_strided_slice %87 {offsets = [0, 256], sizes = [16, 128], strides = [1, 1]} : vector<16x384xf32> to vector<16x128xf32>
    %106 = arith.addf %105, %25 : vector<16x128xf32>
    %107 = arith.mulf %95, %106 : vector<16x128xf32>
    %108 = arith.addf %104, %107 : vector<16x128xf32>
    %109 = math.tanh %108 : vector<16x128xf32>
    %cst_40 = arith.constant 1.000000e+00 : f32
    %110 = vector.broadcast %cst_40 : f32 to vector<16x128xf32>
    %111 = arith.subf %110, %103 : vector<16x128xf32>
    %112 = arith.mulf %111, %109 : vector<16x128xf32>
    %113 = arith.mulf %103, %77 : vector<16x128xf32>
    %114 = arith.addf %112, %113 : vector<16x128xf32>
    %115 = vector.broadcast %82 : i32 to vector<16x1xi32>
    %116 = arith.cmpi sgt, %5, %115 : vector<16x1xi32>
    %cst_41 = arith.constant 0.000000e+00 : f32
    %117 = vector.shape_cast %116 : vector<16x1xi1> to vector<16x1xi1>
    %118 = vector.broadcast %117 : vector<16x1xi1> to vector<16x128xi1>
    %119 = vector.broadcast %cst_41 : f32 to vector<16x128xf32>
    %120 = arith.select %118, %114, %119 : vector<16x128xi1>, vector<16x128xf32>
    %121 = arith.truncf %120 : vector<16x128xf32> to vector<16x128xbf16>
    %c0_42 = arith.constant 0 : index
    %122 = arith.index_cast %81 : i32 to index
    %c0_43 = arith.constant 0 : index
    %c0_44 = arith.constant 0 : index
    %123 = vector.load %arg7[%c0_42, %122, %c0_43, %c0_44] : memref<1x8x16x128xbf16, #tpu.memory_space<vmem>>, vector<1x1x16x128xbf16>
    %124 = vector.shape_cast %123 : vector<1x1x16x128xbf16> to vector<16x128xbf16>
    %125 = vector.shape_cast %121 : vector<16x128xbf16> to vector<1x1x16x128xbf16>
    tpu.vector_store %arg7[%c0_42, %122, %c0_43, %c0_44], %125 {strides = array<i32>} : memref<1x8x16x128xbf16, #tpu.memory_space<vmem>>, vector<1x1x16x128xbf16>,
    %126 = vector.shape_cast %116 : vector<16x1xi1> to vector<16x1xi1>
    %127 = vector.broadcast %126 : vector<16x1xi1> to vector<16x128xi1>
    %128 = arith.select %127, %114, %77 : vector<16x128xi1>, vector<16x128xf32>
    %c2_i32_45 = arith.constant 2 : i32
    %c2_i32_46 = arith.constant 2 : i32
    %129 = arith.muli %c2_i32_46, %c2_i32_45 : i32
    %c7_i32_47 = arith.constant 7 : i32
    %130 = arith.subi %c7_i32_47, %129 : i32
    %131 = arith.muli %arg0, %130 : i32
    %132 = arith.addi %c2_i32_45, %131 : i32
    %133 = arith.addi %10, %132 : i32
    %134 = arith.index_cast %132 : i32 to index
    %c0_48 = arith.constant 0 : index
    %c0_49 = arith.constant 0 : index
    %135 = vector.load %arg9[%134, %c0_48, %c0_49] : memref<8x16x384xf32, #tpu.memory_space<vmem>>, vector<1x16x384xf32>
    %136 = vector.shape_cast %135 : vector<1x16x384xf32> to vector<16x384xf32>
    %137 = arith.truncf %128 : vector<16x128xf32> to vector<16x128xbf16>
    %cst_50 = arith.constant dense<0.000000e+00> : vector<16x384xf32>
    %138 = tpu.matmul %137, %4, %cst_50 {dimension_numbers = #tpu.dot_dimension_numbers<[1], [0], [0], [1], [0, 0, 1, 1], [], []>} : vector<16x128xbf16>, vector<128x384xbf16>, vector<16x384xf32> -> vector<16x384xf32>
    %139 = vector.extract_strided_slice %136 {offsets = [0, 0], sizes = [16, 128], strides = [1, 1]} : vector<16x384xf32> to vector<16x128xf32>
    %140 = vector.extract_strided_slice %138 {offsets = [0, 0], sizes = [16, 128], strides = [1, 1]} : vector<16x384xf32> to vector<16x128xf32>
    %141 = arith.addf %139, %140 : vector<16x128xf32>
    %142 = arith.negf %141 : vector<16x128xf32>
    %143 = math.exp %142 : vector<16x128xf32>
    %cst_51 = arith.constant 1.000000e+00 : f32
    %144 = vector.broadcast %cst_51 : f32 to vector<16x128xf32>
    %145 = arith.addf %144, %143 : vector<16x128xf32>
    %146 = arith.divf %144, %145 : vector<16x128xf32>
    %147 = vector.extract_strided_slice %136 {offsets = [0, 128], sizes = [16, 128], strides = [1, 1]} : vector<16x384xf32> to vector<16x128xf32>
    %148 = vector.extract_strided_slice %138 {offsets = [0, 128], sizes = [16, 128], strides = [1, 1]} : vector<16x384xf32> to vector<16x128xf32>
    %149 = arith.addf %147, %148 : vector<16x128xf32>
    %150 = arith.negf %149 : vector<16x128xf32>
    %151 = math.exp %150 : vector<16x128xf32>
    %cst_52 = arith.constant 1.000000e+00 : f32
    %152 = vector.broadcast %cst_52 : f32 to vector<16x128xf32>
    %153 = arith.addf %152, %151 : vector<16x128xf32>
    %154 = arith.divf %152, %153 : vector<16x128xf32>
    %155 = vector.extract_strided_slice %136 {offsets = [0, 256], sizes = [16, 128], strides = [1, 1]} : vector<16x384xf32> to vector<16x128xf32>
    %156 = vector.extract_strided_slice %138 {offsets = [0, 256], sizes = [16, 128], strides = [1, 1]} : vector<16x384xf32> to vector<16x128xf32>
    %157 = arith.addf %156, %25 : vector<16x128xf32>
    %158 = arith.mulf %146, %157 : vector<16x128xf32>
    %159 = arith.addf %155, %158 : vector<16x128xf32>
    %160 = math.tanh %159 : vector<16x128xf32>
    %cst_53 = arith.constant 1.000000e+00 : f32
    %161 = vector.broadcast %cst_53 : f32 to vector<16x128xf32>
    %162 = arith.subf %161, %154 : vector<16x128xf32>
    %163 = arith.mulf %162, %160 : vector<16x128xf32>
    %164 = arith.mulf %154, %128 : vector<16x128xf32>
    %165 = arith.addf %163, %164 : vector<16x128xf32>
    %166 = vector.broadcast %133 : i32 to vector<16x1xi32>
    %167 = arith.cmpi sgt, %5, %166 : vector<16x1xi32>
    %cst_54 = arith.constant 0.000000e+00 : f32
    %168 = vector.shape_cast %167 : vector<16x1xi1> to vector<16x1xi1>
    %169 = vector.broadcast %168 : vector<16x1xi1> to vector<16x128xi1>
    %170 = vector.broadcast %cst_54 : f32 to vector<16x128xf32>
    %171 = arith.select %169, %165, %170 : vector<16x128xi1>, vector<16x128xf32>
    %172 = arith.truncf %171 : vector<16x128xf32> to vector<16x128xbf16>
    %c0_55 = arith.constant 0 : index
    %173 = arith.index_cast %132 : i32 to index
    %c0_56 = arith.constant 0 : index
    %c0_57 = arith.constant 0 : index
    %174 = vector.load %arg7[%c0_55, %173, %c0_56, %c0_57] : memref<1x8x16x128xbf16, #tpu.memory_space<vmem>>, vector<1x1x16x128xbf16>
    %175 = vector.shape_cast %174 : vector<1x1x16x128xbf16> to vector<16x128xbf16>
    %176 = vector.shape_cast %172 : vector<16x128xbf16> to vector<1x1x16x128xbf16>
    tpu.vector_store %arg7[%c0_55, %173, %c0_56, %c0_57], %176 {strides = array<i32>} : memref<1x8x16x128xbf16, #tpu.memory_space<vmem>>, vector<1x1x16x128xbf16>,
    %177 = vector.shape_cast %167 : vector<16x1xi1> to vector<16x1xi1>
    %178 = vector.broadcast %177 : vector<16x1xi1> to vector<16x128xi1>
    %179 = arith.select %178, %165, %128 : vector<16x128xi1>, vector<16x128xf32>
    %c3_i32 = arith.constant 3 : i32
    %c2_i32_58 = arith.constant 2 : i32
    %180 = arith.muli %c2_i32_58, %c3_i32 : i32
    %c7_i32_59 = arith.constant 7 : i32
    %181 = arith.subi %c7_i32_59, %180 : i32
    %182 = arith.muli %arg0, %181 : i32
    %183 = arith.addi %c3_i32, %182 : i32
    %184 = arith.addi %10, %183 : i32
    %185 = arith.index_cast %183 : i32 to index
    %c0_60 = arith.constant 0 : index
    %c0_61 = arith.constant 0 : index
    %186 = vector.load %arg9[%185, %c0_60, %c0_61] : memref<8x16x384xf32, #tpu.memory_space<vmem>>, vector<1x16x384xf32>
    %187 = vector.shape_cast %186 : vector<1x16x384xf32> to vector<16x384xf32>
    %188 = arith.truncf %179 : vector<16x128xf32> to vector<16x128xbf16>
    %cst_62 = arith.constant dense<0.000000e+00> : vector<16x384xf32>
    %189 = tpu.matmul %188, %4, %cst_62 {dimension_numbers = #tpu.dot_dimension_numbers<[1], [0], [0], [1], [0, 0, 1, 1], [], []>} : vector<16x128xbf16>, vector<128x384xbf16>, vector<16x384xf32> -> vector<16x384xf32>
    %190 = vector.extract_strided_slice %187 {offsets = [0, 0], sizes = [16, 128], strides = [1, 1]} : vector<16x384xf32> to vector<16x128xf32>
    %191 = vector.extract_strided_slice %189 {offsets = [0, 0], sizes = [16, 128], strides = [1, 1]} : vector<16x384xf32> to vector<16x128xf32>
    %192 = arith.addf %190, %191 : vector<16x128xf32>
    %193 = arith.negf %192 : vector<16x128xf32>
    %194 = math.exp %193 : vector<16x128xf32>
    %cst_63 = arith.constant 1.000000e+00 : f32
    %195 = vector.broadcast %cst_63 : f32 to vector<16x128xf32>
    %196 = arith.addf %195, %194 : vector<16x128xf32>
    %197 = arith.divf %195, %196 : vector<16x128xf32>
    %198 = vector.extract_strided_slice %187 {offsets = [0, 128], sizes = [16, 128], strides = [1, 1]} : vector<16x384xf32> to vector<16x128xf32>
    %199 = vector.extract_strided_slice %189 {offsets = [0, 128], sizes = [16, 128], strides = [1, 1]} : vector<16x384xf32> to vector<16x128xf32>
    %200 = arith.addf %198, %199 : vector<16x128xf32>
    %201 = arith.negf %200 : vector<16x128xf32>
    %202 = math.exp %201 : vector<16x128xf32>
    %cst_64 = arith.constant 1.000000e+00 : f32
    %203 = vector.broadcast %cst_64 : f32 to vector<16x128xf32>
    %204 = arith.addf %203, %202 : vector<16x128xf32>
    %205 = arith.divf %203, %204 : vector<16x128xf32>
    %206 = vector.extract_strided_slice %187 {offsets = [0, 256], sizes = [16, 128], strides = [1, 1]} : vector<16x384xf32> to vector<16x128xf32>
    %207 = vector.extract_strided_slice %189 {offsets = [0, 256], sizes = [16, 128], strides = [1, 1]} : vector<16x384xf32> to vector<16x128xf32>
    %208 = arith.addf %207, %25 : vector<16x128xf32>
    %209 = arith.mulf %197, %208 : vector<16x128xf32>
    %210 = arith.addf %206, %209 : vector<16x128xf32>
    %211 = math.tanh %210 : vector<16x128xf32>
    %cst_65 = arith.constant 1.000000e+00 : f32
    %212 = vector.broadcast %cst_65 : f32 to vector<16x128xf32>
    %213 = arith.subf %212, %205 : vector<16x128xf32>
    %214 = arith.mulf %213, %211 : vector<16x128xf32>
    %215 = arith.mulf %205, %179 : vector<16x128xf32>
    %216 = arith.addf %214, %215 : vector<16x128xf32>
    %217 = vector.broadcast %184 : i32 to vector<16x1xi32>
    %218 = arith.cmpi sgt, %5, %217 : vector<16x1xi32>
    %cst_66 = arith.constant 0.000000e+00 : f32
    %219 = vector.shape_cast %218 : vector<16x1xi1> to vector<16x1xi1>
    %220 = vector.broadcast %219 : vector<16x1xi1> to vector<16x128xi1>
    %221 = vector.broadcast %cst_66 : f32 to vector<16x128xf32>
    %222 = arith.select %220, %216, %221 : vector<16x128xi1>, vector<16x128xf32>
    %223 = arith.truncf %222 : vector<16x128xf32> to vector<16x128xbf16>
    %c0_67 = arith.constant 0 : index
    %224 = arith.index_cast %183 : i32 to index
    %c0_68 = arith.constant 0 : index
    %c0_69 = arith.constant 0 : index
    %225 = vector.load %arg7[%c0_67, %224, %c0_68, %c0_69] : memref<1x8x16x128xbf16, #tpu.memory_space<vmem>>, vector<1x1x16x128xbf16>
    %226 = vector.shape_cast %225 : vector<1x1x16x128xbf16> to vector<16x128xbf16>
    %227 = vector.shape_cast %223 : vector<16x128xbf16> to vector<1x1x16x128xbf16>
    tpu.vector_store %arg7[%c0_67, %224, %c0_68, %c0_69], %227 {strides = array<i32>} : memref<1x8x16x128xbf16, #tpu.memory_space<vmem>>, vector<1x1x16x128xbf16>,
    %228 = vector.shape_cast %218 : vector<16x1xi1> to vector<16x1xi1>
    %229 = vector.broadcast %228 : vector<16x1xi1> to vector<16x128xi1>
    %230 = arith.select %229, %216, %179 : vector<16x128xi1>, vector<16x128xf32>
    %c4_i32 = arith.constant 4 : i32
    %c2_i32_70 = arith.constant 2 : i32
    %231 = arith.muli %c2_i32_70, %c4_i32 : i32
    %c7_i32_71 = arith.constant 7 : i32
    %232 = arith.subi %c7_i32_71, %231 : i32
    %233 = arith.muli %arg0, %232 : i32
    %234 = arith.addi %c4_i32, %233 : i32
    %235 = arith.addi %10, %234 : i32
    %236 = arith.index_cast %234 : i32 to index
    %c0_72 = arith.constant 0 : index
    %c0_73 = arith.constant 0 : index
    %237 = vector.load %arg9[%236, %c0_72, %c0_73] : memref<8x16x384xf32, #tpu.memory_space<vmem>>, vector<1x16x384xf32>
    %238 = vector.shape_cast %237 : vector<1x16x384xf32> to vector<16x384xf32>
    %239 = arith.truncf %230 : vector<16x128xf32> to vector<16x128xbf16>
    %cst_74 = arith.constant dense<0.000000e+00> : vector<16x384xf32>
    %240 = tpu.matmul %239, %4, %cst_74 {dimension_numbers = #tpu.dot_dimension_numbers<[1], [0], [0], [1], [0, 0, 1, 1], [], []>} : vector<16x128xbf16>, vector<128x384xbf16>, vector<16x384xf32> -> vector<16x384xf32>
    %241 = vector.extract_strided_slice %238 {offsets = [0, 0], sizes = [16, 128], strides = [1, 1]} : vector<16x384xf32> to vector<16x128xf32>
    %242 = vector.extract_strided_slice %240 {offsets = [0, 0], sizes = [16, 128], strides = [1, 1]} : vector<16x384xf32> to vector<16x128xf32>
    %243 = arith.addf %241, %242 : vector<16x128xf32>
    %244 = arith.negf %243 : vector<16x128xf32>
    %245 = math.exp %244 : vector<16x128xf32>
    %cst_75 = arith.constant 1.000000e+00 : f32
    %246 = vector.broadcast %cst_75 : f32 to vector<16x128xf32>
    %247 = arith.addf %246, %245 : vector<16x128xf32>
    %248 = arith.divf %246, %247 : vector<16x128xf32>
    %249 = vector.extract_strided_slice %238 {offsets = [0, 128], sizes = [16, 128], strides = [1, 1]} : vector<16x384xf32> to vector<16x128xf32>
    %250 = vector.extract_strided_slice %240 {offsets = [0, 128], sizes = [16, 128], strides = [1, 1]} : vector<16x384xf32> to vector<16x128xf32>
    %251 = arith.addf %249, %250 : vector<16x128xf32>
    %252 = arith.negf %251 : vector<16x128xf32>
    %253 = math.exp %252 : vector<16x128xf32>
    %cst_76 = arith.constant 1.000000e+00 : f32
    %254 = vector.broadcast %cst_76 : f32 to vector<16x128xf32>
    %255 = arith.addf %254, %253 : vector<16x128xf32>
    %256 = arith.divf %254, %255 : vector<16x128xf32>
    %257 = vector.extract_strided_slice %238 {offsets = [0, 256], sizes = [16, 128], strides = [1, 1]} : vector<16x384xf32> to vector<16x128xf32>
    %258 = vector.extract_strided_slice %240 {offsets = [0, 256], sizes = [16, 128], strides = [1, 1]} : vector<16x384xf32> to vector<16x128xf32>
    %259 = arith.addf %258, %25 : vector<16x128xf32>
    %260 = arith.mulf %248, %259 : vector<16x128xf32>
    %261 = arith.addf %257, %260 : vector<16x128xf32>
    %262 = math.tanh %261 : vector<16x128xf32>
    %cst_77 = arith.constant 1.000000e+00 : f32
    %263 = vector.broadcast %cst_77 : f32 to vector<16x128xf32>
    %264 = arith.subf %263, %256 : vector<16x128xf32>
    %265 = arith.mulf %264, %262 : vector<16x128xf32>
    %266 = arith.mulf %256, %230 : vector<16x128xf32>
    %267 = arith.addf %265, %266 : vector<16x128xf32>
    %268 = vector.broadcast %235 : i32 to vector<16x1xi32>
    %269 = arith.cmpi sgt, %5, %268 : vector<16x1xi32>
    %cst_78 = arith.constant 0.000000e+00 : f32
    %270 = vector.shape_cast %269 : vector<16x1xi1> to vector<16x1xi1>
    %271 = vector.broadcast %270 : vector<16x1xi1> to vector<16x128xi1>
    %272 = vector.broadcast %cst_78 : f32 to vector<16x128xf32>
    %273 = arith.select %271, %267, %272 : vector<16x128xi1>, vector<16x128xf32>
    %274 = arith.truncf %273 : vector<16x128xf32> to vector<16x128xbf16>
    %c0_79 = arith.constant 0 : index
    %275 = arith.index_cast %234 : i32 to index
    %c0_80 = arith.constant 0 : index
    %c0_81 = arith.constant 0 : index
    %276 = vector.load %arg7[%c0_79, %275, %c0_80, %c0_81] : memref<1x8x16x128xbf16, #tpu.memory_space<vmem>>, vector<1x1x16x128xbf16>
    %277 = vector.shape_cast %276 : vector<1x1x16x128xbf16> to vector<16x128xbf16>
    %278 = vector.shape_cast %274 : vector<16x128xbf16> to vector<1x1x16x128xbf16>
    tpu.vector_store %arg7[%c0_79, %275, %c0_80, %c0_81], %278 {strides = array<i32>} : memref<1x8x16x128xbf16, #tpu.memory_space<vmem>>, vector<1x1x16x128xbf16>,
    %279 = vector.shape_cast %269 : vector<16x1xi1> to vector<16x1xi1>
    %280 = vector.broadcast %279 : vector<16x1xi1> to vector<16x128xi1>
    %281 = arith.select %280, %267, %230 : vector<16x128xi1>, vector<16x128xf32>
    %c5_i32 = arith.constant 5 : i32
    %c2_i32_82 = arith.constant 2 : i32
    %282 = arith.muli %c2_i32_82, %c5_i32 : i32
    %c7_i32_83 = arith.constant 7 : i32
    %283 = arith.subi %c7_i32_83, %282 : i32
    %284 = arith.muli %arg0, %283 : i32
    %285 = arith.addi %c5_i32, %284 : i32
    %286 = arith.addi %10, %285 : i32
    %287 = arith.index_cast %285 : i32 to index
    %c0_84 = arith.constant 0 : index
    %c0_85 = arith.constant 0 : index
    %288 = vector.load %arg9[%287, %c0_84, %c0_85] : memref<8x16x384xf32, #tpu.memory_space<vmem>>, vector<1x16x384xf32>
    %289 = vector.shape_cast %288 : vector<1x16x384xf32> to vector<16x384xf32>
    %290 = arith.truncf %281 : vector<16x128xf32> to vector<16x128xbf16>
    %cst_86 = arith.constant dense<0.000000e+00> : vector<16x384xf32>
    %291 = tpu.matmul %290, %4, %cst_86 {dimension_numbers = #tpu.dot_dimension_numbers<[1], [0], [0], [1], [0, 0, 1, 1], [], []>} : vector<16x128xbf16>, vector<128x384xbf16>, vector<16x384xf32> -> vector<16x384xf32>
    %292 = vector.extract_strided_slice %289 {offsets = [0, 0], sizes = [16, 128], strides = [1, 1]} : vector<16x384xf32> to vector<16x128xf32>
    %293 = vector.extract_strided_slice %291 {offsets = [0, 0], sizes = [16, 128], strides = [1, 1]} : vector<16x384xf32> to vector<16x128xf32>
    %294 = arith.addf %292, %293 : vector<16x128xf32>
    %295 = arith.negf %294 : vector<16x128xf32>
    %296 = math.exp %295 : vector<16x128xf32>
    %cst_87 = arith.constant 1.000000e+00 : f32
    %297 = vector.broadcast %cst_87 : f32 to vector<16x128xf32>
    %298 = arith.addf %297, %296 : vector<16x128xf32>
    %299 = arith.divf %297, %298 : vector<16x128xf32>
    %300 = vector.extract_strided_slice %289 {offsets = [0, 128], sizes = [16, 128], strides = [1, 1]} : vector<16x384xf32> to vector<16x128xf32>
    %301 = vector.extract_strided_slice %291 {offsets = [0, 128], sizes = [16, 128], strides = [1, 1]} : vector<16x384xf32> to vector<16x128xf32>
    %302 = arith.addf %300, %301 : vector<16x128xf32>
    %303 = arith.negf %302 : vector<16x128xf32>
    %304 = math.exp %303 : vector<16x128xf32>
    %cst_88 = arith.constant 1.000000e+00 : f32
    %305 = vector.broadcast %cst_88 : f32 to vector<16x128xf32>
    %306 = arith.addf %305, %304 : vector<16x128xf32>
    %307 = arith.divf %305, %306 : vector<16x128xf32>
    %308 = vector.extract_strided_slice %289 {offsets = [0, 256], sizes = [16, 128], strides = [1, 1]} : vector<16x384xf32> to vector<16x128xf32>
    %309 = vector.extract_strided_slice %291 {offsets = [0, 256], sizes = [16, 128], strides = [1, 1]} : vector<16x384xf32> to vector<16x128xf32>
    %310 = arith.addf %309, %25 : vector<16x128xf32>
    %311 = arith.mulf %299, %310 : vector<16x128xf32>
    %312 = arith.addf %308, %311 : vector<16x128xf32>
    %313 = math.tanh %312 : vector<16x128xf32>
    %cst_89 = arith.constant 1.000000e+00 : f32
    %314 = vector.broadcast %cst_89 : f32 to vector<16x128xf32>
    %315 = arith.subf %314, %307 : vector<16x128xf32>
    %316 = arith.mulf %315, %313 : vector<16x128xf32>
    %317 = arith.mulf %307, %281 : vector<16x128xf32>
    %318 = arith.addf %316, %317 : vector<16x128xf32>
    %319 = vector.broadcast %286 : i32 to vector<16x1xi32>
    %320 = arith.cmpi sgt, %5, %319 : vector<16x1xi32>
    %cst_90 = arith.constant 0.000000e+00 : f32
    %321 = vector.shape_cast %320 : vector<16x1xi1> to vector<16x1xi1>
    %322 = vector.broadcast %321 : vector<16x1xi1> to vector<16x128xi1>
    %323 = vector.broadcast %cst_90 : f32 to vector<16x128xf32>
    %324 = arith.select %322, %318, %323 : vector<16x128xi1>, vector<16x128xf32>
    %325 = arith.truncf %324 : vector<16x128xf32> to vector<16x128xbf16>
    %c0_91 = arith.constant 0 : index
    %326 = arith.index_cast %285 : i32 to index
    %c0_92 = arith.constant 0 : index
    %c0_93 = arith.constant 0 : index
    %327 = vector.load %arg7[%c0_91, %326, %c0_92, %c0_93] : memref<1x8x16x128xbf16, #tpu.memory_space<vmem>>, vector<1x1x16x128xbf16>
    %328 = vector.shape_cast %327 : vector<1x1x16x128xbf16> to vector<16x128xbf16>
    %329 = vector.shape_cast %325 : vector<16x128xbf16> to vector<1x1x16x128xbf16>
    tpu.vector_store %arg7[%c0_91, %326, %c0_92, %c0_93], %329 {strides = array<i32>} : memref<1x8x16x128xbf16, #tpu.memory_space<vmem>>, vector<1x1x16x128xbf16>,
    %330 = vector.shape_cast %320 : vector<16x1xi1> to vector<16x1xi1>
    %331 = vector.broadcast %330 : vector<16x1xi1> to vector<16x128xi1>
    %332 = arith.select %331, %318, %281 : vector<16x128xi1>, vector<16x128xf32>
    %c6_i32 = arith.constant 6 : i32
    %c2_i32_94 = arith.constant 2 : i32
    %333 = arith.muli %c2_i32_94, %c6_i32 : i32
    %c7_i32_95 = arith.constant 7 : i32
    %334 = arith.subi %c7_i32_95, %333 : i32
    %335 = arith.muli %arg0, %334 : i32
    %336 = arith.addi %c6_i32, %335 : i32
    %337 = arith.addi %10, %336 : i32
    %338 = arith.index_cast %336 : i32 to index
    %c0_96 = arith.constant 0 : index
    %c0_97 = arith.constant 0 : index
    %339 = vector.load %arg9[%338, %c0_96, %c0_97] : memref<8x16x384xf32, #tpu.memory_space<vmem>>, vector<1x16x384xf32>
    %340 = vector.shape_cast %339 : vector<1x16x384xf32> to vector<16x384xf32>
    %341 = arith.truncf %332 : vector<16x128xf32> to vector<16x128xbf16>
    %cst_98 = arith.constant dense<0.000000e+00> : vector<16x384xf32>
    %342 = tpu.matmul %341, %4, %cst_98 {dimension_numbers = #tpu.dot_dimension_numbers<[1], [0], [0], [1], [0, 0, 1, 1], [], []>} : vector<16x128xbf16>, vector<128x384xbf16>, vector<16x384xf32> -> vector<16x384xf32>
    %343 = vector.extract_strided_slice %340 {offsets = [0, 0], sizes = [16, 128], strides = [1, 1]} : vector<16x384xf32> to vector<16x128xf32>
    %344 = vector.extract_strided_slice %342 {offsets = [0, 0], sizes = [16, 128], strides = [1, 1]} : vector<16x384xf32> to vector<16x128xf32>
    %345 = arith.addf %343, %344 : vector<16x128xf32>
    %346 = arith.negf %345 : vector<16x128xf32>
    %347 = math.exp %346 : vector<16x128xf32>
    %cst_99 = arith.constant 1.000000e+00 : f32
    %348 = vector.broadcast %cst_99 : f32 to vector<16x128xf32>
    %349 = arith.addf %348, %347 : vector<16x128xf32>
    %350 = arith.divf %348, %349 : vector<16x128xf32>
    %351 = vector.extract_strided_slice %340 {offsets = [0, 128], sizes = [16, 128], strides = [1, 1]} : vector<16x384xf32> to vector<16x128xf32>
    %352 = vector.extract_strided_slice %342 {offsets = [0, 128], sizes = [16, 128], strides = [1, 1]} : vector<16x384xf32> to vector<16x128xf32>
    %353 = arith.addf %351, %352 : vector<16x128xf32>
    %354 = arith.negf %353 : vector<16x128xf32>
    %355 = math.exp %354 : vector<16x128xf32>
    %cst_100 = arith.constant 1.000000e+00 : f32
    %356 = vector.broadcast %cst_100 : f32 to vector<16x128xf32>
    %357 = arith.addf %356, %355 : vector<16x128xf32>
    %358 = arith.divf %356, %357 : vector<16x128xf32>
    %359 = vector.extract_strided_slice %340 {offsets = [0, 256], sizes = [16, 128], strides = [1, 1]} : vector<16x384xf32> to vector<16x128xf32>
    %360 = vector.extract_strided_slice %342 {offsets = [0, 256], sizes = [16, 128], strides = [1, 1]} : vector<16x384xf32> to vector<16x128xf32>
    %361 = arith.addf %360, %25 : vector<16x128xf32>
    %362 = arith.mulf %350, %361 : vector<16x128xf32>
    %363 = arith.addf %359, %362 : vector<16x128xf32>
    %364 = math.tanh %363 : vector<16x128xf32>
    %cst_101 = arith.constant 1.000000e+00 : f32
    %365 = vector.broadcast %cst_101 : f32 to vector<16x128xf32>
    %366 = arith.subf %365, %358 : vector<16x128xf32>
    %367 = arith.mulf %366, %364 : vector<16x128xf32>
    %368 = arith.mulf %358, %332 : vector<16x128xf32>
    %369 = arith.addf %367, %368 : vector<16x128xf32>
    %370 = vector.broadcast %337 : i32 to vector<16x1xi32>
    %371 = arith.cmpi sgt, %5, %370 : vector<16x1xi32>
    %cst_102 = arith.constant 0.000000e+00 : f32
    %372 = vector.shape_cast %371 : vector<16x1xi1> to vector<16x1xi1>
    %373 = vector.broadcast %372 : vector<16x1xi1> to vector<16x128xi1>
    %374 = vector.broadcast %cst_102 : f32 to vector<16x128xf32>
    %375 = arith.select %373, %369, %374 : vector<16x128xi1>, vector<16x128xf32>
    %376 = arith.truncf %375 : vector<16x128xf32> to vector<16x128xbf16>
    %c0_103 = arith.constant 0 : index
    %377 = arith.index_cast %336 : i32 to index
    %c0_104 = arith.constant 0 : index
    %c0_105 = arith.constant 0 : index
    %378 = vector.load %arg7[%c0_103, %377, %c0_104, %c0_105] : memref<1x8x16x128xbf16, #tpu.memory_space<vmem>>, vector<1x1x16x128xbf16>
    %379 = vector.shape_cast %378 : vector<1x1x16x128xbf16> to vector<16x128xbf16>
    %380 = vector.shape_cast %376 : vector<16x128xbf16> to vector<1x1x16x128xbf16>
    tpu.vector_store %arg7[%c0_103, %377, %c0_104, %c0_105], %380 {strides = array<i32>} : memref<1x8x16x128xbf16, #tpu.memory_space<vmem>>, vector<1x1x16x128xbf16>,
    %381 = vector.shape_cast %371 : vector<16x1xi1> to vector<16x1xi1>
    %382 = vector.broadcast %381 : vector<16x1xi1> to vector<16x128xi1>
    %383 = arith.select %382, %369, %332 : vector<16x128xi1>, vector<16x128xf32>
    %c7_i32_106 = arith.constant 7 : i32
    %c2_i32_107 = arith.constant 2 : i32
    %384 = arith.muli %c2_i32_107, %c7_i32_106 : i32
    %c7_i32_108 = arith.constant 7 : i32
    %385 = arith.subi %c7_i32_108, %384 : i32
    %386 = arith.muli %arg0, %385 : i32
    %387 = arith.addi %c7_i32_106, %386 : i32
    %388 = arith.addi %10, %387 : i32
    %389 = arith.index_cast %387 : i32 to index
    %c0_109 = arith.constant 0 : index
    %c0_110 = arith.constant 0 : index
    %390 = vector.load %arg9[%389, %c0_109, %c0_110] : memref<8x16x384xf32, #tpu.memory_space<vmem>>, vector<1x16x384xf32>
    %391 = vector.shape_cast %390 : vector<1x16x384xf32> to vector<16x384xf32>
    %392 = arith.truncf %383 : vector<16x128xf32> to vector<16x128xbf16>
    %cst_111 = arith.constant dense<0.000000e+00> : vector<16x384xf32>
    %393 = tpu.matmul %392, %4, %cst_111 {dimension_numbers = #tpu.dot_dimension_numbers<[1], [0], [0], [1], [0, 0, 1, 1], [], []>} : vector<16x128xbf16>, vector<128x384xbf16>, vector<16x384xf32> -> vector<16x384xf32>
    %394 = vector.extract_strided_slice %391 {offsets = [0, 0], sizes = [16, 128], strides = [1, 1]} : vector<16x384xf32> to vector<16x128xf32>
    %395 = vector.extract_strided_slice %393 {offsets = [0, 0], sizes = [16, 128], strides = [1, 1]} : vector<16x384xf32> to vector<16x128xf32>
    %396 = arith.addf %394, %395 : vector<16x128xf32>
    %397 = arith.negf %396 : vector<16x128xf32>
    %398 = math.exp %397 : vector<16x128xf32>
    %cst_112 = arith.constant 1.000000e+00 : f32
    %399 = vector.broadcast %cst_112 : f32 to vector<16x128xf32>
    %400 = arith.addf %399, %398 : vector<16x128xf32>
    %401 = arith.divf %399, %400 : vector<16x128xf32>
    %402 = vector.extract_strided_slice %391 {offsets = [0, 128], sizes = [16, 128], strides = [1, 1]} : vector<16x384xf32> to vector<16x128xf32>
    %403 = vector.extract_strided_slice %393 {offsets = [0, 128], sizes = [16, 128], strides = [1, 1]} : vector<16x384xf32> to vector<16x128xf32>
    %404 = arith.addf %402, %403 : vector<16x128xf32>
    %405 = arith.negf %404 : vector<16x128xf32>
    %406 = math.exp %405 : vector<16x128xf32>
    %cst_113 = arith.constant 1.000000e+00 : f32
    %407 = vector.broadcast %cst_113 : f32 to vector<16x128xf32>
    %408 = arith.addf %407, %406 : vector<16x128xf32>
    %409 = arith.divf %407, %408 : vector<16x128xf32>
    %410 = vector.extract_strided_slice %391 {offsets = [0, 256], sizes = [16, 128], strides = [1, 1]} : vector<16x384xf32> to vector<16x128xf32>
    %411 = vector.extract_strided_slice %393 {offsets = [0, 256], sizes = [16, 128], strides = [1, 1]} : vector<16x384xf32> to vector<16x128xf32>
    %412 = arith.addf %411, %25 : vector<16x128xf32>
    %413 = arith.mulf %401, %412 : vector<16x128xf32>
    %414 = arith.addf %410, %413 : vector<16x128xf32>
    %415 = math.tanh %414 : vector<16x128xf32>
    %cst_114 = arith.constant 1.000000e+00 : f32
    %416 = vector.broadcast %cst_114 : f32 to vector<16x128xf32>
    %417 = arith.subf %416, %409 : vector<16x128xf32>
    %418 = arith.mulf %417, %415 : vector<16x128xf32>
    %419 = arith.mulf %409, %383 : vector<16x128xf32>
    %420 = arith.addf %418, %419 : vector<16x128xf32>
    %421 = vector.broadcast %388 : i32 to vector<16x1xi32>
    %422 = arith.cmpi sgt, %5, %421 : vector<16x1xi32>
    %cst_115 = arith.constant 0.000000e+00 : f32
    %423 = vector.shape_cast %422 : vector<16x1xi1> to vector<16x1xi1>
    %424 = vector.broadcast %423 : vector<16x1xi1> to vector<16x128xi1>
    %425 = vector.broadcast %cst_115 : f32 to vector<16x128xf32>
    %426 = arith.select %424, %420, %425 : vector<16x128xi1>, vector<16x128xf32>
    %427 = arith.truncf %426 : vector<16x128xf32> to vector<16x128xbf16>
    %c0_116 = arith.constant 0 : index
    %428 = arith.index_cast %387 : i32 to index
    %c0_117 = arith.constant 0 : index
    %c0_118 = arith.constant 0 : index
    %429 = vector.load %arg7[%c0_116, %428, %c0_117, %c0_118] : memref<1x8x16x128xbf16, #tpu.memory_space<vmem>>, vector<1x1x16x128xbf16>
    %430 = vector.shape_cast %429 : vector<1x1x16x128xbf16> to vector<16x128xbf16>
    %431 = vector.shape_cast %427 : vector<16x128xbf16> to vector<1x1x16x128xbf16>
    tpu.vector_store %arg7[%c0_116, %428, %c0_117, %c0_118], %431 {strides = array<i32>} : memref<1x8x16x128xbf16, #tpu.memory_space<vmem>>, vector<1x1x16x128xbf16>,
    %432 = vector.shape_cast %422 : vector<16x1xi1> to vector<16x1xi1>
    %433 = vector.broadcast %432 : vector<16x1xi1> to vector<16x128xi1>
    %434 = arith.select %433, %420, %383 : vector<16x128xi1>, vector<16x128xf32>
    %c8_i32_119 = arith.constant 8 : i32
    %c0_120 = arith.constant 0 : index
    %c0_121 = arith.constant 0 : index
    %435 = vector.load %arg8[%c0_120, %c0_121] : memref<16x128xf32, #tpu.memory_space<vmem>>, vector<16x128xf32>
    tpu.vector_store %arg8[%c0_120, %c0_121], %434 {strides = array<i32>} : memref<16x128xf32, #tpu.memory_space<vmem>>, vector<16x128xf32>,
    return
  }
  func.func @transform_0(%arg0: i32, %arg1: i32) -> (i32, i32, i32) {
    %c2_i32 = arith.constant 2 : i32
    %0 = arith.muli %c2_i32, %arg1 : i32
    %c0_i32 = arith.constant 0 : i32
    %1 = arith.subi %c0_i32, %0 : i32
    %2 = arith.muli %arg0, %1 : i32
    %3 = arith.addi %arg1, %2 : i32
    %c0_i32_0 = arith.constant 0 : i32
    %c0_i32_1 = arith.constant 0 : i32
    %c0_i32_2 = arith.constant 0 : i32
    return %3, %c0_i32_0, %c0_i32_1 : i32, i32, i32
  }
  func.func @transform_1(%arg0: i32, %arg1: i32) -> (i32, i32) {
    %c0_i32 = arith.constant 0 : i32
    %c0_i32_0 = arith.constant 0 : i32
    %c0_i32_1 = arith.constant 0 : i32
    return %c0_i32, %c0_i32_0 : i32, i32
  }
  func.func @transform_2(%arg0: i32, %arg1: i32) -> (i32, i32, i32) {
    %c0_i32 = arith.constant 0 : i32
    %c0_i32_0 = arith.constant 0 : i32
    %c0_i32_1 = arith.constant 0 : i32
    return %arg0, %c0_i32, %c0_i32_0 : i32, i32, i32
  }
  func.func @transform_3(%arg0: i32, %arg1: i32) -> (i32, i32, i32) {
    %c0_i32 = arith.constant 0 : i32
    %c0_i32_0 = arith.constant 0 : i32
    %c0_i32_1 = arith.constant 0 : i32
    return %arg0, %c0_i32, %c0_i32_0 : i32, i32, i32
  }
  func.func @transform_4(%arg0: i32, %arg1: i32) -> (i32, i32, i32) {
    %c0_i32 = arith.constant 0 : i32
    %c0_i32_0 = arith.constant 0 : i32
    %c0_i32_1 = arith.constant 0 : i32
    return %arg0, %c0_i32, %c0_i32_0 : i32, i32, i32
  }
  func.func @transform_5(%arg0: i32, %arg1: i32) -> (i32, i32, i32, i32) {
    %c2_i32 = arith.constant 2 : i32
    %0 = arith.muli %c2_i32, %arg1 : i32
    %c0_i32 = arith.constant 0 : i32
    %1 = arith.subi %c0_i32, %0 : i32
    %2 = arith.muli %arg0, %1 : i32
    %3 = arith.addi %arg1, %2 : i32
    %c0_i32_0 = arith.constant 0 : i32
    %c0_i32_1 = arith.constant 0 : i32
    %c0_i32_2 = arith.constant 0 : i32
    return %arg0, %3, %c0_i32_0, %c0_i32_1 : i32, i32, i32, i32
  }
}

</mosaic_0001>

<bundles_post_ra>
// kernel: tpu_custom_call.1
= control target key start
LH: loop header
LB: loop body
LE: loop exit
PB: predicated region body
PF: predicated region fallthrough
CT: control target
= control target key end

     0   :  { %s4820_s0 = inlined_call_operand.hbm [shape: bf16[8,16,128], index: 0, kind: input, shape index: {}]   ;;  %s4821_s1 = inlined_call_operand.vmem [shape: s32[16,1], index: 1, kind: input, shape index: {}]   ;;  %s4822_s2 = inlined_call_operand.hbm [shape: bf16[2,128,384], index: 2, kind: input, shape index: {}]   ;;  %s4823_s3 = inlined_call_operand.hbm [shape: bf16[2,128,384], index: 3, kind: input, shape index: {}]   ;;  %s4824_s4 = inlined_call_operand.vmem [shape: f32[2,2,384], index: 4, kind: input, shape index: {}]   ;;  %s4825_s5 = inlined_call_operand.hbm [shape: bf16[2,8,16,128], index: 5, kind: output, shape index: {}]  }
   0x1   :  { %4839 = sst [smem:[#allocation17_spill]] %s4822_s2 }
   0x2   :  { %10 = vsyncpa [#allocation5], 0 }
   0x3   :  { %12 = vsyncpa [#allocation5 + $0x1], 0 }
   0x4   :  { %13 = vsyncpa [#allocation8], 0 }
   0x5   :  { %15 = vsyncpa [#allocation8 + $0x1], 0 }
   0x6   :  { %16 = vsyncpa [#allocation6], 0 }
   0x7   :  { %18 = vsyncpa [#allocation6 + $0x1], 0  ;;  %s3760_s18 = smov 0   ;;  %s3762_s19 = smov 0  }
   0x8   :  { %s3764_s20 = smov 0   ;;  %s3766_s21 = smov 0  }
   0x9   :  { %s3768_s22 = smov 0   ;;  %s3770_s23 = smov 0  }
   0xa LB: > { %4840 = sst [smem:[#allocation14_spill]] %s3702_s20  ;;  %s3791_s24 = sadd.s32 4294967295, %s3714_s23   ;;  %s3714_s23 = sphi %s3770_s23, %s24_s23   ;;  %s3710_s22 = sphi %s3768_s22, %s4873_s22   ;;  %s3706_s21 = sphi %s3766_s21, %s4872_s21   ;;  %s3702_s20 = sphi %s3764_s20, %s4868_s20   ;;  %s3698_s19 = sphi %s3762_s19, %s4871_s19   ;;  %s3694_s18 = sphi %s3760_s18, %s4870_s18  }
   0xb   : > { %s2649_s25 = sadd.s32 4294967294, %s3714_s23   ;;  %s36_s26 = sadd.s32 1, %s3710_s22 }
   0xc   : > { %s98_s27 = sadd.s32 1, %s3702_s20  ;;  %p38_p0 = scmp.ge.s32.totalorder %s36_s26, 2 }
   0xd   : > { %p105_p1 = scmp.ne.s32.totalorder %s3702_s20, %s3698_s19  ;;  %p4829_p2 = scmp.eq.s32.totalorder %s3714_s23, 0 }
   0xe   : > { %p111_p3 = scmp.ne.s32.totalorder %s3698_s19, %s3694_s18  ;;  %s4875_s26 = smov (%p38_p0, %s36_s26), 0 }
   0xf   : > { %4841 = sst [smem:[#allocation15_spill]] %s4875_s26  ;;  %p3805_p4 = por %p4829_p2, %p105_p1 }
  0x10   : > { %p4827_p5 = scmp.eq.s32.totalorder %s3791_s24, 0  ;;  %s95_s29 = ssub.s32 %s3710_s22, %s4875_s26 }
  0x11   : > { %p197_p6 = scmp.eq.s32.totalorder %s3791_s24, 1  ;;  %p96_p7 = scmp.eq.s32.totalorder %s95_s29, 0 }
  0x12   : > { %p3815_p8 = por %p4827_p5, %p111_p3  ;;  %p203_p10 = scmp.eq.s32.totalorder %s2649_s25, 1 }
  0x13   : > { %p3819_p9 = por %p197_p6, %p105_p1  ;;  %p4828_p13 = scmp.lt.s32.totalorder %s3714_s23, 2 }
  0x14   : > { %s4843_s30 = scalar_select %p3815_p8, 1, 0 }
  0x15   : > { %s4844_s6 = scalar_select %p3819_p9, 1, 0 }
  0x16   : > { %s3824_s7 = scalar_select %p96_p7, %s3702_s20, %s98_s27  }
  0x17   : > { %p3826_p11 = por %p203_p10, %p111_p3  ;;  %s252_s9 = sand.u32 1, %s3714_s23  }
  0x18   : > { %4845 = sst [smem:[#allocation16_spill]] %s3824_s7  ;;  %s254_s10 = sand.u32 1, %s3702_s20  }
  0x19   : > { %s4846_s8 = scalar_select %p3826_p11, 1, 0 }
  0x1a   : > { %s3834_s11 = smul.u32 192, %s254_s10  ;;  %p3841_p0 = pnand %p4828_p13, %p3805_p4 }
  0x1b   : > { %s4826_s12 = smul.u32 3072, %s3710_s22  ;;  %s4848_s2 = sld [smem:[#allocation17_spill]] }
  0x1c   : > { %s4847_s13 = scalar_select %p3841_p0, 1, 0 }
  0x1d   : > { %s256_s17 = scalar_lea.vmem [#allocation7], %s3834_s11  ;;  %s3856_s27 = scalar_lea.sflag [#allocation8], %s252_s9 }
  0x1e   : > { %s263_s25 = sshll.u32 %s256_s17, 4  ;;  %p4833_p4 = pneg %p3841_p0  ;;  %s3853_s25 = int_to_ptr.vmem [resolvable:$true] %s263_s25 }
  0x21   : > { %s3850_s16 = scalar_lea.hbm %s4848_s2, %s4826_s12  ;;  %s3545_s14 = scalar_lea.hbm %s4848_s2, 6144 }
  0x22   : > { %s3540_s28 = scalar_lea.hbm %s3850_s16, 3072  ;;  %p3546_p10 = scmp.lt.u32.totalorder %s3850_s16, %s4848_s2 }
  0x23   : > { %p3541_p3 = scmp.ne.s32.totalorder %s3850_s16, %s3540_s28  ;;  %p3547_p12 = scmp.lt.u32.totalorder %s3545_s14, %s3540_s28 }
  0x24   : > { %p3549_p13 = scmp.lt.u32.totalorder %s3540_s28, %s3850_s16 }
  0x25   : > { %p3543_p6 = pnand %p4833_p4, %p3541_p3  ;;  %p3548_p5 = por %p3547_p12, %p3546_p10 }
  0x27   : > { %p3544_p7 = pneg %p3543_p6  ;;  %p3550_p2 = por %p3549_p13, %p3548_p5 }
  0x29   : > { %p3551_p1 = pnand %p3550_p2, %p3544_p7 }
  0x2b   : > { %3554 = shalt.err (!%p3551_p1)
}
  0x2c   : > { %s3555_s9 = scalar_lea.vmem %s3853_s25, 3072  ;;  %s3716_s17 = smov [#allocation7]  }
  0x2d   : > { %p3556_p3 = scmp.ne.s32.totalorder %s3853_s25, %s3555_s9  ;;  %s3560_s29 = sshll.u32 %s3716_s17, 4  ;;  %s3561_s29 = int_to_ptr.vmem [resolvable:$false] %s3560_s29 }
  0x2e   : > { %s3562_s12 = scalar_lea.vmem %s3561_s29, 6144  ;;  %p3563_p9 = scmp.lt.s32.totalorder %s3853_s25, %s3561_s29 }
  0x2f   : > { %p3558_p6 = pnand %p3556_p3, %p4833_p4  ;;  %p3564_p12 = scmp.lt.s32.totalorder %s3562_s12, %s3555_s9 }
  0x31   : > { %p3559_p11 = pneg %p3558_p6  ;;  %p3565_p10 = por %p3564_p12, %p3563_p9 }
  0x33   : > { %p3566_p5 = pnand %p3565_p10, %p3559_p11 }
  0x35   : > { %3569 = shalt.err (!%p3566_p5)
}
  0x36   : > { %s4831_s28 = smov 192   ;;  %s4832_s10 = smov 12  }
  0x37   : > { %3210 = dma.hbm_to_vmem [thread:$0]  (!%p3841_p0), %s3850_s16, 3072, %s3853_s25, %s3856_s27, %s4831_s28, %s4831_s28, %s4832_s10  }
  0x38   : > { %p300_p2 = scmp.lt.s32.totalorder %s3714_s23, 3  ;;  %p4849_p13 = scmp.ge.s32.totalorder %s3714_s23, 1 }
  0x39   : > { %s3719_s15 = smov [#allocation4]   ;;  %p4851_p11 = scmp.eq.s32.totalorder %s3714_s23, 0 }
  0x3a   : > { %p3890_p9 = pnand %p4849_p13, %p300_p2  ;;  %s242_s9 = sshll.u32 %s3719_s15, 4  ;;  %s243_s9 = int_to_ptr.vmem [resolvable:$true] %s242_s9 }
  0x3b   : > { %p4852_p1 = scmp.lt.s32.totalorder %s3714_s23, 2  ;;  %s3570_s16 = scalar_lea.hbm %s4820_s0, 1024 }
  0x3c   : > { %s4850_s14 = scalar_select %p3890_p9, 1, 0 }
  0x3d   : > { %p3898_p7 = pnand %p4852_p1, %p4851_p11  ;;  %p3571_p3 = scmp.ne.s32.totalorder %s4820_s0, %s3570_s16 }
  0x3e   : > { %p3577_p5 = scmp.lt.u32.totalorder %s3570_s16, %s4820_s0 }
  0x3f   : > { %p3572_p6 = pneg %p3898_p7 }
  0x41   : > { %p3573_p12 = pnand %p3572_p6, %p3571_p3 }
  0x43   : > { %p3574_p10 = pneg %p3573_p12 }
  0x45   : > { %p3579_p2 = pnand %p3577_p5, %p3574_p10 }
  0x47   : > { %3582 = shalt.err (!%p3579_p2)
}
  0x48   : > { %s3583_s2 = scalar_lea.vmem %s243_s9, 1024  ;;  %s3590_s29 = scalar_lea.vmem %s243_s9, 2048 }
  0x49   : > { %p3584_p13 = scmp.ne.s32.totalorder %s243_s9, %s3583_s2  ;;  %p3591_p4 = scmp.lt.s32.totalorder %s243_s9, %s243_s9 }
  0x4a   : > { %p3592_p8 = scmp.lt.s32.totalorder %s3590_s29, %s3583_s2 }
  0x4b   : > { %p3586_p11 = pnand %p3584_p13, %p3572_p6 }
  0x4c   : > { %p3593_p9 = por %p3592_p8, %p3591_p4 }
  0x4d   : > { %p3587_p1 = pneg %p3586_p11 }
  0x4f   : > { %p3594_p0 = pnand %p3593_p9, %p3587_p1 }
  0x51   : > { %3597 = shalt.err (!%p3594_p0)
}
  0x52   : > { %s3720_s28 = smov 64   ;;  %s3721_s12 = smov 4  }
  0x53   : > { %3207 = dma.hbm_to_vmem [thread:$0]  (!%p3898_p7), %s4820_s0, 1024, %s243_s9, [#allocation5], %s3720_s28, %s3720_s28, %s3721_s12  }
  0x54   : > { %s4854_s25 = smul.u32 3072, %s3710_s22  ;;  %s277_s2 = scalar_lea.vmem [#allocation9], %s3834_s11 }
  0x55   : > { %s284_s29 = sshll.u32 %s277_s2, 4  ;;  %p4855_p0 = scmp.ne.s32.totalorder %s4847_s13, 0  ;;  %s3926_s29 = int_to_ptr.vmem [resolvable:$true] %s284_s29 }
  0x56   : > { %s3923_s7 = scalar_lea.hbm %s4823_s3, %s4854_s25  ;;  %s3603_s26 = scalar_lea.hbm %s4823_s3, 6144 }
  0x57   : > { %s3598_s20 = scalar_lea.hbm %s3923_s7, 3072  ;;  %p4856_p4 = pneg %p4855_p0 }
  0x58   : > { %p3599_p8 = scmp.ne.s32.totalorder %s3923_s7, %s3598_s20  ;;  %p3604_p3 = scmp.lt.u32.totalorder %s3923_s7, %s4823_s3 }
  0x59   : > { %p3605_p6 = scmp.lt.u32.totalorder %s3603_s26, %s3598_s20  ;;  %p3607_p10 = scmp.lt.u32.totalorder %s3598_s20, %s3923_s7 }
  0x5a   : > { %p3601_p9 = pnand %p3599_p8, %p4856_p4 }
  0x5b   : > { %p3606_p12 = por %p3605_p6, %p3604_p3 }
  0x5c   : > { %p3602_p7 = pneg %p3601_p9 }
  0x5d   : > { %p3608_p5 = por %p3607_p10, %p3606_p12 }
  0x5f   : > { %p3609_p2 = pnand %p3608_p5, %p3602_p7 }
  0x61   : > { %3612 = shalt.err (!%p3609_p2)
}
  0x62   : > { %s3613_s11 = scalar_lea.vmem %s3926_s29, 3072  ;;  %p4857_p11 = pmov %p4856_p4 }
  0x63   : > { %p3614_p13 = scmp.ne.s32.totalorder %s3926_s29, %s3613_s11  ;;  %s3722_s10 = smov [#allocation9]  }
  0x64   : > { %s3618_s16 = sshll.u32 %s3722_s10, 4  ;;  %s3619_s16 = int_to_ptr.vmem [resolvable:$false] %s3618_s16 }
  0x65   : > { %p3616_p1 = pnand %p3614_p13, %p4857_p11  ;;  %s3620_s25 = scalar_lea.vmem %s3619_s16, 6144 }
  0x66   : > { %p3621_p4 = scmp.lt.s32.totalorder %s3926_s29, %s3619_s16  ;;  %p3622_p9 = scmp.lt.s32.totalorder %s3620_s25, %s3613_s11 }
  0x67   : > { %p3617_p8 = pneg %p3616_p1 }
  0x68   : > { %p3623_p3 = por %p3622_p9, %p3621_p4 }
  0x6a   : > { %p3624_p6 = pnand %p3623_p3, %p3617_p8 }
  0x6c   : > { %3627 = shalt.err (!%p3624_p6)
}
  0x6d   : > { %s4858_s20 = smov 12   ;;  %s4859_s15 = smov 192  }
  0x6e   : > { %3213 = dma.hbm_to_vmem [thread:$0]  (!%p4855_p0), %s3923_s7, 3072, %s3926_s29, %s3856_s27, %s4859_s15, %s4859_s15, %s4858_s20  }
  0x6f   : > { %p4860_p7 = scmp.ne.s32.totalorder %s4850_s14, 0 }
  0x70   : > { %p4861_p12 = scmp.eq.s32.totalorder (!%p4860_p7), %s3791_s24, 0 }
  0x71   : > { %304 = sbr.rel (%p4860_p7) target bundleno = 2354 (0x932), region = 40 }
  0x78   : > { %3681 = dma.done.wait (%p4861_p12), [#allocation5], 1024   ;;  %p4862_p10 = pmov %p4861_p12 }
  0x79   : > { %s315_s13 = sand.u32 1, %s3791_s24   ;;  %s3963_s2 = sand.u32 1, %s3698_s19  }
  0x7a   : > { %3683 = vsyncadd (%p4862_p10), [#allocation5], 4294966272  ;;  %s3192_s9 = smul.u32 192, %s3963_s2  ;;  %s316_s17 = scalar_lea.sflag [#allocation8], %s315_s13 }
  0x7b   : > { %p4863_p0 = scmp.ne.s32.totalorder %s4843_s30, 0 }
  0x7c   : > { %s3968_s7 = scalar_lea.vmem [#allocation7], %s3192_s9 }
  0x7d   : > { %3685 = dma.done.wait (%p4863_p0), %s316_s17, 6144  }
  0x7e   : > { %3687 = vsyncadd (%p4863_p0), %s316_s17, 4294961152  ;;  %v3723_v0 = vmov 0   ;;  %v3283_v1 = vld [vmem:[%s3968_s7 + $0x4] ss:$12 sps:$4 sm:$0xff]   ;;  %v3285_v2 = vld [vmem:[%s3968_s7] ss:$12 sps:$4 sm:$0xff]  }
  0x7f   : > { %704 = vmatprep.mubr.bf16.mxu0 %v3723_v0  ;;  %3281 = vset.pattern.permute.xlu0 %v3723_v0  ;;  %v3286_v3 = vld [vmem:[%s3968_s7 + $0x1c] ss:$12 sps:$4 sm:$0xff]   ;;  %v3288_v4 = vld [vmem:[%s3968_s7 + $0x18] ss:$12 sps:$4 sm:$0xff]   ;;  %v3289_v5 = vld [vmem:[%s3968_s7 + $0x34] ss:$12 sps:$4 sm:$0xff]  }
  0x80   : > { %3282 = vset.pattern.permute.xlu1 %v3723_v0  ;;  %672 = vmatprep.subr.bf16.mxu0 %v3283_v1  ;;  %v3291_v6 = vld [vmem:[%s3968_s7 + $0x30] ss:$12 sps:$4 sm:$0xff]   ;;  %v3292_v7 = vld [vmem:[%s3968_s7 + $0x4c] ss:$12 sps:$4 sm:$0xff]   ;;  %v3294_v8 = vld [vmem:[%s3968_s7 + $0x48] ss:$12 sps:$4 sm:$0xff]  }
  0x81   : > { %673 = vmatpush1.bf16.msra.mxu0 %v3285_v2  ;;  %v3295_v9 = vld [vmem:[%s3968_s7 + $0x64] ss:$12 sps:$4 sm:$0xff]   ;;  %v3307_v10 = vld [vmem:[%s3968_s7 + $0x8] ss:$12 sps:$4 sm:$0xff]   ;;  %v3309_v12 = vld [vmem:[%s3968_s7 + $0x20] ss:$12 sps:$4 sm:$0xff]  }
  0x82   : > { %674 = vmatprep.subr.bf16.mxu0 %v3286_v3  ;;  %v3308_v11 = vld [vmem:[#allocation4] sm:$0xff]   ;;  %2996 = vmatprep.subr.bf16.mxu1 %v3307_v10  ;;  %v3298_v15 = vld [vmem:[%s3968_s7 + $0x7c] ss:$12 sps:$4 sm:$0xff]   ;;  %s3997_s24 = scalar_lea.vmem [#allocation9], %s3192_s9  ;;  %v3304_v21 = vld [vmem:[%s3968_s7 + $0xac] ss:$12 sps:$4 sm:$0xff]  }
  0x83   : > { %v3297_v13 = vld [vmem:[%s3968_s7 + $0x60] ss:$12 sps:$4 sm:$0xff]   ;;  %2997 = vmatpush3.bf16.msra.mxu1 %v3307_v10  ;;  %3012 = vmatprep.mubr.bf16.mxu1 %v3308_v11  ;;  %v3310_v14 = vld [vmem:[%s3968_s7 + $0x38] ss:$12 sps:$4 sm:$0xff]   ;;  %v3312_v17 = vld [vmem:[%s3968_s7 + $0x50] ss:$12 sps:$4 sm:$0xff]  }
  0x84   : > { %2998 = vmatprep.subr.bf16.mxu1 %v3309_v12  ;;  %v3300_v16 = vld [vmem:[%s3968_s7 + $0x78] ss:$12 sps:$4 sm:$0xff]   ;;  %v3301_v18 = vld [vmem:[%s3968_s7 + $0x94] ss:$12 sps:$4 sm:$0xff]   ;;  %v3303_v19 = vld [vmem:[%s3968_s7 + $0x90] ss:$12 sps:$4 sm:$0xff]  }
  0x85   : > { %675 = vmatpush1.bf16.msra.mxu0 %v3288_v4  ;;  %v3313_v20 = vld [vmem:[%s3968_s7 + $0x68] ss:$12 sps:$4 sm:$0xff]   ;;  %v3315_v23 = vld [vmem:[%s3968_s7 + $0x80] ss:$12 sps:$4 sm:$0xff]   ;;  %v3316_v24 = vld [vmem:[%s3968_s7 + $0x98] ss:$12 sps:$4 sm:$0xff]  }
  0x86   : > { %676 = vmatprep.subr.bf16.mxu0 %v3289_v5  ;;  %v3306_v22 = vld [vmem:[%s3968_s7 + $0xa8] ss:$12 sps:$4 sm:$0xff]   ;;  %v3724_v25 = vmov 0.0   ;;  %v3318_v27 = vld [vmem:[%s3968_s7 + $0xb0] ss:$12 sps:$4 sm:$0xff]   ;;  %s1406_s30 = smul.u32 3, %s3706_s21 }
  0x87   : > { %2999 = vmatpush3.bf16.msra.mxu1 %v3309_v12  ;;  %v4006_v26 = vld [vmem:[%s3997_s24 + $0x8] ss:$12 sps:$4 sm:$0xff]   ;;  %v4012_v28 = vld [vmem:[%s3997_s24 + $0x20] ss:$12 sps:$4 sm:$0xff]   ;;  %v4017_v30 = vld [vmem:[%s3997_s24 + $0x4] ss:$12 sps:$4 sm:$0xff]  }
  0x88   : > { %3000 = vmatprep.subr.bf16.mxu1 %v3310_v14  ;;  %v3311_v29 = vld [vmem:[#allocation4 + $0x8] sm:$0xff]   ;;  %s937_s27 = smul.u32 7, %s3706_s21  ;;  %v4022_v31 = vld [vmem:[%s3997_s24 + $0x38] ss:$12 sps:$4 sm:$0xff]   ;;  %s4025_s14 = sadd.s32 2, %s1406_s30  ;;  %v3314_v32 = vld [vmem:[#allocation4 + $0x10] sm:$0xff]  }
  0x89   : > { %677 = vmatpush1.bf16.msra.mxu0 %v3291_v6  ;;  %v4028_v33 = vld [vmem:[%s3997_s24] ss:$12 sps:$4 sm:$0xff]   ;;  %v4033_v34 = vld [vmem:[%s3997_s24 + $0x1c] ss:$12 sps:$4 sm:$0xff]   ;;  %v4052_v39 = vld [vmem:[%s3997_s24 + $0x18] ss:$12 sps:$4 sm:$0xff]   ;;  %v1547_v42 = vstv %s4025_s14 }
  0x8a   : > { %678 = vmatprep.subr.bf16.mxu0 %v3292_v7  ;;  %v1205_v35 = vstv %s937_s27  ;;  %v4037_v36 = vld [vmem:[%s3997_s24 + $0x50] ss:$12 sps:$4 sm:$0xff]   ;;  %v4043_v37 = vld [vmem:[%s4821_s1] sm:$0xff]  ;;  %v4048_v38 = vld [vmem:[%s4821_s1 + $0x8] sm:$0xff]  ;;  %s1577_s11 = sadd.s32 3, %s3706_s21  ;;  %s4088_s10 = ssub.s32 4, %s3706_s21 }
  0x8b   : > { %3001 = vmatpush3.bf16.msra.mxu1 %v3310_v14  ;;  %vm1206_vm0 = vcmp.gt.s32.totalorder %v4043_v37, %v1205_v35  ;;  %vm1207_vm1 = vcmp.gt.s32.totalorder %v4048_v38, %v1205_v35  ;;  %v4058_v40 = vld [vmem:[%s3997_s24 + $0x34] ss:$12 sps:$4 sm:$0xff]   ;;  %v4071_v45 = vld [vmem:[%s3997_s24 + $0x30] ss:$12 sps:$4 sm:$0xff]   ;;  %vm1548_vm2 = vcmp.gt.s32.totalorder %v4043_v37, %v1547_v42  ;;  %v4079_v47 = vld [vmem:[%s3997_s24 + $0x4c] ss:$12 sps:$4 sm:$0xff]   ;;  %v4081_v48 = vstv %s1577_s11 }
  0x8c   : > { %3002 = vmatprep.subr.bf16.mxu1 %v3312_v17  ;;  %v1208_v41 = vsel %vm1206_vm0, 1, %v3723_v0  ;;  %v4064_v43 = vld [vmem:[%s3997_s24 + $0x68] ss:$12 sps:$4 sm:$0xff]   ;;  %v1209_v44 = vsel %vm1207_vm1, 1, %v3723_v0  ;;  %v3317_v46 = vld [vmem:[#allocation4 + $0x18] sm:$0xff]   ;;  %v3320_v49 = vld [vmem:[#allocation4 + $0x20] sm:$0xff]   ;;  %vm1718_vm3 = vcmp.gt.s32.totalorder %v4043_v37, %v4081_v48  ;;  %v1887_v54 = vstv %s4088_s10 }
  0x8d   : > { %679 = vmatpush1.bf16.msra.mxu0 %v3294_v8  ;;  %1211 = vperm.xlu0 %3281, %v1208_v41   ;;  %v4085_v50 = vld [vmem:[%s3997_s24 + $0x80] ss:$12 sps:$4 sm:$0xff]   ;;  %s1917_s16 = smul.u32 4294967293, %s3706_s21  ;;  %v1550_v51 = vsel %vm1548_vm2, 1, %v3723_v0  ;;  %v4095_v52 = vld [vmem:[%s3997_s24 + $0x48] ss:$12 sps:$4 sm:$0xff]   ;;  %vm1888_vm4 = vcmp.gt.s32.totalorder %v4043_v37, %v1887_v54  ;;  %vm1549_vm11 = vcmp.gt.s32.totalorder %v4048_v38, %v1547_v42  ;;  %vm1719_vm12 = vcmp.gt.s32.totalorder %v4048_v38, %v4081_v48 }
  0x8e   : > { %680 = vmatprep.subr.bf16.mxu0 %v3295_v9  ;;  %v4101_v53 = vld [vmem:[%s3997_s24 + $0x64] ss:$12 sps:$4 sm:$0xff]   ;;  %s2088_s20 = smul.u32 4294967291, %s3706_s21  ;;  %v1720_v56 = vsel %vm1718_vm3, 1, %v3723_v0  ;;  %v4115_v57 = vld [vmem:[%s3997_s24 + $0x60] ss:$12 sps:$4 sm:$0xff]   ;;  %vm1889_vm13 = vcmp.gt.s32.totalorder %v4048_v38, %v1887_v54 }
  0x8f   : > { %3003 = vmatpush3.bf16.msra.mxu1 %v3312_v17  ;;  %v4106_v55 = vld [vmem:[%s3997_s24 + $0x98] ss:$12 sps:$4 sm:$0xff]   ;;  %s4108_s25 = sadd.s32 5, %s1917_s16  ;;  %v3328_v58 = vld [vmem:[#allocation4 + $0x28] sm:$0xff]   ;;  %v3336_v61 = vld [vmem:[#allocation4 + $0x30] sm:$0xff]   ;;  %s2259_s13 = smul.u32 4294967289, %s3706_s21 }
  0x90   : > { %3004 = vmatprep.subr.bf16.mxu1 %v3313_v20  ;;  %v4123_v59 = vld [vmem:[%s3997_s24 + $0x7c] ss:$12 sps:$4 sm:$0xff]   ;;  %v2058_v60 = vstv %s4108_s25  ;;  %s4130_s15 = sadd.s32 6, %s2088_s20  ;;  %v1890_v63 = vsel %vm1888_vm4, 1, %v3723_v0  ;;  %v4137_v1 = vld [vmem:[%s3997_s24 + $0x78] ss:$12 sps:$4 sm:$0xff]  }
  0x91   : > { %681 = vmatpush1.bf16.msra.mxu0 %v3297_v13  ;;  %1214 = vperm.xlu0 %3281, %v1209_v44   ;;  %v4128_v62 = vld [vmem:[%s3997_s24 + $0xb0] ss:$12 sps:$4 sm:$0xff]   ;;  %vm2059_vm5 = vcmp.gt.s32.totalorder %v4043_v37, %v2058_v60  ;;  %v4144_v2 = vld [vmem:[%s3997_s24 + $0x94] ss:$12 sps:$4 sm:$0xff]   ;;  %v2229_v3 = vstv %s4130_s15  ;;  %s4148_s9 = sadd.s32 7, %s2259_s13  ;;  %v3725_v12 = vmov 0.0|0.0   ;;  %v481_v13 = vlaneseq }
  0x92   : > { %682 = vmatprep.subr.bf16.mxu0 %v3298_v15  ;;  %v3342_v4 = vld [vmem:[#allocation4 + $0x38] sm:$0xff]   ;;  %v2061_v5 = vsel %vm2059_vm5, 1, %v3723_v0  ;;  %vm2230_vm6 = vcmp.gt.s32.totalorder %v4043_v37, %v2229_v3  ;;  %v2400_v8 = vstv %s4148_s9  ;;  %v4168_v10 = vld [vmem:[%s3997_s24 + $0xa8] ss:$12 sps:$4 sm:$0xff]   ;;  %vm3726_vm8 = vmmov 0   ;;  %p375_p5 = scmp.lt.s32.totalorder %s3706_s21, 1 }
  0x93   : > { %3005 = vmatpush3.bf16.msra.mxu1 %v3313_v20  ;;  %v4154_v6 = vld [vmem:[%s3997_s24 + $0x90] ss:$12 sps:$4 sm:$0xff]   ;;  %v4162_v7 = vld [vmem:[%s3997_s24 + $0xac] ss:$12 sps:$4 sm:$0xff]   ;;  %v2232_v9 = vsel %vm2230_vm6, 1, %v3723_v0  ;;  %vm2401_vm7 = vcmp.gt.s32.totalorder %v4043_v37, %v2400_v8  ;;  %v482_v14 = vshrl.u32 %v481_v13, 7  ;;  %vm2060_vm14 = vcmp.gt.s32.totalorder %v4048_v38, %v2058_v60 }
  0x94   : > { %3006 = vmatprep.subr.bf16.mxu1 %v3315_v23  ;;  %s376_s17 = scalar_select %p375_p5, %s3706_s21, 1  ;;  %v1891_v13 = vsel %vm1889_vm13, 1, %v3723_v0  ;;  %vm2231_vm15 = vcmp.gt.s32.totalorder %v4048_v38, %v2229_v3  ;;  %vm2402_vm0 = vcmp.gt.s32.totalorder %v4048_v38, %v2400_v8 }
  0x95   : > { %683 = vmatpush1.bf16.msra.mxu0 %v3300_v16  ;;  %1553 = vperm.xlu0 %3281, %v1550_v51   ;;  %v483_v15 = vsub.s32 0, %v482_v14  ;;  %s1235_s26 = smul.u32 5, %s3706_s21  ;;  %v487_v17 = vsub.s32 1, %v482_v14  ;;  %v491_v44 = vsub.s32 2, %v482_v14  ;;  %v1721_v51 = vsel %vm1719_vm12, 1, %v3723_v0  ;;  %s2657_s11 = sshll.u32 %s3963_s2, 6 }
  0x96   : > { %684 = vmatprep.subr.bf16.mxu0 %v3301_v18  ;;  %s3193_s7 = smul.u32 6, %s376_s17  ;;  %s4325_s25 = scalar_lea.vmem [#allocation10], %s2657_s11 }
  0x97   : > { %3007 = vmatpush3.bf16.msra.mxu1 %v3315_v23  ;;  %s1236_s28 = sadd.s32 1, %s1235_s26  ;;  %s2835_s14 = smul.u32 336, %s3706_s21 }
  0x98   : > { %3008 = vmatprep.subr.bf16.mxu1 %v3316_v24  ;;  %s4222_s29 = scalar_lea.vmem %s4824_s4, %s3193_s7  ;;  %v1376_v18 = vstv %s1236_s28  ;;  %s2838_s16 = smul.u32 56, %s3706_s21 }
  0x99   : > { %685 = vmatpush1.bf16.msra.mxu0 %v3303_v19  ;;  %1723 = vperm.xlu0 %3281, %v1720_v56   ;;  %v479_v16 = vld [vmem:[%s4222_s29] ss:$2 sm:$0x7]  ;;  %vm1377_vm9 = vcmp.gt.s32.totalorder %v4043_v37, %v1376_v18  ;;  %vm1378_vm10 = vcmp.gt.s32.totalorder %v4048_v38, %v1376_v18  ;;  %s4308_s12 = scalar_lea.vmem [#allocation3], %s2835_s14  ;;  %s2726_s15 = smul.u32 240, %s3706_s21 }
  0x9a   : > { %686 = vmatprep.subr.bf16.mxu0 %v3304_v21  ;;  %v4226_v19 = vrot.slane %v479_v16, %v483_v15  ;;  %v4230_v20 = vrot.slane %v479_v16, %v487_v17  ;;  %v1379_v21 = vsel %vm1377_vm9, 1, %v3723_v0  ;;  %v1380_v23 = vsel %vm1378_vm10, 1, %v3723_v0  ;;  %s1230_s20 = scalar_lea.vmem %s4325_s25, %s2838_s16 [#allocation10]  ;;  %s2739_s9 = smul.u32 40, %s3706_s21 }
  0x9b   : > { %3009 = vmatpush3.bf16.msra.mxu1 %v3316_v24  ;;  %1382 = vperm.xlu1 %3282, %v1379_v21   ;;  %v2062_v21 = vsel %vm2060_vm14, 1, %v3723_v0  ;;  %s4368_s13 = scalar_lea.vmem [#allocation3], %s2726_s15  ;;  %s2742_s7 = smul.u32 144, %s3706_s21 }
  0x9c   : > { %3010 = vmatprep.subr.bf16.mxu1 %v3318_v27  ;;  %s2536_s17 = scalar_lea.vmem %s4325_s25, %s2739_s9 [#allocation10]  ;;  %s2755_s27 = smul.u32 24, %s3706_s21 }
  0x9d   : > { %687 = vmatpush1.bf16.msra.mxu0 %v3306_v22  ;;  %1893 = vperm.xlu0 %3281, %v1890_v63   ;;  %s4459_s30 = scalar_lea.vmem [#allocation3], %s2742_s7  ;;  %s2546_s28 = smul.u32 48, %s3706_s21 }
  0x9e   : > { %3028 = vmatprep.subr.bf16.mxu0 %v3724_v25  ;;  %s2544_s26 = scalar_lea.vmem %s4325_s25, %s2755_s27 [#allocation10]  ;;  %s2845_s11 = smul.u32 48, %s4088_s10 }
  0x9f   : > { %3011 = vmatpush3.bf16.msra.mxu1 %v3318_v27  ;;  %1385 = vperm.xlu1 %3282, %v1380_v23   ;;  %s4556_s14 = scalar_lea.vmem [#allocation3], %s2546_s28  ;;  %p4864_p13 = scmp.ne.s32.totalorder %s4844_s6, 0 }
  0xa0   : > { %705 = vmatmul.mubr.bf16.vlgmr.msra.gmra.mrb[0].mxu0 %v3308_v11  ;;  %1077 = vmatprep.subr.bf16.mxu1 %v4017_v30  ;;  %v2403_v11 = vsel %vm2401_vm7, 1, %v3723_v0  ;;  %s4614_s16 = scalar_lea.vmem [#allocation3], %s2845_s11 }
  0xa1   : > { %714 = vmatprep.mubr.bf16.mxu0 %v3723_v0  ;;  %3029 = vmatpush3.bf16.msra.mxu0 %v4006_v26 }
  0xa2   : > { %3030 = vmatprep.subr.bf16.mxu0 %v3724_v25  ;;  %3013 = vmatmul.mubr.bf16.vlgmr.msra.gmra.mrb[0].mxu1 %v3311_v29 }
  0xa3   : > { %1078 = vmatpush1.bf16.msra.mxu1 %v4028_v33  ;;  %3016 = vmatprep.mubr.bf16.mxu1 %v3314_v32 }
  0xa4   : > { %1079 = vmatprep.subr.bf16.mxu1 %v4033_v34  ;;  %2064 = vperm.xlu0 %3281, %v2061_v5  }
  0xa5   : > { %3031 = vmatpush3.bf16.msra.mxu0 %v4012_v28 }
  0xa6   : > { %3032 = vmatprep.subr.bf16.mxu0 %v3724_v25 }
  0xa7   : > { %1080 = vmatpush1.bf16.msra.mxu1 %v4052_v39 }
  0xa8   : > { %715 = vmatmul.mubr.bf16.gmra.mrb[4].mxu0 %v3311_v29  ;;  %1081 = vmatprep.subr.bf16.mxu1 %v4058_v40 }
  0xa9   : > { %724 = vmatprep.mubr.bf16.mxu0 %v3723_v0  ;;  %3033 = vmatpush3.bf16.msra.mxu0 %v4022_v31 }
  0xaa   : > { %3034 = vmatprep.subr.bf16.mxu0 %v3724_v25  ;;  %3017 = vmatmul.mubr.bf16.gmra.mrb[4].mxu1 %v3317_v46 }
  0xab   : > { %1082 = vmatpush1.bf16.msra.mxu1 %v4071_v45  ;;  %3020 = vmatprep.mubr.bf16.mxu1 %v3320_v49 }
  0xac   : > { %1083 = vmatprep.subr.bf16.mxu1 %v4079_v47  ;;  %2235 = vperm.xlu0 %3281, %v2232_v9  }
  0xad   : > { %3035 = vmatpush3.bf16.msra.mxu0 %v4037_v36 }
  0xae   : > { %3036 = vmatprep.subr.bf16.mxu0 %v3724_v25 }
  0xaf   : > { %1084 = vmatpush1.bf16.msra.mxu1 %v4095_v52 }
  0xb0   : > { %725 = vmatmul.mubr.bf16.gmra.mrb[8].mxu0 %v3314_v32  ;;  %1085 = vmatprep.subr.bf16.mxu1 %v4101_v53 }
  0xb1   : > { %734 = vmatprep.mubr.bf16.mxu0 %v3723_v0  ;;  %3037 = vmatpush3.bf16.msra.mxu0 %v4064_v43 }
  0xb2   : > { %3038 = vmatprep.subr.bf16.mxu0 %v3724_v25  ;;  %3021 = vmatmul.mubr.bf16.gmra.mrb[8].mxu1 %v3328_v58 }
  0xb3   : > { %1086 = vmatpush1.bf16.msra.mxu1 %v4115_v57  ;;  %3024 = vmatprep.mubr.bf16.mxu1 %v3336_v61 }
  0xb4   : > { %1087 = vmatprep.subr.bf16.mxu1 %v4123_v59  ;;  %2406 = vperm.xlu0 %3281, %v2403_v11  }
  0xb5   : > { %3039 = vmatpush3.bf16.msra.mxu0 %v4085_v50 }
  0xb6   : > { %3040 = vmatprep.subr.bf16.mxu0 %v3724_v25 }
  0xb7   : > { %1088 = vmatpush1.bf16.msra.mxu1 %v4137_v1 }
  0xb8   : > { %735 = vmatmul.mubr.bf16.gmra.mrb[12].mxu0 %v3317_v46  ;;  %1089 = vmatprep.subr.bf16.mxu1 %v4144_v2  ;;  %v1551_v46 = vsel %vm1549_vm11, 1, %v3723_v0 }
  0xb9   : > { %744 = vmatprep.mubr.bf16.mxu0 %v3723_v0  ;;  %3041 = vmatpush3.bf16.msra.mxu0 %v4106_v55 }
  0xba   : > { %3042 = vmatprep.subr.bf16.mxu0 %v3724_v25  ;;  %3025 = vmatmul.mubr.bf16.gmra.mrb[12].mxu1 %v3342_v4 }
  0xbb   : > { %1090 = vmatpush1.bf16.msra.mxu1 %v4154_v6  ;;  %1109 = vmatprep.mubr.bf16.mxu1 %v3723_v0 }
  0xbc   : > { %1091 = vmatprep.subr.bf16.mxu1 %v4162_v7  ;;  %1556 = vperm.xlu1 %3282, %v1551_v46  }
  0xbd   : > { %3043 = vmatpush3.bf16.msra.mxu0 %v4128_v62 }
  0xbe   : > { %3048 = vmatprep.subr.bf16.mxu0 %v3724_v25 }
  0xbf   : > { %1092 = vmatpush1.bf16.msra.mxu1 %v4168_v10 }
  0xc0   : > { %745 = vmatmul.mubr.bf16.gmra.mrb[16].mxu0 %v3320_v49  ;;  %1248 = vmatprep.subr.bf16.mxu1 %v4017_v30  ;;  %v4244_v49 = vrot.slane %v479_v16, %v491_v44  ;;  %v2233_v44 = vsel %vm2231_vm15, 1, %v3723_v0 }
  0xc1   : > { %754 = vmatprep.mubr.bf16.mxu0 %v3723_v0  ;;  %1726 = vperm.xlu1 %3282, %v1721_v51  }
  0xc2   : > { %1110 = vmatmul.mubr.bf16.vlgmr.msra.gmra.mrb[16].mxu1 %v3725_v12 }
  0xc3   : > { %1249 = vmatpush1.bf16.msra.mxu1 %v4028_v33  ;;  %1280 = vmatprep.mubr.bf16.mxu1 %v3723_v0 }
  0xc4   : > { %1250 = vmatprep.subr.bf16.mxu1 %v4033_v34 }
  0xc5   : > { %1896 = vperm.xlu1 %3282, %v1891_v13  }
  0xc7   : > { %1251 = vmatpush1.bf16.msra.mxu1 %v4052_v39 }
  0xc8   : > { %755 = vmatmul.mubr.bf16.gmra.mrb[20].mxu0 %v3328_v58  ;;  %1252 = vmatprep.subr.bf16.mxu1 %v4058_v40 }
  0xc9   : > { %764 = vmatprep.mubr.bf16.mxu0 %v3723_v0  ;;  %2067 = vperm.xlu1 %3282, %v2062_v21  }
  0xcb   : > { %1253 = vmatpush1.bf16.msra.mxu1 %v4071_v45 }
  0xcc   : > { %1254 = vmatprep.subr.bf16.mxu1 %v4079_v47 }
  0xcd   : > { %2238 = vperm.xlu1 %3282, %v2233_v44  }
  0xcf   : > { %1255 = vmatpush1.bf16.msra.mxu1 %v4095_v52 }
  0xd0   : > { %765 = vmatmul.mubr.bf16.gmra.mrb[24].mxu0 %v3336_v61  ;;  %1256 = vmatprep.subr.bf16.mxu1 %v4101_v53 }
  0xd1   : > { %774 = vmatprep.mubr.bf16.mxu0 %v3723_v0 }
  0xd3   : > { %1257 = vmatpush1.bf16.msra.mxu1 %v4115_v57 }
  0xd4   : > { %1258 = vmatprep.subr.bf16.mxu1 %v4123_v59 }
  0xd7   : > { %1259 = vmatpush1.bf16.msra.mxu1 %v4137_v1 }
  0xd8   : > { %775 = vmatmul.mubr.bf16.gmra.mrb[28].mxu0 %v3342_v4  ;;  %1260 = vmatprep.subr.bf16.mxu1 %v4144_v2 }
  0xd9   : > { %3044 = vmatprep.mubr.msk.bf16.mxu0 %vm3726_vm8, %v3724_v25 }
  0xdb   : > { %1261 = vmatpush1.bf16.msra.mxu1 %v4154_v6 }
  0xdc   : > { %1262 = vmatprep.subr.bf16.mxu1 %v4162_v7 }
  0xdf   : > { %1263 = vmatpush1.bf16.msra.mxu1 %v4168_v10 }
  0xe0   : > { %3045 = vmatmul.mubr.bf16.vlgmr.msra.gmra.mrb[32].mxu0 %v3725_v12  ;;  %1419 = vmatprep.subr.bf16.mxu1 %v4017_v30 }
  0xe1   : > { %3049 = vmatpush3.bf16.msra.mxu0 %v4006_v26  ;;  %3064 = vmatprep.mubr.msk.bf16.mxu0 %vm3726_vm8, %v3724_v25 }
  0xe2   : > { %3050 = vmatprep.subr.bf16.mxu0 %v3724_v25 }
  0xe5   : > { %3051 = vmatpush3.bf16.msra.mxu0 %v4012_v28 }
  0xe6   : > { %3052 = vmatprep.subr.bf16.mxu0 %v3724_v25 }
  0xe9   : > { %3053 = vmatpush3.bf16.msra.mxu0 %v4022_v31 }
  0xea   : > { %3054 = vmatprep.subr.bf16.mxu0 %v3724_v25 }
  0xed   : > { %3055 = vmatpush3.bf16.msra.mxu0 %v4037_v36 }
  0xee   : > { %3056 = vmatprep.subr.bf16.mxu0 %v3724_v25 }
  0xf1   : > { %3057 = vmatpush3.bf16.msra.mxu0 %v4064_v43 }
  0xf2   : > { %3058 = vmatprep.subr.bf16.mxu0 %v3724_v25 }
  0xf5   : > { %3059 = vmatpush3.bf16.msra.mxu0 %v4085_v50 }
  0xf6   : > { %3060 = vmatprep.subr.bf16.mxu0 %v3724_v25 }
  0xf9   : > { %3061 = vmatpush3.bf16.msra.mxu0 %v4106_v55 }
  0xfa   : > { %3062 = vmatprep.subr.bf16.mxu0 %v3724_v25 }
  0xfd   : > { %3063 = vmatpush3.bf16.msra.mxu0 %v4128_v62 }
  0xfe   : > { %3068 = vmatprep.subr.bf16.mxu0 %v3724_v25 }
 0x173   : > { %v706_v22 = vpop.f32.mrb[0].mxu0 }
 0x174   : > { %v707_v24 = vadd.f32 %v706_v22, %v4226_v19  ;;  %v708_v27 = vpop.f32.mrb[1].mxu0 }
 0x175   : > { %v709_v29 = vadd.f32 %v708_v27, %v4230_v20  ;;  %v710_v32 = vpop.f32.mrb[2].mxu0  ;;  %v3014_v5 = vpop.f32.mrb[0].mxu1 }
 0x176   : > { %882 = vst [vmem:[#allocation3] sm:$0xff] %v707_v24  ;;  %v711_v35 = vadd.f32 %v710_v32, %v4226_v19  ;;  %v712_v37 = vpop.f32.mrb[3].mxu0  ;;  %v828_v11 = vadd.f32 %v3014_v5, %v4244_v49  ;;  %v819_v12 = vpop.f32.mrb[1].mxu1 }
 0x177   : > { %883 = vst [vmem:[#allocation3 + $0x8] sm:$0xff] %v709_v29  ;;  %v713_v41 = vadd.f32 %v712_v37, %v4230_v20  ;;  %v820_v54 = vadd.f32 %v819_v12, %v4244_v49  ;;  %v3015_v14 = vpop.f32.mrb[2].mxu1 }
 0x178   : > { %885 = vst [vmem:[#allocation3 + $0x18] sm:$0xff] %v711_v35  ;;  %890 = vst [vmem:[#allocation3 + $0x40] sm:$0xff] %v828_v11  ;;  %v831_v15 = vadd.f32 %v3015_v14, %v4244_v49  ;;  %v822_v16 = vpop.f32.mrb[3].mxu1 }
 0x179   : > { %886 = vst [vmem:[#allocation3 + $0x20] sm:$0xff] %v713_v41  ;;  %884 = vst [vmem:[#allocation3 + $0x10] sm:$0xff] %v820_v54  ;;  %v823_v17 = vadd.f32 %v822_v16, %v4244_v49 }
 0x17a   : > { %893 = vst [vmem:[#allocation3 + $0x58] sm:$0xff] %v831_v15 }
 0x17b   : > { %v716_v42 = vpop.f32.mrb[4].mxu0  ;;  %887 = vst [vmem:[#allocation3 + $0x28] sm:$0xff] %v823_v17 }
 0x17c   : > { %v717_v56 = vadd.f32 %v716_v42, %v4226_v19  ;;  %v718_v58 = vpop.f32.mrb[5].mxu0 }
 0x17d   : > { %v719_v61 = vadd.f32 %v718_v58, %v4230_v20  ;;  %v720_v63 = vpop.f32.mrb[6].mxu0  ;;  %v3018_v32 = vpop.f32.mrb[4].mxu1 }
 0x17e   : > { %888 = vst [vmem:[#allocation3 + $0x30] sm:$0xff] %v717_v56  ;;  %v721_v48 = vadd.f32 %v720_v63, %v4226_v19  ;;  %v722_v4 = vpop.f32.mrb[7].mxu0  ;;  %v844_v37 = vadd.f32 %v3018_v32, %v4244_v49  ;;  %v835_v41 = vpop.f32.mrb[5].mxu1 }
 0x17f   : > { %889 = vst [vmem:[#allocation3 + $0x38] sm:$0xff] %v719_v61  ;;  %v723_v9 = vadd.f32 %v722_v4, %v4230_v20  ;;  %v836_v3 = vadd.f32 %v835_v41, %v4244_v49  ;;  %v3019_v46 = vpop.f32.mrb[6].mxu1  ;;  %v2404_v61 = vsel %vm2402_vm0, 1, %v3723_v0 }
 0x180   : > { %891 = vst [vmem:[#allocation3 + $0x48] sm:$0xff] %v721_v48  ;;  %902 = vst [vmem:[#allocation3 + $0xa0] sm:$0xff] %v844_v37  ;;  %v847_v42 = vadd.f32 %v3019_v46, %v4244_v49  ;;  %v838_v51 = vpop.f32.mrb[7].mxu1  ;;  %2409 = vperm.xlu1 %3282, %v2404_v61  }
 0x181   : > { %892 = vst [vmem:[#allocation3 + $0x50] sm:$0xff] %v723_v9  ;;  %896 = vst [vmem:[#allocation3 + $0x70] sm:$0xff] %v836_v3  ;;  %v839_v56 = vadd.f32 %v838_v51, %v4244_v49 }
 0x182   : > { %905 = vst [vmem:[#allocation3 + $0xb8] sm:$0xff] %v847_v42 }
 0x183   : > { %v726_v18 = vpop.f32.mrb[8].mxu0  ;;  %899 = vst [vmem:[#allocation3 + $0x88] sm:$0xff] %v839_v56 }
 0x184   : > { %v727_v22 = vadd.f32 %v726_v18, %v4226_v19  ;;  %v728_v23 = vpop.f32.mrb[9].mxu0 }
 0x185   : > { %v729_v60 = vadd.f32 %v728_v23, %v4230_v20  ;;  %v730_v24 = vpop.f32.mrb[10].mxu0  ;;  %v3022_v9 = vpop.f32.mrb[8].mxu1 }
 0x186   : > { %894 = vst [vmem:[#allocation3 + $0x60] sm:$0xff] %v727_v22  ;;  %v731_v27 = vadd.f32 %v730_v24, %v4226_v19  ;;  %v732_v29 = vpop.f32.mrb[11].mxu0  ;;  %v860_v12 = vadd.f32 %v3022_v9, %v4244_v49  ;;  %v851_v13 = vpop.f32.mrb[9].mxu1 }
 0x187   : > { %895 = vst [vmem:[#allocation3 + $0x68] sm:$0xff] %v729_v60  ;;  %v733_v35 = vadd.f32 %v732_v29, %v4230_v20  ;;  %v852_v54 = vadd.f32 %v851_v13, %v4244_v49  ;;  %v3023_v14 = vpop.f32.mrb[10].mxu1 }
 0x188   : > { %897 = vst [vmem:[#allocation3 + $0x78] sm:$0xff] %v731_v27  ;;  %914 = vst [vmem:[#allocation3 + $0x100] sm:$0xff] %v860_v12  ;;  %v863_v15 = vadd.f32 %v3023_v14, %v4244_v49  ;;  %v854_v16 = vpop.f32.mrb[11].mxu1 }
 0x189   : > { %898 = vst [vmem:[#allocation3 + $0x80] sm:$0xff] %v733_v35  ;;  %908 = vst [vmem:[#allocation3 + $0xd0] sm:$0xff] %v852_v54  ;;  %v855_v17 = vadd.f32 %v854_v16, %v4244_v49 }
 0x18a   : > { %917 = vst [vmem:[#allocation3 + $0x118] sm:$0xff] %v863_v15 }
 0x18b   : > { %v736_v58 = vpop.f32.mrb[12].mxu0  ;;  %911 = vst [vmem:[#allocation3 + $0xe8] sm:$0xff] %v855_v17 }
 0x18c   : > { %v737_v63 = vadd.f32 %v736_v58, %v4226_v19  ;;  %v738_v48 = vpop.f32.mrb[13].mxu0 }
 0x18d   : > { %v739_v4 = vadd.f32 %v738_v48, %v4230_v20  ;;  %v740_v38 = vpop.f32.mrb[14].mxu0  ;;  %v3026_v29 = vpop.f32.mrb[12].mxu1 }
 0x18e   : > { %900 = vst [vmem:[#allocation3 + $0x90] sm:$0xff] %v737_v63  ;;  %v741_v8 = vadd.f32 %v740_v38, %v4226_v19  ;;  %v742_v5 = vpop.f32.mrb[15].mxu0  ;;  %v876_v35 = vadd.f32 %v3026_v29, %v4244_v49  ;;  %v867_v37 = vpop.f32.mrb[13].mxu1 }
 0x18f   : > { %901 = vst [vmem:[#allocation3 + $0x98] sm:$0xff] %v739_v4  ;;  %v743_v11 = vadd.f32 %v742_v5, %v4230_v20  ;;  %v868_v41 = vadd.f32 %v867_v37, %v4244_v49  ;;  %v3027_v44 = vpop.f32.mrb[14].mxu1 }
 0x190   : > { %903 = vst [vmem:[#allocation3 + $0xa8] sm:$0xff] %v741_v8  ;;  %926 = vst [vmem:[#allocation3 + $0x160] sm:$0xff] %v876_v35  ;;  %v879_v3 = vadd.f32 %v3027_v44, %v4244_v49  ;;  %v870_v46 = vpop.f32.mrb[15].mxu1 }
 0x191   : > { %904 = vst [vmem:[#allocation3 + $0xb0] sm:$0xff] %v743_v11  ;;  %920 = vst [vmem:[#allocation3 + $0x130] sm:$0xff] %v868_v41  ;;  %v871_v42 = vadd.f32 %v870_v46, %v4244_v49 }
 0x192   : > { %929 = vst [vmem:[#allocation3 + $0x178] sm:$0xff] %v879_v3 }
 0x193   : > { %v746_v18 = vpop.f32.mrb[16].mxu0  ;;  %923 = vst [vmem:[#allocation3 + $0x148] sm:$0xff] %v871_v42 }
 0x194   : > { %v747_v21 = vadd.f32 %v746_v18, %v4226_v19  ;;  %v748_v22 = vpop.f32.mrb[17].mxu0 }
 0x195   : > { %v749_v23 = vadd.f32 %v748_v22, %v4230_v20  ;;  %v750_v60 = vpop.f32.mrb[18].mxu0  ;;  %v1111_v38 = vpop.f32.mrb[16].mxu1 }
 0x196   : > { %906 = vst [vmem:[#allocation3 + $0xc0] sm:$0xff] %v747_v21  ;;  %v751_v24 = vadd.f32 %v750_v60, %v4226_v19  ;;  %v752_v27 = vpop.f32.mrb[19].mxu0  ;;  %v1113_v5 = vpop.f32.mrb[17].mxu1 }
 0x197   : > { %907 = vst [vmem:[#allocation3 + $0xc8] sm:$0xff] %v749_v23  ;;  %v753_v32 = vadd.f32 %v752_v27, %v4230_v20  ;;  %v1115_v49 = vpop.f32.mrb[18].mxu1 }
 0x198   : > { %909 = vst [vmem:[#allocation3 + $0xd8] sm:$0xff] %v751_v24  ;;  %v1117_v9 = vpop.f32.mrb[19].mxu1 }
 0x199   : > { %910 = vst [vmem:[#allocation3 + $0xe0] sm:$0xff] %v753_v32 }
 0x19b   : > { %v756_v51 = vpop.f32.mrb[20].mxu0 }
 0x19c   : > { %v757_v56 = vadd.f32 %v756_v51, %v4226_v19  ;;  %v758_v58 = vpop.f32.mrb[21].mxu0 }
 0x19d   : > { %v759_v61 = vadd.f32 %v758_v58, %v4230_v20  ;;  %v760_v63 = vpop.f32.mrb[22].mxu0 }
 0x19e   : > { %912 = vst [vmem:[#allocation3 + $0xf0] sm:$0xff] %v757_v56  ;;  %v761_v48 = vadd.f32 %v760_v63, %v4226_v19  ;;  %v762_v4 = vpop.f32.mrb[23].mxu0 }
 0x19f   : > { %913 = vst [vmem:[#allocation3 + $0xf8] sm:$0xff] %v759_v61  ;;  %v763_v8 = vadd.f32 %v762_v4, %v4230_v20 }
 0x1a0   : > { %915 = vst [vmem:[#allocation3 + $0x108] sm:$0xff] %v761_v48 }
 0x1a1   : > { %916 = vst [vmem:[#allocation3 + $0x110] sm:$0xff] %v763_v8 }
 0x1a3   : > { %v766_v11 = vpop.f32.mrb[24].mxu0 }
 0x1a4   : > { %v767_v12 = vadd.f32 %v766_v11, %v4226_v19  ;;  %v768_v13 = vpop.f32.mrb[25].mxu0 }
 0x1a5   : > { %v769_v54 = vadd.f32 %v768_v13, %v4230_v20  ;;  %v770_v14 = vpop.f32.mrb[26].mxu0  ;;  %v4315_v13 = vld [vmem:[%s4222_s29 + $0x5] ss:$0 sm:$0xff] }
 0x1a6   : > { %918 = vst [vmem:[#allocation3 + $0x120] sm:$0xff] %v767_v12  ;;  %v771_v15 = vadd.f32 %v770_v14, %v4226_v19  ;;  %v772_v16 = vpop.f32.mrb[27].mxu0 }
 0x1a7   : > { %919 = vst [vmem:[#allocation3 + $0x128] sm:$0xff] %v769_v54  ;;  %v773_v17 = vadd.f32 %v772_v16, %v4230_v20 }
 0x1a8   : > { %921 = vst [vmem:[#allocation3 + $0x138] sm:$0xff] %v771_v15 }
 0x1a9   : > { %922 = vst [vmem:[#allocation3 + $0x140] sm:$0xff] %v773_v17 }
 0x1ab   : > { %v776_v18 = vpop.f32.mrb[28].mxu0 }
 0x1ac   : > { %v777_v21 = vadd.f32 %v776_v18, %v4226_v19  ;;  %v778_v22 = vpop.f32.mrb[29].mxu0 }
 0x1ad   : > { %v779_v23 = vadd.f32 %v778_v22, %v4230_v20  ;;  %v780_v60 = vpop.f32.mrb[30].mxu0 }
 0x1ae   : > { %924 = vst [vmem:[#allocation3 + $0x150] sm:$0xff] %v777_v21  ;;  %v781_v24 = vadd.f32 %v780_v60, %v4226_v19  ;;  %v782_v27 = vpop.f32.mrb[31].mxu0 }
 0x1af   : > { %925 = vst [vmem:[#allocation3 + $0x158] sm:$0xff] %v779_v23  ;;  %v783_v29 = vadd.f32 %v782_v27, %v4230_v20 }
 0x1b0   : > { %927 = vst [vmem:[#allocation3 + $0x168] sm:$0xff] %v781_v24 }
 0x1b1   : > { %928 = vst [vmem:[#allocation3 + $0x170] sm:$0xff] %v783_v29  ;;  %v1212_v29 = vpop.permute.xlu0 %1211 }
 0x1b2   : > { %vm1216_vm1 = vcmp.eq.s32.totalorder %v1212_v29, 1 }
 0x1b3   : > { %v1154_v32 = vpop.f32.mrb[32].mxu0 }
 0x1b4   : > { %v3046_v35 = vpop.f32.mrb[33].mxu0 }
 0x1b5   : > { %v1157_v37 = vpop.f32.mrb[34].mxu0 }
 0x1b6   : > { %v3047_v41 = vpop.f32.mrb[35].mxu0  ;;  %v1190_v16 = vadd.f32 %v4315_v13, %v1157_v37 }
 0x1b8   : > { %v942_v44 = vld [vmem:[%s4308_s12] sm:$0xff]  ;;  %v945_v3 = vld [vmem:[%s4308_s12 + $0x18] sm:$0xff]  ;;  %v943_v46 = vld [vmem:[%s4308_s12 + $0x8] sm:$0xff] }
 0x1b9   : > { %v1161_v19 = vadd.f32 %v1111_v38, %v942_v44  ;;  %v1162_v42 = vadd.f32 %v1115_v49, %v945_v3  ;;  %v946_v56 = vld [vmem:[%s4308_s12 + $0x20] sm:$0xff]  ;;  %v1175_v58 = vadd.f32 %v1113_v5, %v943_v46  ;;  %v944_v18 = vld [vmem:[%s4308_s12 + $0x10] sm:$0xff]  ;;  %v947_v23 = vld [vmem:[%s4308_s12 + $0x28] sm:$0xff] }
 0x1ba   : > { %v1176_v61 = vadd.f32 %v1117_v9, %v946_v56  ;;  %v1189_v9 = vadd.f32 %v4315_v13, %v1154_v32 }
 0x1bb   : > { %v2718_v51 = vmul.f32 -1.442695, %v1161_v19  ;;  %v2719_v20 = vmul.f32 -1.442695, %v1162_v42  ;;  %v2720_v63 = vmul.f32 -1.442695, %v1175_v58 }
 0x1bc   : > { %v2721_v48 = vmul.f32 -1.442695, %v1176_v61 }
 0x1bd   : > { %3355 = vpow2.f32 %v2718_v51  ;;  %v1215_v51 = vpop.permute.xlu0 %1214 }
 0x1be   : > { %3357 = vpow2.f32 %v2719_v20  ;;  %vm1217_vm2 = vcmp.eq.s32.totalorder %v1215_v51, 1 }
 0x1bf   : > { %3359 = vpow2.f32 %v2720_v63  ;;  %vm2902_vm3 = vmpackc.low %vm1217_vm2, %vm1216_vm1 }
 0x1c0   : > { %3361 = vpow2.f32 %v2721_v48 }
 0x1c7   : > { %v3356_v4 = vpop.eup %3355 }
 0x1c8   : > { %v1169_v8 = vadd.f32 1.0, %v3356_v4  ;;  %v3358_v11 = vpop.eup %3357 }
 0x1c9   : > { %v1170_v38 = vadd.f32 1.0, %v3358_v11  ;;  %v3360_v49 = vpop.eup %3359 }
 0x1ca   : > { %3363 = vrcp.f32 %v1169_v8  ;;  %v3362_v12 = vpop.eup %3361  ;;  %v1183_v5 = vadd.f32 1.0, %v3360_v49  ;;  %v2731_v49 = vld [vmem:[%s4368_s13 + $0x50] sm:$0xff] }
 0x1cb   : > { %3365 = vrcp.f32 %v1170_v38  ;;  %v1184_v54 = vadd.f32 1.0, %v3362_v12 }
 0x1cc   : > { %3367 = vrcp.f32 %v1183_v5 }
 0x1cd   : > { %3369 = vrcp.f32 %v1184_v54 }
 0x1d4   : > { %v3364_v14 = vpop.eup %3363 }
 0x1d5   : > { %v1191_v15 = vmul.f32 %v3364_v14, %v1189_v9  ;;  %v3366_v17 = vpop.eup %3365 }
 0x1d6   : > { %v1192_v22 = vmul.f32 %v3366_v17, %v1190_v16  ;;  %v3368_v24 = vpop.eup %3367 }
 0x1d7   : > { %v1193_v21 = vadd.f32 %v1191_v15, %v944_v18  ;;  %v3370_v27 = vpop.eup %3369  ;;  %v1197_v32 = vsub.f32 1.0, %v3368_v24  ;;  %v1201_v41 = vmul.f32 0.0, %v3368_v24 }
 0x1d8   : > { %v1194_v60 = vadd.f32 %v1192_v22, %v947_v23  ;;  %v1198_v44 = vsub.f32 1.0, %v3370_v27  ;;  %v1202_v19 = vmul.f32 0.0, %v3370_v27 }
 0x1d9   : > { %3371 = vtanh.f32 %v1193_v21 }
 0x1da   : > { %3373 = vtanh.f32 %v1194_v60 }
 0x1e3   : > { %v3372_v35 = vpop.eup %3371 }
 0x1e4   : > { %v1199_v3 = vmul.f32 %v3372_v35, %v1197_v32  ;;  %v3374_v37 = vpop.eup %3373  ;;  %v2729_v32 = vld [vmem:[%s4368_s13 + $0x40] sm:$0xff] }
 0x1e5   : > { %v1200_v46 = vmul.f32 %v3374_v37, %v1198_v44  ;;  %v2732_v44 = vld [vmem:[%s4368_s13 + $0x58] sm:$0xff] }
 0x1e6   : > { %v1203_v42 = vadd.f32 %v1201_v41, %v1199_v3 }
 0x1e7   : > { %v1204_v20 = vadd.f32 %v1202_v19, %v1200_v46  ;;  %v1383_v46 = vpop.permute.xlu1 %1382 }
 0x1e8   : > { %v4323_v56 = vsel %vm1216_vm1, %v1203_v42, 0.0  ;;  %vm1387_vm4 = vcmp.eq.s32.totalorder %v1383_v46, 1 }
 0x1e9   : > { %v2903_v58 = vpack.c.bf16 %v1204_v20, %v1203_v42  ;;  %v4328_v61 = vsel %vm1217_vm2, %v1204_v20, 0.0 }
 0x1ea   : > { %v2859_v63 = vpack.c.bf16 %v4328_v61, %v4323_v56 }
 0x1eb   : > { %2904 = vmatmul.mubr.msk.bf16.vlgmr.msra.gmra.mrb[20].mxu1 %vm2902_vm3, %v2903_v58  ;;  %3065 = vmatmul.mubr.msk.bf16.vlgmr.msra.gmra.mrb[36].mxu0 %vm2902_vm3, %v2903_v58 }
 0x1ec   : > { %2860 = vst [vmem:[%s1230_s20] sm:$0xff] %v2859_v63   ;;  %1420 = vmatpush1.bf16.msra.mxu1 %v4028_v33  ;;  %3069 = vmatpush3.bf16.msra.mxu0 %v4006_v26  ;;  %v2727_v26 = vld [vmem:[%s4368_s13 + $0x30] sm:$0xff]  ;;  %s2848_s20 = sshll.u32 %s4088_s10, 3  ;;  %s2782_s10 = smul.u32 4294967152, %s3706_s21 }
 0x1ed   : > { %1421 = vmatprep.subr.bf16.mxu1 %v4033_v34  ;;  %3070 = vmatprep.subr.bf16.mxu0 %v3724_v25  ;;  %s1912_s15 = scalar_lea.vmem %s4325_s25, %s2848_s20 [#allocation10] }
 0x1ee   : > { %1451 = vmatprep.mubr.bf16.mxu1 %v3723_v0  ;;  %3084 = vmatprep.mubr.msk.bf16.mxu0 %vm3726_vm8, %v3724_v25 }
 0x1f0   : > { %1422 = vmatpush1.bf16.msra.mxu1 %v4052_v39  ;;  %3071 = vmatpush3.bf16.msra.mxu0 %v4012_v28  ;;  %v2730_v39 = vld [vmem:[%s4368_s13 + $0x48] sm:$0xff] }
 0x1f1   : > { %1423 = vmatprep.subr.bf16.mxu1 %v4058_v40  ;;  %3072 = vmatprep.subr.bf16.mxu0 %v3724_v25 }
 0x1f4   : > { %1424 = vmatpush1.bf16.msra.mxu1 %v4071_v45  ;;  %3073 = vmatpush3.bf16.msra.mxu0 %v4022_v31 }
 0x1f5   : > { %1425 = vmatprep.subr.bf16.mxu1 %v4079_v47  ;;  %3074 = vmatprep.subr.bf16.mxu0 %v3724_v25 }
 0x1f8   : > { %1426 = vmatpush1.bf16.msra.mxu1 %v4095_v52  ;;  %3075 = vmatpush3.bf16.msra.mxu0 %v4037_v36 }
 0x1f9   : > { %1427 = vmatprep.subr.bf16.mxu1 %v4101_v53  ;;  %3076 = vmatprep.subr.bf16.mxu0 %v3724_v25 }
 0x1fc   : > { %1428 = vmatpush1.bf16.msra.mxu1 %v4115_v57  ;;  %3077 = vmatpush3.bf16.msra.mxu0 %v4064_v43 }
 0x1fd   : > { %1429 = vmatprep.subr.bf16.mxu1 %v4123_v59  ;;  %3078 = vmatprep.subr.bf16.mxu0 %v3724_v25 }
 0x200   : > { %1430 = vmatpush1.bf16.msra.mxu1 %v4137_v1  ;;  %3079 = vmatpush3.bf16.msra.mxu0 %v4085_v50 }
 0x201   : > { %1431 = vmatprep.subr.bf16.mxu1 %v4144_v2  ;;  %3080 = vmatprep.subr.bf16.mxu0 %v3724_v25 }
 0x204   : > { %1432 = vmatpush1.bf16.msra.mxu1 %v4154_v6  ;;  %3081 = vmatpush3.bf16.msra.mxu0 %v4106_v55 }
 0x205   : > { %1433 = vmatprep.subr.bf16.mxu1 %v4162_v7  ;;  %3082 = vmatprep.subr.bf16.mxu0 %v3724_v25 }
 0x208   : > { %1434 = vmatpush1.bf16.msra.mxu1 %v4168_v10  ;;  %3083 = vmatpush3.bf16.msra.mxu0 %v4128_v62 }
 0x209   : > { %1589 = vmatprep.subr.bf16.mxu1 %v4017_v30  ;;  %3088 = vmatprep.subr.bf16.mxu0 %v3724_v25  ;;  %v2728_v30 = vld [vmem:[%s4368_s13 + $0x38] sm:$0xff]  ;;  %s4672_s13 = scalar_lea.vmem [#allocation3], %s2782_s10 }
 0x2be   : > { %v1282_v28 = vpop.f32.mrb[20].mxu1  ;;  %v1325_v31 = vpop.f32.mrb[36].mxu0 }
 0x2bf   : > { %v1332_v33 = vadd.f32 %v2727_v26, %v1282_v28  ;;  %v1284_v34 = vpop.f32.mrb[21].mxu1  ;;  %v3066_v36 = vpop.f32.mrb[37].mxu0  ;;  %v1360_v22 = vadd.f32 %v4315_v13, %v1325_v31 }
 0x2c0   : > { %v1286_v40 = vpop.f32.mrb[22].mxu1  ;;  %v1328_v43 = vpop.f32.mrb[38].mxu0  ;;  %v1346_v11 = vadd.f32 %v2728_v30, %v1284_v34 }
 0x2c1   : > { %v2733_v50 = vmul.f32 -1.442695, %v1332_v33  ;;  %v1333_v48 = vadd.f32 %v2730_v39, %v1286_v40  ;;  %v1288_v4 = vpop.f32.mrb[23].mxu1  ;;  %v3067_v8 = vpop.f32.mrb[39].mxu0  ;;  %v1361_v27 = vadd.f32 %v4315_v13, %v1328_v43 }
 0x2c2   : > { %v1347_v12 = vadd.f32 %v2731_v49, %v1288_v4  ;;  %v2735_v5 = vmul.f32 -1.442695, %v1346_v11  ;;  %v1386_v34 = vpop.permute.xlu1 %1385  ;;  %v4391_v4 = vld [vmem:[%s3997_s24] ss:$12 sps:$4 sm:$0xff]   ;;  %v4407_v8 = vld [vmem:[%s3997_s24 + $0x18] ss:$12 sps:$4 sm:$0xff]  }
 0x2c3   : > { %3375 = vpow2.f32 %v2733_v50  ;;  %v2734_v38 = vmul.f32 -1.442695, %v1333_v48  ;;  %vm1388_vm5 = vcmp.eq.s32.totalorder %v1386_v34, 1  ;;  %v4411_v11 = vld [vmem:[%s3997_s24 + $0x20] ss:$12 sps:$4 sm:$0xff]  }
 0x2c4   : > { %v2736_v54 = vmul.f32 -1.442695, %v1347_v12  ;;  %v4421_v49 = vld [vmem:[%s3997_s24 + $0x38] ss:$12 sps:$4 sm:$0xff]   ;;  %v4428_v12 = vld [vmem:[%s3997_s24 + $0x50] ss:$12 sps:$4 sm:$0xff]  }
 0x2c5   : > { %3377 = vpow2.f32 %v2734_v38  ;;  %v4415_v38 = vld [vmem:[%s3997_s24 + $0x34] ss:$12 sps:$4 sm:$0xff]  }
 0x2c6   : > { %3379 = vpow2.f32 %v2735_v5  ;;  %v2744_v5 = vld [vmem:[%s4459_s30 + $0x68] sm:$0xff] }
 0x2c7   : > { %3381 = vpow2.f32 %v2736_v54 }
 0x2cd   : > { %v3376_v9 = vpop.eup %3375 }
 0x2ce   : > { %v1340_v14 = vadd.f32 1.0, %v3376_v9 }
 0x2cf   : > { %v3378_v15 = vpop.eup %3377 }
 0x2d0   : > { %3383 = vrcp.f32 %v1340_v14  ;;  %v1341_v16 = vadd.f32 1.0, %v3378_v15  ;;  %v3380_v17 = vpop.eup %3379 }
 0x2d1   : > { %v3382_v18 = vpop.eup %3381  ;;  %v1354_v21 = vadd.f32 1.0, %v3380_v17  ;;  %v2747_v17 = vld [vmem:[%s4459_s30 + $0x80] sm:$0xff] }
 0x2d2   : > { %3385 = vrcp.f32 %v1341_v16  ;;  %v1355_v23 = vadd.f32 1.0, %v3382_v18 }
 0x2d3   : > { %3387 = vrcp.f32 %v1354_v21 }
 0x2d4   : > { %3389 = vrcp.f32 %v1355_v23 }
 0x2da   : > { %v3384_v60 = vpop.eup %3383 }
 0x2db   : > { %v1362_v24 = vmul.f32 %v3384_v60, %v1360_v22 }
 0x2dc   : > { %v3386_v29 = vpop.eup %3385 }
 0x2dd   : > { %v1364_v35 = vadd.f32 %v2729_v32, %v1362_v24  ;;  %v1363_v41 = vmul.f32 %v3386_v29, %v1361_v27  ;;  %v3388_v37 = vpop.eup %3387 }
 0x2de   : > { %v3390_v19 = vpop.eup %3389  ;;  %v1368_v42 = vsub.f32 1.0, %v3388_v37  ;;  %v1372_v58 = vmul.f32 %v3388_v37, %v4323_v56 }
 0x2df   : > { %3391 = vtanh.f32 %v1364_v35  ;;  %v1365_v3 = vadd.f32 %v2732_v44, %v1363_v41  ;;  %v1369_v63 = vsub.f32 1.0, %v3390_v19  ;;  %v1373_v33 = vmul.f32 %v3390_v19, %v4328_v61 }
 0x2e1   : > { %3393 = vtanh.f32 %v1365_v3 }
 0x2e9   : > { %v3392_v51 = vpop.eup %3391 }
 0x2ea   : > { %v1370_v20 = vmul.f32 %v3392_v51, %v1368_v42  ;;  %v2745_v42 = vld [vmem:[%s4459_s30 + $0x70] sm:$0xff] }
 0x2eb   : > { %v3394_v26 = vpop.eup %3393 }
 0x2ec   : > { %v1374_v28 = vadd.f32 %v1372_v58, %v1370_v20  ;;  %v1371_v31 = vmul.f32 %v3394_v26, %v1369_v63  ;;  %v2748_v58 = vld [vmem:[%s4459_s30 + $0x88] sm:$0xff] }
 0x2ee   : > { %v1375_v36 = vadd.f32 %v1373_v33, %v1371_v31  ;;  %v1389_v39 = vsel %vm1387_vm4, %v1374_v28, 0.0  ;;  %v4382_v40 = vsel %vm1387_vm4, %v1374_v28, %v4323_v56  ;;  %v4395_v56 = vld [vmem:[%s3997_s24 + $0x8] ss:$12 sps:$4 sm:$0xff]  }
 0x2f0   : > { %v1390_v43 = vsel %vm1388_vm5, %v1375_v36, 0.0  ;;  %v4386_v50 = vsel %vm1388_vm5, %v1375_v36, %v4328_v61  ;;  %v4399_v61 = vld [vmem:[%s3997_s24 + $0x1c] ss:$12 sps:$4 sm:$0xff]  }
 0x2f1   : > { %v2864_v30 = vpack.c.bf16 %v1390_v43, %v1389_v39  ;;  %v1418_v48 = vpack.c.bf16 %v4386_v50, %v4382_v40 }
 0x2f3   : > { %2896 = vst [vmem:[%s2536_s17 + $0x8] sm:$0xff] %v2864_v30   ;;  %1452 = vmatmul.mubr.bf16.vlgmr.msra.gmra.mrb[24].mxu1 %v1418_v48  ;;  %3085 = vmatmul.mubr.bf16.vlgmr.msra.gmra.mrb[40].mxu0 %v1418_v48  ;;  %s2798_s17 = smul.u32 4294967056, %s3706_s21 }
 0x2f4   : > { %1590 = vmatpush1.bf16.msra.mxu1 %v4391_v4  ;;  %3089 = vmatpush3.bf16.msra.mxu0 %v4395_v56 }
 0x2f5   : > { %1591 = vmatprep.subr.bf16.mxu1 %v4399_v61  ;;  %3090 = vmatprep.subr.bf16.mxu0 %v3724_v25  ;;  %s4731_s7 = scalar_lea.vmem [#allocation3], %s2798_s17 }
 0x2f6   : > { %1621 = vmatprep.mubr.bf16.mxu1 %v3723_v0  ;;  %3104 = vmatprep.mubr.msk.bf16.mxu0 %vm3726_vm8, %v3724_v25 }
 0x2f8   : > { %1592 = vmatpush1.bf16.msra.mxu1 %v4407_v8  ;;  %3091 = vmatpush3.bf16.msra.mxu0 %v4411_v11 }
 0x2f9   : > { %1593 = vmatprep.subr.bf16.mxu1 %v4415_v38  ;;  %3092 = vmatprep.subr.bf16.mxu0 %v3724_v25 }
 0x2fc   : > { %1594 = vmatpush1.bf16.msra.mxu1 %v4071_v45  ;;  %3093 = vmatpush3.bf16.msra.mxu0 %v4421_v49  ;;  %v4435_v45 = vld [vmem:[%s3997_s24 + $0x68] ss:$12 sps:$4 sm:$0xff]  }
 0x2fd   : > { %1595 = vmatprep.subr.bf16.mxu1 %v4079_v47  ;;  %3094 = vmatprep.subr.bf16.mxu0 %v3724_v25  ;;  %v4442_v47 = vld [vmem:[%s3997_s24 + $0x80] ss:$12 sps:$4 sm:$0xff]  }
 0x300   : > { %1596 = vmatpush1.bf16.msra.mxu1 %v4095_v52  ;;  %3095 = vmatpush3.bf16.msra.mxu0 %v4428_v12  ;;  %v4454_v52 = vld [vmem:[%s3997_s24 + $0x4] ss:$12 sps:$4 sm:$0xff]  }
 0x301   : > { %1597 = vmatprep.subr.bf16.mxu1 %v4101_v53  ;;  %3096 = vmatprep.subr.bf16.mxu0 %v3724_v25  ;;  %v2743_v53 = vld [vmem:[%s4459_s30 + $0x60] sm:$0xff] }
 0x304   : > { %1598 = vmatpush1.bf16.msra.mxu1 %v4115_v57  ;;  %3097 = vmatpush3.bf16.msra.mxu0 %v4435_v45 }
 0x305   : > { %1599 = vmatprep.subr.bf16.mxu1 %v4123_v59  ;;  %3098 = vmatprep.subr.bf16.mxu0 %v3724_v25 }
 0x308   : > { %1600 = vmatpush1.bf16.msra.mxu1 %v4137_v1  ;;  %3099 = vmatpush3.bf16.msra.mxu0 %v4442_v47 }
 0x309   : > { %1601 = vmatprep.subr.bf16.mxu1 %v4144_v2  ;;  %3100 = vmatprep.subr.bf16.mxu0 %v3724_v25 }
 0x30c   : > { %1602 = vmatpush1.bf16.msra.mxu1 %v4154_v6  ;;  %3101 = vmatpush3.bf16.msra.mxu0 %v4106_v55 }
 0x30d   : > { %1603 = vmatprep.subr.bf16.mxu1 %v4162_v7  ;;  %3102 = vmatprep.subr.bf16.mxu0 %v3724_v25 }
 0x310   : > { %1604 = vmatpush1.bf16.msra.mxu1 %v4168_v10  ;;  %3103 = vmatpush3.bf16.msra.mxu0 %v4128_v62  ;;  %v2746_v62 = vld [vmem:[%s4459_s30 + $0x78] sm:$0xff]  ;;  %s2811_s30 = smul.u32 4294967256, %s3706_s21 }
 0x311   : > { %1759 = vmatprep.subr.bf16.mxu1 %v4454_v52  ;;  %3108 = vmatprep.subr.bf16.mxu0 %v3724_v25 }
 0x312   : > { %s2570_s27 = scalar_lea.vmem %s4325_s25, %s2811_s30 [#allocation10] }
 0x3c6   : > { %v1453_v55 = vpop.f32.mrb[24].mxu1  ;;  %v1496_v57 = vpop.f32.mrb[40].mxu0 }
 0x3c7   : > { %v1503_v59 = vadd.f32 %v2743_v53, %v1453_v55  ;;  %v1455_v1 = vpop.f32.mrb[25].mxu1  ;;  %v3086_v2 = vpop.f32.mrb[41].mxu0  ;;  %v1531_v41 = vadd.f32 %v4315_v13, %v1496_v57 }
 0x3c8   : > { %v1457_v6 = vpop.f32.mrb[26].mxu1  ;;  %v1499_v7 = vpop.f32.mrb[42].mxu0  ;;  %v1517_v15 = vadd.f32 %v2744_v5, %v1455_v1  ;;  %v4503_v5 = vld [vmem:[%s3997_s24 + $0x48] ss:$12 sps:$4 sm:$0xff]  }
 0x3c9   : > { %v2749_v10 = vmul.f32 -1.442695, %v1503_v59  ;;  %v1504_v54 = vadd.f32 %v2746_v62, %v1457_v6  ;;  %v1459_v9 = vpop.f32.mrb[27].mxu1  ;;  %v3087_v14 = vpop.f32.mrb[43].mxu0  ;;  %v1532_v19 = vadd.f32 %v4315_v13, %v1499_v7 }
 0x3ca   : > { %v1518_v18 = vadd.f32 %v2747_v17, %v1459_v9  ;;  %v2751_v21 = vmul.f32 -1.442695, %v1517_v15  ;;  %v1554_v55 = vpop.permute.xlu0 %1553  ;;  %v1557_v57 = vpop.permute.xlu1 %1556  ;;  %v4513_v9 = vld [vmem:[%s3997_s24 + $0x60] ss:$12 sps:$4 sm:$0xff]   ;;  %v4518_v14 = vld [vmem:[%s3997_s24 + $0x7c] ss:$12 sps:$4 sm:$0xff]  }
 0x3cb   : > { %3395 = vpow2.f32 %v2749_v10  ;;  %v2750_v16 = vmul.f32 -1.442695, %v1504_v54  ;;  %vm1558_vm6 = vcmp.eq.s32.totalorder %v1554_v55, 1  ;;  %vm1559_vm7 = vcmp.eq.s32.totalorder %v1557_v57, 1  ;;  %v4508_v54 = vld [vmem:[%s3997_s24 + $0x64] ss:$12 sps:$4 sm:$0xff]  }
 0x3cc   : > { %v2752_v22 = vmul.f32 -1.442695, %v1518_v18  ;;  %v4523_v15 = vld [vmem:[%s3997_s24 + $0x78] ss:$12 sps:$4 sm:$0xff]   ;;  %v4533_v17 = vld [vmem:[%s3997_s24 + $0x90] ss:$12 sps:$4 sm:$0xff]  }
 0x3cd   : > { %3397 = vpow2.f32 %v2750_v16  ;;  %v4528_v16 = vld [vmem:[%s3997_s24 + $0x94] ss:$12 sps:$4 sm:$0xff]   ;;  %v4537_v18 = vld [vmem:[%s3997_s24 + $0x98] ss:$12 sps:$4 sm:$0xff]  }
 0x3ce   : > { %3399 = vpow2.f32 %v2751_v21  ;;  %v4541_v21 = vld [vmem:[%s3997_s24 + $0xac] ss:$12 sps:$4 sm:$0xff]  }
 0x3cf   : > { %3401 = vpow2.f32 %v2752_v22  ;;  %v4546_v22 = vld [vmem:[%s3997_s24 + $0xa8] ss:$12 sps:$4 sm:$0xff]  }
 0x3d5   : > { %v3396_v23 = vpop.eup %3395 }
 0x3d6   : > { %v1511_v60 = vadd.f32 1.0, %v3396_v23  ;;  %v4550_v23 = vld [vmem:[%s3997_s24 + $0xb0] ss:$12 sps:$4 sm:$0xff]  }
 0x3d7   : > { %v3398_v24 = vpop.eup %3397 }
 0x3d8   : > { %3403 = vrcp.f32 %v1511_v60  ;;  %v1512_v27 = vadd.f32 1.0, %v3398_v24  ;;  %v3400_v29 = vpop.eup %3399  ;;  %v2758_v60 = vld [vmem:[%s4556_s14 + $0x90] sm:$0xff] }
 0x3d9   : > { %v3402_v32 = vpop.eup %3401  ;;  %v1525_v35 = vadd.f32 1.0, %v3400_v29 }
 0x3da   : > { %3405 = vrcp.f32 %v1512_v27  ;;  %v1526_v44 = vadd.f32 1.0, %v3402_v32 }
 0x3db   : > { %3407 = vrcp.f32 %v1525_v35 }
 0x3dc   : > { %3409 = vrcp.f32 %v1526_v44 }
 0x3e2   : > { %v3404_v3 = vpop.eup %3403 }
 0x3e3   : > { %v1533_v37 = vmul.f32 %v3404_v3, %v1531_v41  ;;  %v2761_v41 = vld [vmem:[%s4556_s14 + $0xa8] sm:$0xff] }
 0x3e4   : > { %v3406_v46 = vpop.eup %3405 }
 0x3e5   : > { %v1535_v51 = vadd.f32 %v2745_v42, %v1533_v37  ;;  %v1534_v20 = vmul.f32 %v3406_v46, %v1532_v19  ;;  %v3408_v26 = vpop.eup %3407  ;;  %v2759_v19 = vld [vmem:[%s4556_s14 + $0x98] sm:$0xff] }
 0x3e6   : > { %v3410_v28 = vpop.eup %3409  ;;  %v1539_v31 = vsub.f32 1.0, %v3408_v26  ;;  %v1543_v34 = vmul.f32 %v3408_v26, %v4382_v40 }
 0x3e7   : > { %3411 = vtanh.f32 %v1535_v51  ;;  %v1536_v63 = vadd.f32 %v2748_v58, %v1534_v20  ;;  %v1540_v36 = vsub.f32 1.0, %v3410_v28  ;;  %v1544_v30 = vmul.f32 %v3410_v28, %v4386_v50 }
 0x3e9   : > { %3413 = vtanh.f32 %v1536_v63  ;;  %v2762_v63 = vld [vmem:[%s4556_s14 + $0xb0] sm:$0xff] }
 0x3f1   : > { %v3412_v33 = vpop.eup %3411 }
 0x3f2   : > { %v1541_v39 = vmul.f32 %v3412_v33, %v1539_v31 }
 0x3f3   : > { %v3414_v43 = vpop.eup %3413 }
 0x3f4   : > { %v1542_v48 = vmul.f32 %v3414_v43, %v1540_v36  ;;  %v1545_v53 = vadd.f32 %v1543_v34, %v1541_v39 }
 0x3f6   : > { %v1546_v59 = vadd.f32 %v1544_v30, %v1542_v48  ;;  %v1560_v1 = vsel %vm1558_vm6, %v1545_v53, 0.0  ;;  %v4474_v62 = vsel %vm1558_vm6, %v1545_v53, %v4382_v40  ;;  %v4493_v40 = vld [vmem:[%s3997_s24 + $0x30] ss:$12 sps:$4 sm:$0xff]  }
 0x3f8   : > { %v1561_v2 = vsel %vm1559_vm7, %v1546_v59, 0.0  ;;  %v4477_v6 = vsel %vm1559_vm7, %v1546_v59, %v4386_v50  ;;  %v4498_v50 = vld [vmem:[%s3997_s24 + $0x4c] ss:$12 sps:$4 sm:$0xff]   ;;  %s2770_s24 = sshll.u32 %s3706_s21, 3 }
 0x3f9   : > { %v2869_v7 = vpack.c.bf16 %v1561_v2, %v1560_v1  ;;  %v1588_v10 = vpack.c.bf16 %v4477_v6, %v4474_v62  ;;  %s2550_s12 = scalar_lea.vmem %s4325_s25, %s2770_s24 [#allocation10]  ;;  %s2855_s24 = sshll.u32 %s3706_s21, 10 }
 0x3fb   : > { %2897 = vst [vmem:[%s2544_s26 + $0x10] sm:$0xff] %v2869_v7   ;;  %1622 = vmatmul.mubr.bf16.vlgmr.msra.gmra.mrb[28].mxu1 %v1588_v10  ;;  %3105 = vmatmul.mubr.bf16.vlgmr.msra.gmra.mrb[44].mxu0 %v1588_v10  ;;  %v2760_v7 = vld [vmem:[%s4556_s14 + $0xa0] sm:$0xff]  ;;  %s2814_s26 = smul.u32 4294966960, %s3706_s21 }
 0x3fc   : > { %1760 = vmatpush1.bf16.msra.mxu1 %v4391_v4  ;;  %3109 = vmatpush3.bf16.msra.mxu0 %v4395_v56 }
 0x3fd   : > { %1761 = vmatprep.subr.bf16.mxu1 %v4399_v61  ;;  %3110 = vmatprep.subr.bf16.mxu0 %v3724_v25  ;;  %s4751_s28 = scalar_lea.vmem [#allocation3], %s2814_s26 }
 0x3fe   : > { %1791 = vmatprep.mubr.bf16.mxu1 %v3723_v0  ;;  %3124 = vmatprep.mubr.msk.bf16.mxu0 %vm3726_vm8, %v3724_v25 }
 0x400   : > { %1762 = vmatpush1.bf16.msra.mxu1 %v4407_v8  ;;  %3111 = vmatpush3.bf16.msra.mxu0 %v4411_v11 }
 0x401   : > { %1763 = vmatprep.subr.bf16.mxu1 %v4415_v38  ;;  %3112 = vmatprep.subr.bf16.mxu0 %v3724_v25 }
 0x404   : > { %1764 = vmatpush1.bf16.msra.mxu1 %v4493_v40  ;;  %3113 = vmatpush3.bf16.msra.mxu0 %v4421_v49 }
 0x405   : > { %1765 = vmatprep.subr.bf16.mxu1 %v4498_v50  ;;  %3114 = vmatprep.subr.bf16.mxu0 %v3724_v25 }
 0x408   : > { %1766 = vmatpush1.bf16.msra.mxu1 %v4503_v5  ;;  %3115 = vmatpush3.bf16.msra.mxu0 %v4428_v12 }
 0x409   : > { %1767 = vmatprep.subr.bf16.mxu1 %v4508_v54  ;;  %3116 = vmatprep.subr.bf16.mxu0 %v3724_v25 }
 0x40c   : > { %1768 = vmatpush1.bf16.msra.mxu1 %v4513_v9  ;;  %3117 = vmatpush3.bf16.msra.mxu0 %v4435_v45 }
 0x40d   : > { %1769 = vmatprep.subr.bf16.mxu1 %v4518_v14  ;;  %3118 = vmatprep.subr.bf16.mxu0 %v3724_v25 }
 0x410   : > { %1770 = vmatpush1.bf16.msra.mxu1 %v4523_v15  ;;  %3119 = vmatpush3.bf16.msra.mxu0 %v4442_v47 }
 0x411   : > { %1771 = vmatprep.subr.bf16.mxu1 %v4528_v16  ;;  %3120 = vmatprep.subr.bf16.mxu0 %v3724_v25 }
 0x414   : > { %1772 = vmatpush1.bf16.msra.mxu1 %v4533_v17  ;;  %3121 = vmatpush3.bf16.msra.mxu0 %v4537_v18 }
 0x415   : > { %1773 = vmatprep.subr.bf16.mxu1 %v4541_v21  ;;  %3122 = vmatprep.subr.bf16.mxu0 %v3724_v25 }
 0x418   : > { %1774 = vmatpush1.bf16.msra.mxu1 %v4546_v22  ;;  %3123 = vmatpush3.bf16.msra.mxu0 %v4550_v23 }
 0x419   : > { %1930 = vmatprep.subr.bf16.mxu1 %v4454_v52  ;;  %3128 = vmatprep.subr.bf16.mxu0 %v3724_v25 }
 0x4ce   : > { %v1623_v24 = vpop.f32.mrb[28].mxu1  ;;  %v1666_v27 = vpop.f32.mrb[44].mxu0 }
 0x4cf   : > { %v1673_v29 = vadd.f32 %v2758_v60, %v1623_v24  ;;  %v1625_v32 = vpop.f32.mrb[29].mxu1  ;;  %v3106_v35 = vpop.f32.mrb[45].mxu0  ;;  %v1701_v53 = vadd.f32 %v4315_v13, %v1666_v27  ;;  %v2763_v24 = vld [vmem:[%s4556_s14 + $0xb8] sm:$0xff]  ;;  %s2827_s14 = smul.u32 4294967240, %s3706_s21 }
 0x4d0   : > { %v1627_v44 = vpop.f32.mrb[30].mxu1  ;;  %v1669_v3 = vpop.f32.mrb[46].mxu0  ;;  %v1687_v20 = vadd.f32 %v2759_v19, %v1625_v32 }
 0x4d1   : > { %v2764_v37 = vmul.f32 -1.442695, %v1673_v29  ;;  %v1674_v46 = vadd.f32 %v2761_v41, %v1627_v44  ;;  %v1629_v42 = vpop.f32.mrb[31].mxu1  ;;  %v3107_v51 = vpop.f32.mrb[47].mxu0  ;;  %v1702_v1 = vadd.f32 %v4315_v13, %v1669_v3  ;;  %s2578_s11 = scalar_lea.vmem %s4325_s25, %s2827_s14 [#allocation10] }
 0x4d2   : > { %v1688_v26 = vadd.f32 %v2762_v63, %v1629_v42  ;;  %v2766_v28 = vmul.f32 -1.442695, %v1687_v20  ;;  %v1724_v20 = vpop.permute.xlu0 %1723 }
 0x4d3   : > { %3415 = vpow2.f32 %v2764_v37  ;;  %v2765_v58 = vmul.f32 -1.442695, %v1674_v46  ;;  %vm1728_vm9 = vcmp.eq.s32.totalorder %v1724_v20, 1 }
 0x4d4   : > { %v2767_v31 = vmul.f32 -1.442695, %v1688_v26 }
 0x4d5   : > { %3417 = vpow2.f32 %v2765_v58  ;;  %v1727_v58 = vpop.permute.xlu1 %1726 }
 0x4d6   : > { %3419 = vpow2.f32 %v2766_v28  ;;  %vm1729_vm10 = vcmp.eq.s32.totalorder %v1727_v58, 1 }
 0x4d7   : > { %3421 = vpow2.f32 %v2767_v31 }
 0x4dd   : > { %v3416_v33 = vpop.eup %3415 }
 0x4de   : > { %v1681_v34 = vadd.f32 1.0, %v3416_v33 }
 0x4df   : > { %v3418_v36 = vpop.eup %3417 }
 0x4e0   : > { %3423 = vrcp.f32 %v1681_v34  ;;  %v1682_v39 = vadd.f32 1.0, %v3418_v36  ;;  %v3420_v43 = vpop.eup %3419 }
 0x4e1   : > { %v3422_v30 = vpop.eup %3421  ;;  %v1695_v48 = vadd.f32 1.0, %v3420_v43 }
 0x4e2   : > { %3425 = vrcp.f32 %v1682_v39  ;;  %v1696_v55 = vadd.f32 1.0, %v3422_v30  ;;  %v1753_v30 = vld [vmem:[%s4614_s16 + $0x8] sm:$0xff] }
 0x4e3   : > { %3427 = vrcp.f32 %v1695_v48 }
 0x4e4   : > { %3429 = vrcp.f32 %v1696_v55 }
 0x4ea   : > { %v3424_v57 = vpop.eup %3423 }
 0x4eb   : > { %v1703_v59 = vmul.f32 %v3424_v57, %v1701_v53  ;;  %v1755_v57 = vld [vmem:[%s4614_s16 + $0x18] sm:$0xff] }
 0x4ec   : > { %v3426_v2 = vpop.eup %3425 }
 0x4ed   : > { %v1705_v10 = vadd.f32 %v2760_v7, %v1703_v59  ;;  %v1704_v60 = vmul.f32 %v3426_v2, %v1702_v1  ;;  %v3428_v32 = vpop.eup %3427 }
 0x4ee   : > { %v3430_v35 = vpop.eup %3429  ;;  %v1709_v41 = vsub.f32 1.0, %v3428_v32  ;;  %v1713_v44 = vmul.f32 %v3428_v32, %v4474_v62 }
 0x4ef   : > { %3431 = vtanh.f32 %v1705_v10  ;;  %v1706_v29 = vadd.f32 %v2763_v24, %v1704_v60  ;;  %v1710_v37 = vsub.f32 1.0, %v3430_v35  ;;  %v1714_v46 = vmul.f32 %v3430_v35, %v4477_v6  ;;  %v1756_v10 = vld [vmem:[%s4614_s16 + $0x20] sm:$0xff] }
 0x4f1   : > { %3433 = vtanh.f32 %v1706_v29 }
 0x4f9   : > { %v3432_v27 = vpop.eup %3431 }
 0x4fa   : > { %v1711_v19 = vmul.f32 %v3432_v27, %v1709_v41 }
 0x4fb   : > { %v3434_v3 = vpop.eup %3433 }
 0x4fc   : > { %v1712_v42 = vmul.f32 %v3434_v3, %v1710_v37  ;;  %v1715_v51 = vadd.f32 %v1713_v44, %v1711_v19 }
 0x4fe   : > { %v1716_v63 = vadd.f32 %v1714_v46, %v1712_v42  ;;  %v1730_v26 = vsel %vm1728_vm9, %v1715_v51, 0.0  ;;  %v4571_v31 = vsel %vm1728_vm9, %v1715_v51, %v4474_v62  ;;  %v1752_v62 = vld [vmem:[%s4614_s16] sm:$0xff] }
 0x500   : > { %v1731_v28 = vsel %vm1729_vm10, %v1716_v63, 0.0  ;;  %v4574_v33 = vsel %vm1729_vm10, %v1716_v63, %v4477_v6 }
 0x501   : > { %v2874_v34 = vpack.c.bf16 %v1731_v28, %v1730_v26  ;;  %v1758_v36 = vpack.c.bf16 %v4574_v33, %v4571_v31 }
 0x503   : > { %2898 = vst [vmem:[%s2550_s12 + $0x18] sm:$0xff] %v2874_v34   ;;  %1792 = vmatmul.mubr.bf16.vlgmr.msra.gmra.mrb[32].mxu1 %v1758_v36  ;;  %3125 = vmatmul.mubr.bf16.vlgmr.msra.gmra.mrb[48].mxu0 %v1758_v36  ;;  %v1754_v34 = vld [vmem:[%s4614_s16 + $0x10] sm:$0xff]  ;;  %s2453_s12 = sshll.u32 %s4325_s25, 4  ;;  %s4771_s12 = int_to_ptr.vmem [resolvable:$true] %s2453_s12 }
 0x504   : > { %1931 = vmatpush1.bf16.msra.mxu1 %v4391_v4  ;;  %3129 = vmatpush3.bf16.msra.mxu0 %v4395_v56  ;;  %s3628_s10 = scalar_lea.vmem %s4771_s12, 1024 }
 0x505   : > { %1932 = vmatprep.subr.bf16.mxu1 %v4399_v61  ;;  %3130 = vmatprep.subr.bf16.mxu0 %v3724_v25  ;;  %p3629_p2 = scmp.ne.s32.totalorder %s4771_s12, %s3628_s10 }
 0x506   : > { %1962 = vmatprep.mubr.bf16.mxu1 %v3723_v0  ;;  %3144 = vmatprep.mubr.msk.bf16.mxu0 %vm3726_vm8, %v3724_v25 }
 0x507   : > { %p3630_p11 = pnand %p3629_p2, %p4864_p13 }
 0x508   : > { %1933 = vmatpush1.bf16.msra.mxu1 %v4407_v8  ;;  %3131 = vmatpush3.bf16.msra.mxu0 %v4411_v11 }
 0x509   : > { %1934 = vmatprep.subr.bf16.mxu1 %v4415_v38  ;;  %3132 = vmatprep.subr.bf16.mxu0 %v3724_v25  ;;  %p3631_p1 = pneg %p3630_p11 }
 0x50c   : > { %1935 = vmatpush1.bf16.msra.mxu1 %v4493_v40  ;;  %3133 = vmatpush3.bf16.msra.mxu0 %v4421_v49 }
 0x50d   : > { %1936 = vmatprep.subr.bf16.mxu1 %v4498_v50  ;;  %3134 = vmatprep.subr.bf16.mxu0 %v3724_v25 }
 0x510   : > { %1937 = vmatpush1.bf16.msra.mxu1 %v4503_v5  ;;  %3135 = vmatpush3.bf16.msra.mxu0 %v4428_v12 }
 0x511   : > { %1938 = vmatprep.subr.bf16.mxu1 %v4508_v54  ;;  %3136 = vmatprep.subr.bf16.mxu0 %v3724_v25 }
 0x514   : > { %1939 = vmatpush1.bf16.msra.mxu1 %v4513_v9  ;;  %3137 = vmatpush3.bf16.msra.mxu0 %v4435_v45 }
 0x515   : > { %1940 = vmatprep.subr.bf16.mxu1 %v4518_v14  ;;  %3138 = vmatprep.subr.bf16.mxu0 %v3724_v25 }
 0x518   : > { %1941 = vmatpush1.bf16.msra.mxu1 %v4523_v15  ;;  %3139 = vmatpush3.bf16.msra.mxu0 %v4442_v47 }
 0x519   : > { %1942 = vmatprep.subr.bf16.mxu1 %v4528_v16  ;;  %3140 = vmatprep.subr.bf16.mxu0 %v3724_v25 }
 0x51c   : > { %1943 = vmatpush1.bf16.msra.mxu1 %v4533_v17  ;;  %3141 = vmatpush3.bf16.msra.mxu0 %v4537_v18 }
 0x51d   : > { %1944 = vmatprep.subr.bf16.mxu1 %v4541_v21  ;;  %3142 = vmatprep.subr.bf16.mxu0 %v3724_v25 }
 0x520   : > { %1945 = vmatpush1.bf16.msra.mxu1 %v4546_v22  ;;  %3143 = vmatpush3.bf16.msra.mxu0 %v4550_v23 }
 0x521   : > { %2101 = vmatprep.subr.bf16.mxu1 %v4454_v52  ;;  %3148 = vmatprep.subr.bf16.mxu0 %v3724_v25 }
 0x5d6   : > { %v1793_v6 = vpop.f32.mrb[32].mxu1  ;;  %v1836_v39 = vpop.f32.mrb[48].mxu0 }
 0x5d7   : > { %v1843_v43 = vadd.f32 %v1793_v6, %v1752_v62  ;;  %v1795_v48 = vpop.f32.mrb[33].mxu1  ;;  %v3126_v53 = vpop.f32.mrb[49].mxu0  ;;  %v1871_v51 = vadd.f32 %v4315_v13, %v1836_v39  ;;  %v1757_v6 = vld [vmem:[%s4614_s16 + $0x28] sm:$0xff] }
 0x5d8   : > { %v1857_v55 = vadd.f32 %v1795_v48, %v1753_v30  ;;  %v1797_v59 = vpop.f32.mrb[34].mxu1  ;;  %v1839_v1 = vpop.f32.mrb[50].mxu0 }
 0x5d9   : > { %v2774_v2 = vmul.f32 -1.442695, %v1843_v43  ;;  %v1844_v7 = vadd.f32 %v1797_v59, %v1755_v57  ;;  %v1799_v60 = vpop.f32.mrb[35].mxu1  ;;  %v3127_v24 = vpop.f32.mrb[51].mxu0  ;;  %v1872_v26 = vadd.f32 %v4315_v13, %v1839_v1 }
 0x5da   : > { %v1858_v29 = vadd.f32 %v1799_v60, %v1756_v10  ;;  %v2776_v35 = vmul.f32 -1.442695, %v1857_v55  ;;  %v1894_v10 = vpop.permute.xlu0 %1893  ;;  %v1897_v60 = vpop.permute.xlu1 %1896 }
 0x5db   : > { %3435 = vpow2.f32 %v2774_v2  ;;  %v2775_v32 = vmul.f32 -1.442695, %v1844_v7  ;;  %vm1898_vm11 = vcmp.eq.s32.totalorder %v1894_v10, 1  ;;  %vm1899_vm12 = vcmp.eq.s32.totalorder %v1897_v60, 1 }
 0x5dc   : > { %v2777_v41 = vmul.f32 -1.442695, %v1858_v29 }
 0x5dd   : > { %3437 = vpow2.f32 %v2775_v32 }
 0x5de   : > { %3439 = vpow2.f32 %v2776_v35 }
 0x5df   : > { %3441 = vpow2.f32 %v2777_v41 }
 0x5e5   : > { %v3436_v27 = vpop.eup %3435 }
 0x5e6   : > { %v1851_v44 = vadd.f32 1.0, %v3436_v27 }
 0x5e7   : > { %v3438_v37 = vpop.eup %3437 }
 0x5e8   : > { %3443 = vrcp.f32 %v1851_v44  ;;  %v1852_v19 = vadd.f32 1.0, %v3438_v37  ;;  %v3440_v3 = vpop.eup %3439 }
 0x5e9   : > { %v3442_v46 = vpop.eup %3441  ;;  %v1865_v42 = vadd.f32 1.0, %v3440_v3 }
 0x5ea   : > { %3445 = vrcp.f32 %v1852_v19  ;;  %v1866_v20 = vadd.f32 1.0, %v3442_v46 }
 0x5eb   : > { %3447 = vrcp.f32 %v1865_v42  ;;  %v2786_v42 = vld [vmem:[%s4672_s13 + $0x108] sm:$0xff] }
 0x5ec   : > { %3449 = vrcp.f32 %v1866_v20 }
 0x5f2   : > { %v3444_v58 = vpop.eup %3443 }
 0x5f3   : > { %v1873_v63 = vmul.f32 %v3444_v58, %v1871_v51 }
 0x5f4   : > { %v3446_v28 = vpop.eup %3445 }
 0x5f5   : > { %v1875_v36 = vadd.f32 %v1873_v63, %v1754_v34  ;;  %v1874_v62 = vmul.f32 %v3446_v28, %v1872_v26  ;;  %v3448_v30 = vpop.eup %3447 }
 0x5f6   : > { %v3450_v48 = vpop.eup %3449  ;;  %v1879_v39 = vsub.f32 1.0, %v3448_v30  ;;  %v1883_v55 = vmul.f32 %v3448_v30, %v4571_v31 }
 0x5f7   : > { %3451 = vtanh.f32 %v1875_v36  ;;  %v1876_v43 = vadd.f32 %v1874_v62, %v1757_v6  ;;  %v1880_v57 = vsub.f32 1.0, %v3450_v48  ;;  %v1884_v1 = vmul.f32 %v3450_v48, %v4574_v33  ;;  %v2787_v62 = vld [vmem:[%s4672_s13 + $0x110] sm:$0xff] }
 0x5f9   : > { %3453 = vtanh.f32 %v1876_v43 }
 0x601   : > { %v3452_v53 = vpop.eup %3451 }
 0x602   : > { %v1881_v59 = vmul.f32 %v3452_v53, %v1879_v39 }
 0x603   : > { %v3454_v13 = vpop.eup %3453 }
 0x604   : > { %v1882_v2 = vmul.f32 %v3454_v13, %v1880_v57  ;;  %v1885_v7 = vadd.f32 %v1883_v55, %v1881_v59 }
 0x606   : > { %v1886_v24 = vadd.f32 %v1884_v1, %v1882_v2  ;;  %v1900_v29 = vsel %vm1898_vm11, %v1885_v7, 0.0  ;;  %v4629_v35 = vsel %vm1898_vm11, %v1885_v7, %v4571_v31  ;;  %v2783_v31 = vld [vmem:[%s4672_s13 + $0xf0] sm:$0xff]  ;;  %v4679_v1 = vld [vmem:[%s4222_s29 + $0x5] ss:$0 sm:$0xff]  ;;  %s2795_s29 = smul.u32 4294967272, %s3706_s21  ;;  %s2433_s21 = scalar_lea.sflag [#allocation6], %s3963_s2 }
 0x608   : > { %v1901_v32 = vsel %vm1899_vm12, %v1886_v24, 0.0  ;;  %v4632_v41 = vsel %vm1899_vm12, %v1886_v24, %v4574_v33  ;;  %s2562_s9 = scalar_lea.vmem %s4325_s25, %s2795_s29 [#allocation10]  ;;  %s3727_s25 = smov [#allocation10]  }
 0x609   : > { %v2879_v27 = vpack.c.bf16 %v1901_v32, %v1900_v29  ;;  %v1929_v44 = vpack.c.bf16 %v4632_v41, %v4629_v35  ;;  %v2785_v32 = vld [vmem:[%s4672_s13 + $0x100] sm:$0xff] }
 0x60b   : > { %2880 = vst [vmem:[%s1912_s15] sm:$0xff] %v2879_v27   ;;  %1963 = vmatmul.mubr.bf16.vlgmr.msra.gmra.mrb[36].mxu1 %v1929_v44  ;;  %3145 = vmatmul.mubr.bf16.vlgmr.msra.gmra.mrb[52].mxu0 %v1929_v44  ;;  %s4769_s15 = scalar_lea.hbm %s4825_s5, %s2855_s24 }
 0x60c   : > { %2102 = vmatpush1.bf16.msra.mxu1 %v4391_v4  ;;  %3149 = vmatpush3.bf16.msra.mxu0 %v4395_v56 }
 0x60d   : > { %2103 = vmatprep.subr.bf16.mxu1 %v4399_v61  ;;  %3150 = vmatprep.subr.bf16.mxu0 %v3724_v25 }
 0x60e   : > { %2133 = vmatprep.mubr.bf16.mxu1 %v3723_v0  ;;  %3164 = vmatprep.mubr.msk.bf16.mxu0 %vm3726_vm8, %v3724_v25 }
 0x610   : > { %2104 = vmatpush1.bf16.msra.mxu1 %v4407_v8  ;;  %3151 = vmatpush3.bf16.msra.mxu0 %v4411_v11 }
 0x611   : > { %2105 = vmatprep.subr.bf16.mxu1 %v4415_v38  ;;  %3152 = vmatprep.subr.bf16.mxu0 %v3724_v25 }
 0x614   : > { %2106 = vmatpush1.bf16.msra.mxu1 %v4493_v40  ;;  %3153 = vmatpush3.bf16.msra.mxu0 %v4421_v49 }
 0x615   : > { %2107 = vmatprep.subr.bf16.mxu1 %v4498_v50  ;;  %3154 = vmatprep.subr.bf16.mxu0 %v3724_v25 }
 0x618   : > { %2108 = vmatpush1.bf16.msra.mxu1 %v4503_v5  ;;  %3155 = vmatpush3.bf16.msra.mxu0 %v4428_v12 }
 0x619   : > { %2109 = vmatprep.subr.bf16.mxu1 %v4508_v54  ;;  %3156 = vmatprep.subr.bf16.mxu0 %v3724_v25 }
 0x61c   : > { %2110 = vmatpush1.bf16.msra.mxu1 %v4513_v9  ;;  %3157 = vmatpush3.bf16.msra.mxu0 %v4435_v45 }
 0x61d   : > { %2111 = vmatprep.subr.bf16.mxu1 %v4518_v14  ;;  %3158 = vmatprep.subr.bf16.mxu0 %v3724_v25 }
 0x620   : > { %2112 = vmatpush1.bf16.msra.mxu1 %v4523_v15  ;;  %3159 = vmatpush3.bf16.msra.mxu0 %v4442_v47 }
 0x621   : > { %2113 = vmatprep.subr.bf16.mxu1 %v4528_v16  ;;  %3160 = vmatprep.subr.bf16.mxu0 %v3724_v25 }
 0x624   : > { %2114 = vmatpush1.bf16.msra.mxu1 %v4533_v17  ;;  %3161 = vmatpush3.bf16.msra.mxu0 %v4537_v18 }
 0x625   : > { %2115 = vmatprep.subr.bf16.mxu1 %v4541_v21  ;;  %3162 = vmatprep.subr.bf16.mxu0 %v3724_v25 }
 0x628   : > { %2116 = vmatpush1.bf16.msra.mxu1 %v4546_v22  ;;  %3163 = vmatpush3.bf16.msra.mxu0 %v4550_v23 }
 0x629   : > { %2272 = vmatprep.subr.bf16.mxu1 %v4454_v52  ;;  %3168 = vmatprep.subr.bf16.mxu0 %v3724_v25  ;;  %v2784_v52 = vld [vmem:[%s4672_s13 + $0xf8] sm:$0xff] }
 0x6de   : > { %v1964_v33 = vpop.f32.mrb[36].mxu1  ;;  %v2007_v37 = vpop.f32.mrb[52].mxu0 }
 0x6df   : > { %v2014_v19 = vadd.f32 %v2783_v31, %v1964_v33  ;;  %v1966_v3 = vpop.f32.mrb[37].mxu1  ;;  %v3146_v46 = vpop.f32.mrb[53].mxu0  ;;  %v2042_v2 = vadd.f32 %v4679_v1, %v2007_v37  ;;  %v2788_v31 = vld [vmem:[%s4672_s13 + $0x118] sm:$0xff]  ;;  %s3632_s13 = sshll.u32 %s3727_s25, 4  ;;  %s3633_s13 = int_to_ptr.vmem [resolvable:$false] %s3632_s13 }
 0x6e0   : > { %v1968_v51 = vpop.f32.mrb[38].mxu1  ;;  %v2010_v20 = vpop.f32.mrb[54].mxu0  ;;  %v2028_v34 = vadd.f32 %v2784_v52, %v1966_v3  ;;  %s3634_s29 = scalar_lea.vmem %s3633_s13, 2048  ;;  %p3635_p8 = scmp.lt.s32.totalorder %s4771_s12, %s3633_s13 }
 0x6e1   : > { %v2789_v58 = vmul.f32 -1.442695, %v2014_v19  ;;  %v2015_v63 = vadd.f32 %v2786_v42, %v1968_v51  ;;  %v1970_v26 = vpop.f32.mrb[39].mxu1  ;;  %v3147_v28 = vpop.f32.mrb[55].mxu0  ;;  %v2043_v24 = vadd.f32 %v4679_v1, %v2010_v20  ;;  %p3636_p4 = scmp.lt.s32.totalorder %s3634_s29, %s3628_s10 }
 0x6e2   : > { %v2029_v6 = vadd.f32 %v2787_v62, %v1970_v26  ;;  %v2791_v43 = vmul.f32 -1.442695, %v2028_v34  ;;  %v2065_v28 = vpop.permute.xlu0 %2064  ;;  %v2068_v34 = vpop.permute.xlu1 %2067 }
 0x6e3   : > { %3455 = vpow2.f32 %v2789_v58  ;;  %v2790_v36 = vmul.f32 -1.442695, %v2015_v63  ;;  %vm2069_vm13 = vcmp.eq.s32.totalorder %v2065_v28, 1  ;;  %vm2070_vm14 = vcmp.eq.s32.totalorder %v2068_v34, 1  ;;  %p3637_p9 = por %p3636_p4, %p3635_p8 }
 0x6e4   : > { %v2792_v30 = vmul.f32 -1.442695, %v2029_v6 }
 0x6e5   : > { %3457 = vpow2.f32 %v2790_v36  ;;  %p3638_p3 = pnand %p3637_p9, %p3631_p1 }
 0x6e6   : > { %3459 = vpow2.f32 %v2791_v43 }
 0x6e7   : > { %3461 = vpow2.f32 %v2792_v30 }
 0x6ed   : > { %v3456_v48 = vpop.eup %3455 }
 0x6ee   : > { %v2022_v39 = vadd.f32 1.0, %v3456_v48 }
 0x6ef   : > { %v3458_v53 = vpop.eup %3457 }
 0x6f0   : > { %3463 = vrcp.f32 %v2022_v39  ;;  %v2023_v55 = vadd.f32 1.0, %v3458_v53  ;;  %v3460_v57 = vpop.eup %3459 }
 0x6f1   : > { %v3462_v59 = vpop.eup %3461  ;;  %v2036_v13 = vadd.f32 1.0, %v3460_v57 }
 0x6f2   : > { %3465 = vrcp.f32 %v2023_v55  ;;  %v2037_v7 = vadd.f32 1.0, %v3462_v59 }
 0x6f3   : > { %3467 = vrcp.f32 %v2036_v13 }
 0x6f4   : > { %3469 = vrcp.f32 %v2037_v7  ;;  %v2801_v7 = vld [vmem:[%s4731_s7 + $0x130] sm:$0xff] }
 0x6fa   : > { %v3464_v10 = vpop.eup %3463 }
 0x6fb   : > { %v2044_v60 = vmul.f32 %v3464_v10, %v2042_v2 }
 0x6fc   : > { %v3466_v29 = vpop.eup %3465 }
 0x6fd   : > { %v2046_v27 = vadd.f32 %v2785_v32, %v2044_v60  ;;  %v2045_v44 = vmul.f32 %v3466_v29, %v2043_v24  ;;  %v3468_v19 = vpop.eup %3467  ;;  %v2804_v24 = vld [vmem:[%s4731_s7 + $0x148] sm:$0xff] }
 0x6fe   : > { %v3470_v3 = vpop.eup %3469  ;;  %v2050_v37 = vsub.f32 1.0, %v3468_v19  ;;  %v2054_v42 = vmul.f32 %v3468_v19, %v4629_v35 }
 0x6ff   : > { %3471 = vtanh.f32 %v2046_v27  ;;  %v2047_v33 = vadd.f32 %v2788_v31, %v2045_v44  ;;  %v2051_v51 = vsub.f32 1.0, %v3470_v3  ;;  %v2055_v52 = vmul.f32 %v3470_v3, %v4632_v41 }
 0x701   : > { %3473 = vtanh.f32 %v2047_v33 }
 0x709   : > { %v3472_v46 = vpop.eup %3471 }
 0x70a   : > { %v2052_v58 = vmul.f32 %v3472_v46, %v2050_v37 }
 0x70b   : > { %v3474_v20 = vpop.eup %3473 }
 0x70c   : > { %v2053_v63 = vmul.f32 %v3474_v20, %v2051_v51  ;;  %v2056_v26 = vadd.f32 %v2054_v42, %v2052_v58  ;;  %v2236_v58 = vpop.permute.xlu0 %2235  ;;  %v2239_v20 = vpop.permute.xlu1 %2238 }
 0x70d   : > { %vm2241_vm15 = vcmp.eq.s32.totalorder %v2239_v20, 1 }
 0x70e   : > { %v2057_v36 = vadd.f32 %v2055_v52, %v2053_v63  ;;  %v2071_v62 = vsel %vm2069_vm13, %v2056_v26, 0.0  ;;  %v4690_v43 = vsel %vm2069_vm13, %v2056_v26, %v4629_v35 }
 0x710   : > { %v2072_v6 = vsel %vm2070_vm14, %v2057_v36, 0.0  ;;  %v4693_v30 = vsel %vm2070_vm14, %v2057_v36, %v4632_v41 }
 0x711   : > { %v2884_v48 = vpack.c.bf16 %v2072_v6, %v2071_v62  ;;  %v2100_v39 = vpack.c.bf16 %v4693_v30, %v4690_v43  ;;  %v2815_v6 = vld [vmem:[%s4751_s28 + $0x150] sm:$0xff] }
 0x713   : > { %2134 = vmatmul.mubr.bf16.vlgmr.msra.gmra.mrb[40].mxu1 %v2100_v39  ;;  %2899 = vst [vmem:[%s2562_s9 + $0x28] sm:$0xff] %v2884_v48   ;;  %3165 = vmatmul.mubr.bf16.vlgmr.msra.gmra.mrb[56].mxu0 %v2100_v39 }
 0x714   : > { %2273 = vmatpush1.bf16.msra.mxu1 %v4391_v4  ;;  %3169 = vmatpush3.bf16.msra.mxu0 %v4395_v56 }
 0x715   : > { %2274 = vmatprep.subr.bf16.mxu1 %v4399_v61  ;;  %3170 = vmatprep.subr.bf16.mxu0 %v3724_v25 }
 0x716   : > { %2304 = vmatprep.mubr.bf16.mxu1 %v3723_v0  ;;  %3184 = vmatprep.mubr.msk.bf16.mxu0 %vm3726_vm8, %v3724_v25  ;;  %v2799_v0 = vld [vmem:[%s4731_s7 + $0x120] sm:$0xff]  ;;  %vm2240_vm8 = vcmp.eq.s32.totalorder %v2236_v58, 1 }
 0x718   : > { %2275 = vmatpush1.bf16.msra.mxu1 %v4407_v8  ;;  %3171 = vmatpush3.bf16.msra.mxu0 %v4411_v11 }
 0x719   : > { %2276 = vmatprep.subr.bf16.mxu1 %v4415_v38  ;;  %3172 = vmatprep.subr.bf16.mxu0 %v3724_v25  ;;  %v2802_v38 = vld [vmem:[%s4731_s7 + $0x138] sm:$0xff] }
 0x71c   : > { %2277 = vmatpush1.bf16.msra.mxu1 %v4493_v40  ;;  %3173 = vmatpush3.bf16.msra.mxu0 %v4421_v49 }
 0x71d   : > { %2278 = vmatprep.subr.bf16.mxu1 %v4498_v50  ;;  %3174 = vmatprep.subr.bf16.mxu0 %v3724_v25 }
 0x720   : > { %2279 = vmatpush1.bf16.msra.mxu1 %v4503_v5  ;;  %3175 = vmatpush3.bf16.msra.mxu0 %v4428_v12 }
 0x721   : > { %2280 = vmatprep.subr.bf16.mxu1 %v4508_v54  ;;  %3176 = vmatprep.subr.bf16.mxu0 %v3724_v25 }
 0x724   : > { %2281 = vmatpush1.bf16.msra.mxu1 %v4513_v9  ;;  %3177 = vmatpush3.bf16.msra.mxu0 %v4435_v45  ;;  %v2800_v45 = vld [vmem:[%s4731_s7 + $0x128] sm:$0xff]  ;;  %v2803_v9 = vld [vmem:[%s4731_s7 + $0x140] sm:$0xff] }
 0x725   : > { %2282 = vmatprep.subr.bf16.mxu1 %v4518_v14  ;;  %3178 = vmatprep.subr.bf16.mxu0 %v3724_v25 }
 0x728   : > { %2283 = vmatpush1.bf16.msra.mxu1 %v4523_v15  ;;  %3179 = vmatpush3.bf16.msra.mxu0 %v4442_v47 }
 0x729   : > { %2284 = vmatprep.subr.bf16.mxu1 %v4528_v16  ;;  %3180 = vmatprep.subr.bf16.mxu0 %v3724_v25 }
 0x72c   : > { %2285 = vmatpush1.bf16.msra.mxu1 %v4533_v17  ;;  %3181 = vmatpush3.bf16.msra.mxu0 %v4537_v18 }
 0x72d   : > { %2286 = vmatprep.subr.bf16.mxu1 %v4541_v21  ;;  %3182 = vmatprep.subr.bf16.mxu0 %v3724_v25 }
 0x730   : > { %2287 = vmatpush1.bf16.msra.mxu1 %v4546_v22  ;;  %3183 = vmatpush3.bf16.msra.mxu0 %v4550_v23 }
 0x7e6   : > { %v2135_v4 = vpop.f32.mrb[40].mxu1  ;;  %v2178_v56 = vpop.f32.mrb[56].mxu0 }
 0x7e7   : > { %v2185_v61 = vadd.f32 %v2799_v0, %v2135_v4  ;;  %v2137_v8 = vpop.f32.mrb[41].mxu1  ;;  %v3166_v11 = vpop.f32.mrb[57].mxu0  ;;  %v2213_v53 = vadd.f32 %v4679_v1, %v2178_v56  ;;  %v2818_v4 = vld [vmem:[%s4751_s28 + $0x168] sm:$0xff] }
 0x7e8   : > { %v2139_v49 = vpop.f32.mrb[42].mxu1  ;;  %v2181_v25 = vpop.f32.mrb[58].mxu0  ;;  %v2199_v5 = vadd.f32 %v2800_v45, %v2137_v8  ;;  %v2816_v11 = vld [vmem:[%s4751_s28 + $0x158] sm:$0xff] }
 0x7e9   : > { %v2805_v12 = vmul.f32 -1.442695, %v2185_v61  ;;  %v2186_v47 = vadd.f32 %v2802_v38, %v2139_v49  ;;  %v2141_v40 = vpop.f32.mrb[43].mxu1  ;;  %v3167_v50 = vpop.f32.mrb[59].mxu0  ;;  %v2214_v13 = vadd.f32 %v4679_v1, %v2181_v25 }
 0x7ea   : > { %v2200_v14 = vadd.f32 %v2803_v9, %v2141_v40  ;;  %v2807_v15 = vmul.f32 -1.442695, %v2199_v5 }
 0x7eb   : > { %3475 = vpow2.f32 %v2805_v12  ;;  %v2806_v54 = vmul.f32 -1.442695, %v2186_v47  ;;  %v2819_v47 = vld [vmem:[%s4751_s28 + $0x170] sm:$0xff] }
 0x7ec   : > { %v2808_v16 = vmul.f32 -1.442695, %v2200_v14 }
 0x7ed   : > { %3477 = vpow2.f32 %v2806_v54 }
 0x7ee   : > { %3479 = vpow2.f32 %v2807_v15 }
 0x7ef   : > { %3481 = vpow2.f32 %v2808_v16 }
 0x7f5   : > { %v3476_v17 = vpop.eup %3475 }
 0x7f6   : > { %v2193_v18 = vadd.f32 1.0, %v3476_v17 }
 0x7f7   : > { %v3478_v21 = vpop.eup %3477 }
 0x7f8   : > { %3483 = vrcp.f32 %v2193_v18  ;;  %v2194_v22 = vadd.f32 1.0, %v3478_v21  ;;  %v3480_v23 = vpop.eup %3479 }
 0x7f9   : > { %v3482_v35 = vpop.eup %3481  ;;  %v2207_v41 = vadd.f32 1.0, %v3480_v23 }
 0x7fa   : > { %3485 = vrcp.f32 %v2194_v22  ;;  %v2208_v55 = vadd.f32 1.0, %v3482_v35 }
 0x7fb   : > { %3487 = vrcp.f32 %v2207_v41 }
 0x7fc   : > { %3489 = vrcp.f32 %v2208_v55  ;;  %v2817_v55 = vld [vmem:[%s4751_s28 + $0x160] sm:$0xff] }
 0x802   : > { %v3484_v57 = vpop.eup %3483 }
 0x803   : > { %v2215_v59 = vmul.f32 %v3484_v57, %v2213_v53 }
 0x804   : > { %v3486_v2 = vpop.eup %3485 }
 0x805   : > { %v2217_v10 = vadd.f32 %v2801_v7, %v2215_v59  ;;  %v2216_v60 = vmul.f32 %v3486_v2, %v2214_v13  ;;  %v3488_v32 = vpop.eup %3487  ;;  %v2820_v13 = vld [vmem:[%s4751_s28 + $0x178] sm:$0xff] }
 0x806   : > { %v3490_v27 = vpop.eup %3489  ;;  %v2221_v44 = vsub.f32 1.0, %v3488_v32  ;;  %v2225_v3 = vmul.f32 %v3488_v32, %v4690_v43 }
 0x807   : > { %3491 = vtanh.f32 %v2217_v10  ;;  %v2218_v29 = vadd.f32 %v2804_v24, %v2216_v60  ;;  %v2222_v33 = vsub.f32 1.0, %v3490_v27  ;;  %v2226_v42 = vmul.f32 %v3490_v27, %v4693_v30 }
 0x809   : > { %3493 = vtanh.f32 %v2218_v29 }
 0x811   : > { %v3492_v31 = vpop.eup %3491 }
 0x812   : > { %v2223_v19 = vmul.f32 %v3492_v31, %v2221_v44  ;;  %v2407_v44 = vpop.permute.xlu0 %2406  ;;  %v2410_v31 = vpop.permute.xlu1 %2409 }
 0x813   : > { %v3494_v37 = vpop.eup %3493  ;;  %vm2411_vm0 = vcmp.eq.s32.totalorder %v2407_v44, 1  ;;  %vm2412_vm1 = vcmp.eq.s32.totalorder %v2410_v31, 1 }
 0x814   : > { %v2224_v46 = vmul.f32 %v3494_v37, %v2222_v33  ;;  %v2227_v51 = vadd.f32 %v2225_v3, %v2223_v19 }
 0x816   : > { %v2228_v52 = vadd.f32 %v2226_v42, %v2224_v46  ;;  %v2242_v63 = vsel %vm2240_vm8, %v2227_v51, 0.0  ;;  %v2257_v28 = vsel %vm2240_vm8, %v2227_v51, %v4690_v43 }
 0x818   : > { %v2243_v26 = vsel %vm2241_vm15, %v2228_v52, 0.0  ;;  %v4747_v34 = vsel %vm2241_vm15, %v2228_v52, %v4693_v30 }
 0x819   : > { %v2889_v36 = vpack.c.bf16 %v2243_v26, %v2242_v63  ;;  %v2271_v62 = vpack.c.bf16 %v4747_v34, %v2257_v28 }
 0x81b   : > { %2305 = vmatmul.mubr.bf16.vlgmr.msra.gmra.mrb[44].mxu1 %v2271_v62  ;;  %2900 = vst [vmem:[%s2570_s27 + $0x30] sm:$0xff] %v2889_v36   ;;  %3185 = vmatmul.mubr.bf16.vlgmr.msra.gmra.mrb[60].mxu0 %v2271_v62 }
 0x8ee   : > { %v2306_v48 = vpop.f32.mrb[44].mxu1  ;;  %v2349_v39 = vpop.f32.mrb[60].mxu0 }
 0x8ef   : > { %v2356_v43 = vadd.f32 %v2815_v6, %v2306_v48  ;;  %v2308_v0 = vpop.f32.mrb[45].mxu1  ;;  %v3186_v30 = vpop.f32.mrb[61].mxu0  ;;  %v2384_v21 = vadd.f32 %v4679_v1, %v2349_v39 }
 0x8f0   : > { %v2310_v56 = vpop.f32.mrb[46].mxu1  ;;  %v2352_v61 = vpop.f32.mrb[62].mxu0  ;;  %v2370_v12 = vadd.f32 %v2816_v11, %v2308_v0 }
 0x8f1   : > { %v2821_v8 = vmul.f32 -1.442695, %v2356_v43  ;;  %v2357_v38 = vadd.f32 %v2818_v4, %v2310_v56  ;;  %v2312_v49 = vpop.f32.mrb[47].mxu1  ;;  %v3187_v25 = vpop.f32.mrb[63].mxu0  ;;  %v2385_v41 = vadd.f32 %v4679_v1, %v2352_v61 }
 0x8f2   : > { %v2371_v40 = vadd.f32 %v2819_v47, %v2312_v49  ;;  %v2823_v50 = vmul.f32 -1.442695, %v2370_v12 }
 0x8f3   : > { %3495 = vpow2.f32 %v2821_v8  ;;  %v2822_v45 = vmul.f32 -1.442695, %v2357_v38 }
 0x8f4   : > { %v2824_v5 = vmul.f32 -1.442695, %v2371_v40 }
 0x8f5   : > { %3497 = vpow2.f32 %v2822_v45 }
 0x8f6   : > { %3499 = vpow2.f32 %v2823_v50 }
 0x8f7   : > { %3501 = vpow2.f32 %v2824_v5 }
 0x8fd   : > { %v3496_v54 = vpop.eup %3495 }
 0x8fe   : > { %v2364_v9 = vadd.f32 1.0, %v3496_v54 }
 0x8ff   : > { %v3498_v14 = vpop.eup %3497 }
 0x900   : > { %3503 = vrcp.f32 %v2364_v9  ;;  %v2365_v15 = vadd.f32 1.0, %v3498_v14  ;;  %v3500_v16 = vpop.eup %3499 }
 0x901   : > { %v3502_v17 = vpop.eup %3501  ;;  %v2378_v18 = vadd.f32 1.0, %v3500_v16 }
 0x902   : > { %3505 = vrcp.f32 %v2365_v15  ;;  %v2379_v22 = vadd.f32 1.0, %v3502_v17 }
 0x903   : > { %3507 = vrcp.f32 %v2378_v18 }
 0x904   : > { %3509 = vrcp.f32 %v2379_v22 }
 0x90a   : > { %v3504_v23 = vpop.eup %3503 }
 0x90b   : > { %v2386_v35 = vmul.f32 %v3504_v23, %v2384_v21 }
 0x90c   : > { %v3506_v53 = vpop.eup %3505 }
 0x90d   : > { %v2388_v57 = vadd.f32 %v2817_v55, %v2386_v35  ;;  %v2387_v59 = vmul.f32 %v3506_v53, %v2385_v41  ;;  %v3508_v7 = vpop.eup %3507 }
 0x90e   : > { %v3510_v10 = vpop.eup %3509  ;;  %v2392_v60 = vsub.f32 1.0, %v3508_v7  ;;  %v2396_v32 = vmul.f32 %v3508_v7, %v2257_v28 }
 0x90f   : > { %3511 = vtanh.f32 %v2388_v57  ;;  %v2389_v2 = vadd.f32 %v2820_v13, %v2387_v59  ;;  %v2393_v1 = vsub.f32 1.0, %v3510_v10  ;;  %v2397_v3 = vmul.f32 %v3510_v10, %v4747_v34 }
 0x911   : > { %3513 = vtanh.f32 %v2389_v2 }
 0x919   : > { %v3512_v24 = vpop.eup %3511 }
 0x91a   : > { %v2394_v29 = vmul.f32 %v3512_v24, %v2392_v60 }
 0x91b   : > { %v3514_v27 = vpop.eup %3513 }
 0x91c   : > { %v2398_v33 = vadd.f32 %v2396_v32, %v2394_v29  ;;  %v2395_v19 = vmul.f32 %v3514_v27, %v2393_v1 }
 0x91e   : > { %v2399_v37 = vadd.f32 %v2397_v3, %v2395_v19  ;;  %v2413_v46 = vsel %vm2411_vm0, %v2398_v33, 0.0 }
 0x920   : > { %v2414_v42 = vsel %vm2412_vm1, %v2399_v37, 0.0 }
 0x921   : > { %v2894_v51 = vpack.c.bf16 %v2414_v42, %v2413_v46 }
 0x923   : > { %2901 = vst [vmem:[%s2578_s11 + $0x38] sm:$0xff] %v2894_v51  }
 0x924   : > { %3641 = shalt.err (!%p3638_p3)
}
 0x925   : > { %s3642_s9 = scalar_lea.hbm %s4769_s15, 1024  ;;  %s3646_s30 = scalar_lea.hbm %s4825_s5, 2048 }
 0x926   : > { %p3643_p6 = scmp.ne.s32.totalorder %s4769_s15, %s3642_s9  ;;  %p3647_p10 = scmp.lt.u32.totalorder %s4769_s15, %s4825_s5 }
 0x927   : > { %p3648_p0 = scmp.lt.u32.totalorder %s3646_s30, %s3642_s9  ;;  %p3650_p2 = scmp.lt.u32.totalorder %s3642_s9, %s4769_s15 }
 0x928   : > { %p3644_p7 = pnand %p3643_p6, %p4864_p13 }
 0x929   : > { %p3649_p5 = por %p3648_p0, %p3647_p10 }
 0x92a   : > { %p3645_p12 = pneg %p3644_p7 }
 0x92b   : > { %p3651_p11 = por %p3650_p2, %p3649_p5 }
 0x92d   : > { %p3652_p1 = pnand %p3651_p11, %p3645_p12 }
 0x92f   : > { %3655 = shalt.err (!%p3652_p1)
}
 0x930   : > { %s3728_s28 = smov 64   ;;  %s3729_s14 = smov 4  }
 0x931   : > { %3202 = dma.vmem_to_hbm [thread:$0]  (%p4864_p13), %s4771_s12, 1024, %s4769_s15, %s2433_s21, %s3728_s28, %s3728_s28, %s3729_s14  }
 0x932 PF: > { %s2468_s24 = sand.u32 1, %s3694_s18   ;;  %p4865_p8 = scmp.ne.s32.totalorder %s4846_s8, 0 }
 0x933   : > { %p4866_p4 = scmp.ge.s32.totalorder %s3714_s23, 2  ;;  %s2469_s11 = scalar_lea.sflag [#allocation6], %s2468_s24 }
 0x935   : > { %p3215_p9 = pnand %p4866_p4, %p4865_p8 }
 0x937   : > { %3689 = dma.done.wait (!%p3215_p9), %s2469_s11, 1024  }
 0x938   : > { %3691 = vsyncadd (!%p3215_p9), %s2469_s11, 4294966272  ;;  %s24_s23 = sadd.s32 1, %s3714_s23   ;;  %s4867_s16 = sld [smem:[#allocation14_spill]] }
 0x939   : > { %p21_p3 = scmp.ge.s32.totalorder %s24_s23, 4   ;;  %s4868_s20 = sld [smem:[#allocation16_spill]] }
 0x93a   : > { %s4869_s6 = sld [smem:[#allocation15_spill]]  ;;  %s4870_s18 = smov %s3698_s19 }
 0x93b   : > { %s4872_s21 = smov %s3710_s22  ;;  %23 = sbr.rel (!%p21_p3) target bundleno = 10 (0xa), region = 132 }
 0x93e   : > { %s4871_s19 = smov %s4867_s16 }
 0x940   : > { %s4873_s22 = smov %s4869_s6 }
 0x942   :  { %2474 = vsyncpa [#allocation5], 1 }
 0x943   :  { %2476 = vsyncpa [#allocation5 + $0x1], 1 }
 0x944   :  { %2477 = vsyncpa [#allocation8], 1 }
 0x945   :  { %2479 = vsyncpa [#allocation8 + $0x1], 1 }
 0x946   :  { %2480 = vsyncpa [#allocation6], 1 }
 0x947   :  { %2482 = vsyncpa [#allocation6 + $0x1], 1 }

</bundles_post_ra>
